<compile_context>
chip_gen: v7x
topology: tpu7x:2x2x1
jax: 0.10.0
libtpu: 0.0.40
codegen_flags: <defaults>
</compile_context>

<pallas_src>
import jax
import jax.numpy as jnp
from jax.experimental import pallas as pl
from jax.experimental.pallas import tpu as pltpu


_VOCAB = 21        # 20 amino acids + padding token 0
_VOCAB_PAD = 32    # pad the one-hot contraction dim to a sublane multiple
_NUM_INPUTS = 13
_CHUNK = 4         # steps per fori_loop chunk for long sequences
_UNROLL_T = 16     # fully unroll the time loop up to this many steps


# ----------------------------------------------------------------------------
# Fused Pallas kernel
# ----------------------------------------------------------------------------
def _fused_forward_kernel(
    # token ids (time-major, flattened); pep ids pre-shifted by +_VOCAB_PAD
    tcr_ids_ref, pep_ids_ref,
    # per-lane last-step index map (B, 2H): [tcr_len-1 | pep_len-1]
    last_idx_ref,
    # fused 2-branch, 2-layer LSTM params (gate columns interleaved, g pre-x2)
    proj0_ref, b0_ref, whh0_ref, wih1_ref, whh1_ref, b1_ref,
    # MLP head
    m_w1_ref, m_b1_ref, m_w2_ref, m_b2_ref,
    # output
    out_ref,
    # scratch: hoisted layer-0 input projections, all timesteps, both branches
    g0_scr,
):
    f32 = jnp.float32
    bf16 = jnp.bfloat16
    B = out_ref.shape[0]
    H2 = whh0_ref.shape[0]          # 2 * lstm_dim  (tcr | pep lanes)
    G = g0_scr.shape[1]             # 8 * lstm_dim  (interleaved gates)
    V2 = proj0_ref.shape[0]         # 2 * _VOCAB_PAD
    n = tcr_ids_ref.shape[0]
    T = n // B

    # --- hoisted: embedding + layer-0 input projection, all timesteps, both
    #     branches, in ONE one-hot matmul; bias folded in -----------------------
    iota = jax.lax.broadcasted_iota(jnp.int32, (n, V2), 1)
    onehot = jnp.logical_or(tcr_ids_ref[...] == iota,
                            pep_ids_ref[...] == iota).astype(f32)
    g0_scr[...] = (
        jnp.dot(onehot, proj0_ref[...], preferred_element_type=f32) + b0_ref[...]
    )

    # --- loop-invariant hoists (recurrent weights kept bf16 for the MXU) -------
    whh0 = whh0_ref[...]
    wih1 = wih1_ref[...]
    whh1 = whh1_ref[...]
    b1 = jnp.broadcast_to(b1_ref[...], (B, G))
    last_idx = last_idx_ref[...]

    def cell(gates, c_prev):
        # One sigmoid over the full (B, 8H) gate width; g-gate columns were
        # pre-scaled by 2, so tanh(z_g) = 2*sigmoid(2 z_g) - 1 = 2*s_g - 1.
        # Column layout: [i_t|i_p, f_t|f_p, g_t|g_p, o_t|o_p], each 2H wide.
        s = jax.nn.sigmoid(gates)
        i = s[:, 0 * H2:1 * H2]
        f = s[:, 1 * H2:2 * H2]
        g = 2.0 * s[:, 2 * H2:3 * H2] - 1.0
        o = s[:, 3 * H2:4 * H2]
        c = f * c_prev + i * g
        h = o * jnp.tanh(c)
        return h, c

    def step(t, state):
        h0, c0, h1, c1, last = state
        row = t * B
        if not isinstance(t, int):
            row = pl.multiple_of(row, B)
        # layer 0: hoisted input projection + ONE block-diag recurrent dot
        g0 = g0_scr[pl.ds(row, B), :] + jnp.dot(
            h0.astype(bf16), whh0, preferred_element_type=f32)
        h0, c0 = cell(g0, c0)
        # layer 1: two block-diag dots, no per-step concat (dropout = identity)
        g1 = (jnp.dot(h0.astype(bf16), wih1, preferred_element_type=f32)
              + jnp.dot(h1.astype(bf16), whh1, preferred_element_type=f32)
              + b1)
        h1, c1 = cell(g1, c1)
        # last-valid-step selection kept in registers (per-lane index map)
        last = jnp.where(last_idx == t, h1, last)
        return (h0, c0, h1, c1, last)

    zeros = jnp.zeros((B, H2), f32)
    state = (zeros, zeros, zeros, zeros, zeros)

    if T <= _UNROLL_T:
        # Small T: fully unrolled static loop.
        for t in range(T):
            state = step(t, state)
    else:
        # Long T: chunked fori_loop bounds vreg live ranges (T padded to _CHUNK
        # multiples by the wrapper; padded steps process token 0 and are never
        # selected, so they are harmless).
        def chunk_body(ci, st):
            for off in range(_CHUNK):
                st = step(ci * _CHUNK + off, st)
            return st
        state = jax.lax.fori_loop(0, T // _CHUNK, chunk_body, state)

    last = state[4]                         # (B, 2H) = [h1_tcr_last | h1_pep_last]

    # --- MLP head: Linear(2H->H), LeakyReLU(0.01), dropout=id, Linear(H->1),
    #               sigmoid ----------------------------------------------------
    h = jnp.dot(last, m_w1_ref[...], preferred_element_type=f32) + m_b1_ref[...]
    h = jnp.where(h > 0, h, 0.01 * h)
    y = jnp.dot(h, m_w2_ref[...], preferred_element_type=f32) + m_b2_ref[...]
    out_ref[...] = jax.nn.sigmoid(y)


# ----------------------------------------------------------------------------
# Wrapper
# ----------------------------------------------------------------------------
_VMEM = pl.BlockSpec(memory_space=pltpu.MemorySpace.VMEM)


@jax.jit
def double_lstm_classifier_forward(params, tcrs, tcr_lens, peps, pep_lens):
    B = tcrs.shape[0]
    b_pad = -(-B // 16) * 16                 # 16-sublane align for bf16 operands
    # TODO(synk): at real inference batch sizes, tile the batch into >=128-row
    #             blocks via a grid axis instead of padding a tiny batch.
    Tt, Tp = tcrs.shape[1], peps.shape[1]
    T = max(Tt, Tp)
    T_pad = T if T <= _UNROLL_T else -(-T // _CHUNK) * _CHUNK
    H = params["mlp"]["w2"].shape[0]         # lstm_dim

    def prep_ids(ids, T_in, shift):
        ids = jnp.pad(ids.astype(jnp.int32), ((0, b_pad - B), (0, T_pad - T_in)))
        # time-major flattened: row index = t * b_pad + b; padding is token 0,
        # which maps to the zero embedding row (harmless, never selected).
        return jnp.transpose(ids, (1, 0)).reshape(T_pad * b_pad, 1) + shift

    def prep_last_idx(t_lens, p_lens):
        t_lens = jnp.pad(t_lens.astype(jnp.int32), (0, b_pad - B),
                         constant_values=1)
        p_lens = jnp.pad(p_lens.astype(jnp.int32), (0, b_pad - B),
                         constant_values=1)
        t_col = jnp.broadcast_to((t_lens - 1)[:, None], (b_pad, H))
        p_col = jnp.broadcast_to((p_lens - 1)[:, None], (b_pad, H))
        return jnp.concatenate([t_col, p_col], axis=1)   # (b_pad, 2H) i32

    fp, mp = params["fused"], params["mlp"]

    out = pl.pallas_call(
        _fused_forward_kernel,
        out_shape=jax.ShapeDtypeStruct((b_pad, 1), jnp.float32),
        in_specs=[_VMEM] * _NUM_INPUTS,
        out_specs=_VMEM,
        scratch_shapes=[
            pltpu.VMEM((T_pad * b_pad, 8 * H), jnp.float32),
        ],
    )(prep_ids(tcrs, Tt, 0), prep_ids(peps, Tp, _VOCAB_PAD),
      prep_last_idx(tcr_lens, pep_lens),
      fp["proj0"], fp["b0"], fp["whh0"], fp["wih1"], fp["whh1"], fp["b1"],
      mp["w1"], mp["b1"], mp["w2"], mp["b2"])
    return out[:B]


# ----------------------------------------------------------------------------
# Deterministic parameter init (PyTorch-style shapes / scales, pre-packed)
# ----------------------------------------------------------------------------
def _uniform(key, shape, scale):
    return jax.random.uniform(key, shape, jnp.float32, -scale, scale)


def _init_lstm2_raw(key, input_dim, H):
    ks = jax.random.split(key, 8)
    s = 1.0 / jnp.sqrt(H)
    return dict(
        w_ih_l0=_uniform(ks[0], (4 * H, input_dim), s),
        w_hh_l0=_uniform(ks[1], (4 * H, H), s),
        b_l0=_uniform(ks[2], (4 * H,), s) + _uniform(ks[3], (4 * H,), s),
        w_ih_l1=_uniform(ks[4], (4 * H, H), s),
        w_hh_l1=_uniform(ks[5], (4 * H, H), s),
        b_l1=_uniform(ks[6], (4 * H,), s) + _uniform(ks[7], (4 * H,), s),
    )


def _interleave_gates(w_t, w_p, H):
    """Block-diagonal, gate-interleaved packing.

    w_t, w_p: (K_t, 4H) / (K_p, 4H) with PyTorch gate column order i,f,g,o.
    Returns (K_t + K_p, 8H) with columns [i_t,i_p,f_t,f_p,g_t,g_p,o_t,o_p]:
    rows 0:K_t carry tcr weights (even H-blocks), rows K_t: carry pep (odd).
    """
    Kt = w_t.shape[0]
    out = jnp.zeros((Kt + w_p.shape[0], 8 * H), jnp.float32)
    for gi in range(4):
        out = out.at[:Kt, (2 * gi) * H:(2 * gi + 1) * H].set(
            w_t[:, gi * H:(gi + 1) * H])
        out = out.at[Kt:, (2 * gi + 1) * H:(2 * gi + 2) * H].set(
            w_p[:, gi * H:(gi + 1) * H])
    return out


def _interleave_bias(b_t, b_p, H):
    out = jnp.zeros((1, 8 * H), jnp.float32)
    for gi in range(4):
        out = out.at[0, (2 * gi) * H:(2 * gi + 1) * H].set(b_t[gi * H:(gi + 1) * H])
        out = out.at[0, (2 * gi + 1) * H:(2 * gi + 2) * H].set(b_p[gi * H:(gi + 1) * H])
    return out


def _scale_g_cols(w, H):
    # Pre-scale g-gate columns by 2 so the kernel can use a single sigmoid pass
    # and recover tanh(z_g) = 2*sigmoid(2 z_g) - 1.
    return w.at[..., 4 * H:6 * H].multiply(2.0)


def init_params(key, embedding_dim, lstm_dim):
    H = lstm_dim
    k_emb_t, k_emb_p, k_lstm_t, k_lstm_p, k_h, k_o = jax.random.split(key, 6)

    def embedding(k):
        e = jax.random.normal(k, (_VOCAB, embedding_dim), jnp.float32)
        return e.at[0].set(0.0)                                  # padding_idx=0

    emb_t, emb_p = embedding(k_emb_t), embedding(k_emb_p)
    lt = _init_lstm2_raw(k_lstm_t, embedding_dim, H)
    lp = _init_lstm2_raw(k_lstm_p, embedding_dim, H)

    # Fold embedding lookup into the layer-0 input projection:
    #   x_t @ Wih0.T == onehot(ids_t) @ (emb_table @ Wih0.T)
    def fold_emb(emb, w_ih_l0):
        proj = emb @ w_ih_l0.T                                   # (V, 4H)
        return jnp.pad(proj, ((0, _VOCAB_PAD - _VOCAB), (0, 0))) # (Vpad, 4H)

    proj0 = _scale_g_cols(_interleave_gates(fold_emb(emb_t, lt["w_ih_l0"]),
                                            fold_emb(emb_p, lp["w_ih_l0"]), H), H)
    b0 = _scale_g_cols(_interleave_bias(lt["b_l0"], lp["b_l0"], H), H)
    whh0 = _scale_g_cols(_interleave_gates(lt["w_hh_l0"].T, lp["w_hh_l0"].T, H), H)
    wih1 = _scale_g_cols(_interleave_gates(lt["w_ih_l1"].T, lp["w_ih_l1"].T, H), H)
    whh1 = _scale_g_cols(_interleave_gates(lt["w_hh_l1"].T, lp["w_hh_l1"].T, H), H)
    b1 = _scale_g_cols(_interleave_bias(lt["b_l1"], lp["b_l1"], H), H)

    kh1, kh2 = jax.random.split(k_h)
    ko1, ko2 = jax.random.split(k_o)
    s_h = 1.0 / jnp.sqrt(2 * H)
    s_o = 1.0 / jnp.sqrt(H)
    w1 = _uniform(kh1, (H, 2 * H), s_h)      # hidden_layer.weight (torch layout)
    b1m = _uniform(kh2, (H,), s_h)
    w2 = _uniform(ko1, (1, H), s_o)          # output_layer.weight
    b2 = _uniform(ko2, (1,), s_o)

    return {
        "fused": {
            "proj0": proj0,                                  # (2*Vpad, 8H) f32
            "b0": b0,                                        # (1, 8H)     f32
            "whh0": whh0.astype(jnp.bfloat16),               # (2H, 8H)    bf16
            "wih1": wih1.astype(jnp.bfloat16),               # (2H, 8H)    bf16
            "whh1": whh1.astype(jnp.bfloat16),               # (2H, 8H)    bf16
            "b1": b1,                                        # (1, 8H)     f32
        },
        "mlp": {
            # Reference concatenates [tcr_last, pep_last]; rows 0:H of w1.T are
            # the tcr features, matching the [tcr | pep] lane layout of `last`.
            "w1": w1.T,                                      # (2H, H)
            "b1": b1m.reshape(1, H),
            "w2": w2.T,                                      # (H, 1)
            "b2": b2.reshape(1, 1),
        },
    }


# ----------------------------------------------------------------------------
# Demo
# ----------------------------------------------------------------------------
if __name__ == "__main__":
    embedding_dim, lstm_dim = 16, 32
    B, T_TCR, T_PEP = 2, 12, 8

    root = jax.random.PRNGKey(0)
    k_params, k_tcr, k_pep = jax.random.split(root, 3)
    params = init_params(k_params, embedding_dim, lstm_dim)

    # token ids in 1..20, padded with 0 beyond each sequence's length
    tcr_lens = jnp.array([12, 7], dtype=jnp.int32)
    pep_lens = jnp.array([8, 5], dtype=jnp.int32)
    tcrs = jax.random.randint(k_tcr, (B, T_TCR), 1, 21, dtype=jnp.int32)
    peps = jax.random.randint(k_pep, (B, T_PEP), 1, 21, dtype=jnp.int32)
    tcrs = jnp.where(jnp.arange(T_TCR)[None, :] < tcr_lens[:, None], tcrs, 0)
    peps = jnp.where(jnp.arange(T_PEP)[None, :] < pep_lens[:, None], peps, 0)

    out = double_lstm_classifier_forward(params, tcrs, tcr_lens, peps, pep_lens)
    out = jax.block_until_ready(out)
    assert out.shape == (B, 1)
    assert bool(jnp.all(jnp.isfinite(out)))
    print("KERNEL_OK")
</pallas_src>

<mosaic_0001>
module attributes {stable_mosaic.version = 11 : i64} {
  func.func @_fused_forward_kernel(%arg0: memref<192x1xi32, #tpu.memory_space<vmem>>, %arg1: memref<192x1xi32, #tpu.memory_space<vmem>>, %arg2: memref<16x64xi32, #tpu.memory_space<vmem>>, %arg3: memref<64x256xf32, #tpu.memory_space<vmem>>, %arg4: memref<1x256xf32, #tpu.memory_space<vmem>>, %arg5: memref<64x256xbf16, #tpu.memory_space<vmem>>, %arg6: memref<64x256xbf16, #tpu.memory_space<vmem>>, %arg7: memref<64x256xbf16, #tpu.memory_space<vmem>>, %arg8: memref<1x256xf32, #tpu.memory_space<vmem>>, %arg9: memref<64x32xf32, #tpu.memory_space<vmem>>, %arg10: memref<1x32xf32, #tpu.memory_space<vmem>>, %arg11: memref<32x1xf32, #tpu.memory_space<vmem>>, %arg12: memref<1x1xf32, #tpu.memory_space<vmem>>, %arg13: memref<16x1xf32, #tpu.memory_space<vmem>>, %arg14: memref<192x256xf32, #tpu.memory_space<vmem>>) attributes {dimension_semantics = [], scalar_prefetch = 0 : i64, scratch_operands = 1 : i64, tpu.core_type = #tpu.core_type<tc>} {
    %0 = tpu.iota {dimensions = array<i32: 1>} : vector<192x64xi32>
    %c0 = arith.constant 0 : index
    %c0_0 = arith.constant 0 : index
    %1 = vector.load %arg0[%c0, %c0_0] : memref<192x1xi32, #tpu.memory_space<vmem>>, vector<192x1xi32>
    %2 = vector.broadcast %1 : vector<192x1xi32> to vector<192x64xi32>
    %3 = arith.cmpi eq, %2, %0 : vector<192x64xi32>
    %c0_1 = arith.constant 0 : index
    %c0_2 = arith.constant 0 : index
    %4 = vector.load %arg1[%c0_1, %c0_2] : memref<192x1xi32, #tpu.memory_space<vmem>>, vector<192x1xi32>
    %5 = vector.broadcast %4 : vector<192x1xi32> to vector<192x64xi32>
    %6 = arith.cmpi eq, %5, %0 : vector<192x64xi32>
    %7 = arith.ori %3, %6 : vector<192x64xi1>
    %8 = arith.extui %7 : vector<192x64xi1> to vector<192x64xi32>
    %9 = arith.sitofp %8 : vector<192x64xi32> to vector<192x64xf32>
    %c0_3 = arith.constant 0 : index
    %c0_4 = arith.constant 0 : index
    %10 = vector.load %arg3[%c0_3, %c0_4] : memref<64x256xf32, #tpu.memory_space<vmem>>, vector<64x256xf32>
    %cst = arith.constant dense<0.000000e+00> : vector<192x256xf32>
    %11 = tpu.matmul %9, %10, %cst {dimension_numbers = #tpu.dot_dimension_numbers<[1], [0], [0], [1], [0, 0, 1, 1], [], []>} : vector<192x64xf32>, vector<64x256xf32>, vector<192x256xf32> -> vector<192x256xf32>
    %c0_5 = arith.constant 0 : index
    %c0_6 = arith.constant 0 : index
    %12 = vector.load %arg4[%c0_5, %c0_6] : memref<1x256xf32, #tpu.memory_space<vmem>>, vector<1x256xf32>
    %13 = vector.broadcast %12 : vector<1x256xf32> to vector<192x256xf32>
    %14 = arith.addf %11, %13 : vector<192x256xf32>
    %c0_7 = arith.constant 0 : index
    %c0_8 = arith.constant 0 : index
    %15 = vector.load %arg14[%c0_7, %c0_8] : memref<192x256xf32, #tpu.memory_space<vmem>>, vector<192x256xf32>
    tpu.vector_store %arg14[%c0_7, %c0_8], %14 {strides = array<i32>} : memref<192x256xf32, #tpu.memory_space<vmem>>, vector<192x256xf32>,
    %c0_9 = arith.constant 0 : index
    %c0_10 = arith.constant 0 : index
    %16 = vector.load %arg5[%c0_9, %c0_10] : memref<64x256xbf16, #tpu.memory_space<vmem>>, vector<64x256xbf16>
    %c0_11 = arith.constant 0 : index
    %c0_12 = arith.constant 0 : index
    %17 = vector.load %arg6[%c0_11, %c0_12] : memref<64x256xbf16, #tpu.memory_space<vmem>>, vector<64x256xbf16>
    %c0_13 = arith.constant 0 : index
    %c0_14 = arith.constant 0 : index
    %18 = vector.load %arg7[%c0_13, %c0_14] : memref<64x256xbf16, #tpu.memory_space<vmem>>, vector<64x256xbf16>
    %c0_15 = arith.constant 0 : index
    %c0_16 = arith.constant 0 : index
    %19 = vector.load %arg8[%c0_15, %c0_16] : memref<1x256xf32, #tpu.memory_space<vmem>>, vector<1x256xf32>
    %20 = vector.shape_cast %19 : vector<1x256xf32> to vector<1x256xf32>
    %21 = vector.broadcast %20 : vector<1x256xf32> to vector<16x256xf32>
    %c0_17 = arith.constant 0 : index
    %c0_18 = arith.constant 0 : index
    %22 = vector.load %arg2[%c0_17, %c0_18] : memref<16x64xi32, #tpu.memory_space<vmem>>, vector<16x64xi32>
    %cst_19 = arith.constant 0.000000e+00 : f32
    %23 = vector.broadcast %cst_19 : f32 to vector<16x64xf32>
    %c0_20 = arith.constant 0 : index
    %c0_21 = arith.constant 0 : index
    %24 = vector.load %arg14[%c0_20, %c0_21] : memref<192x256xf32, #tpu.memory_space<vmem>>, vector<16x256xf32>
    %25 = arith.truncf %23 : vector<16x64xf32> to vector<16x64xbf16>
    %cst_22 = arith.constant dense<0.000000e+00> : vector<16x256xf32>
    %26 = tpu.matmul %25, %16, %cst_22 {dimension_numbers = #tpu.dot_dimension_numbers<[1], [0], [0], [1], [0, 0, 1, 1], [], []>} : vector<16x64xbf16>, vector<64x256xbf16>, vector<16x256xf32> -> vector<16x256xf32>
    %27 = arith.addf %24, %26 : vector<16x256xf32>
    %28 = arith.negf %27 : vector<16x256xf32>
    %29 = math.exp %28 : vector<16x256xf32>
    %cst_23 = arith.constant 1.000000e+00 : f32
    %30 = vector.broadcast %cst_23 : f32 to vector<16x256xf32>
    %31 = arith.addf %30, %29 : vector<16x256xf32>
    %32 = arith.divf %30, %31 : vector<16x256xf32>
    %33 = vector.extract_strided_slice %32 {offsets = [0, 0], sizes = [16, 64], strides = [1, 1]} : vector<16x256xf32> to vector<16x64xf32>
    %34 = vector.extract_strided_slice %32 {offsets = [0, 64], sizes = [16, 64], strides = [1, 1]} : vector<16x256xf32> to vector<16x64xf32>
    %35 = vector.extract_strided_slice %32 {offsets = [0, 128], sizes = [16, 64], strides = [1, 1]} : vector<16x256xf32> to vector<16x64xf32>
    %cst_24 = arith.constant 2.000000e+00 : f32
    %36 = vector.broadcast %cst_24 : f32 to vector<16x64xf32>
    %37 = arith.mulf %36, %35 : vector<16x64xf32>
    %cst_25 = arith.constant 1.000000e+00 : f32
    %38 = vector.broadcast %cst_25 : f32 to vector<16x64xf32>
    %39 = arith.subf %37, %38 : vector<16x64xf32>
    %40 = vector.extract_strided_slice %32 {offsets = [0, 192], sizes = [16, 64], strides = [1, 1]} : vector<16x256xf32> to vector<16x64xf32>
    %41 = arith.mulf %34, %23 : vector<16x64xf32>
    %42 = arith.mulf %33, %39 : vector<16x64xf32>
    %43 = arith.addf %41, %42 : vector<16x64xf32>
    %44 = math.tanh %43 : vector<16x64xf32>
    %45 = arith.mulf %40, %44 : vector<16x64xf32>
    %46 = arith.truncf %45 : vector<16x64xf32> to vector<16x64xbf16>
    %cst_26 = arith.constant dense<0.000000e+00> : vector<16x256xf32>
    %47 = tpu.matmul %46, %17, %cst_26 {dimension_numbers = #tpu.dot_dimension_numbers<[1], [0], [0], [1], [0, 0, 1, 1], [], []>} : vector<16x64xbf16>, vector<64x256xbf16>, vector<16x256xf32> -> vector<16x256xf32>
    %48 = arith.truncf %23 : vector<16x64xf32> to vector<16x64xbf16>
    %cst_27 = arith.constant dense<0.000000e+00> : vector<16x256xf32>
    %49 = tpu.matmul %48, %18, %cst_27 {dimension_numbers = #tpu.dot_dimension_numbers<[1], [0], [0], [1], [0, 0, 1, 1], [], []>} : vector<16x64xbf16>, vector<64x256xbf16>, vector<16x256xf32> -> vector<16x256xf32>
    %50 = arith.addf %47, %49 : vector<16x256xf32>
    %51 = arith.addf %50, %21 : vector<16x256xf32>
    %52 = arith.negf %51 : vector<16x256xf32>
    %53 = math.exp %52 : vector<16x256xf32>
    %cst_28 = arith.constant 1.000000e+00 : f32
    %54 = vector.broadcast %cst_28 : f32 to vector<16x256xf32>
    %55 = arith.addf %54, %53 : vector<16x256xf32>
    %56 = arith.divf %54, %55 : vector<16x256xf32>
    %57 = vector.extract_strided_slice %56 {offsets = [0, 0], sizes = [16, 64], strides = [1, 1]} : vector<16x256xf32> to vector<16x64xf32>
    %58 = vector.extract_strided_slice %56 {offsets = [0, 64], sizes = [16, 64], strides = [1, 1]} : vector<16x256xf32> to vector<16x64xf32>
    %59 = vector.extract_strided_slice %56 {offsets = [0, 128], sizes = [16, 64], strides = [1, 1]} : vector<16x256xf32> to vector<16x64xf32>
    %cst_29 = arith.constant 2.000000e+00 : f32
    %60 = vector.broadcast %cst_29 : f32 to vector<16x64xf32>
    %61 = arith.mulf %60, %59 : vector<16x64xf32>
    %cst_30 = arith.constant 1.000000e+00 : f32
    %62 = vector.broadcast %cst_30 : f32 to vector<16x64xf32>
    %63 = arith.subf %61, %62 : vector<16x64xf32>
    %64 = vector.extract_strided_slice %56 {offsets = [0, 192], sizes = [16, 64], strides = [1, 1]} : vector<16x256xf32> to vector<16x64xf32>
    %65 = arith.mulf %58, %23 : vector<16x64xf32>
    %66 = arith.mulf %57, %63 : vector<16x64xf32>
    %67 = arith.addf %65, %66 : vector<16x64xf32>
    %68 = math.tanh %67 : vector<16x64xf32>
    %69 = arith.mulf %64, %68 : vector<16x64xf32>
    %c0_i32 = arith.constant 0 : i32
    %70 = vector.broadcast %c0_i32 : i32 to vector<16x64xi32>
    %71 = arith.cmpi eq, %22, %70 : vector<16x64xi32>
    %72 = arith.select %71, %69, %23 : vector<16x64xi1>, vector<16x64xf32>
    %c16 = arith.constant 16 : index
    %c0_31 = arith.constant 0 : index
    %73 = vector.load %arg14[%c16, %c0_31] : memref<192x256xf32, #tpu.memory_space<vmem>>, vector<16x256xf32>
    %74 = arith.truncf %45 : vector<16x64xf32> to vector<16x64xbf16>
    %cst_32 = arith.constant dense<0.000000e+00> : vector<16x256xf32>
    %75 = tpu.matmul %74, %16, %cst_32 {dimension_numbers = #tpu.dot_dimension_numbers<[1], [0], [0], [1], [0, 0, 1, 1], [], []>} : vector<16x64xbf16>, vector<64x256xbf16>, vector<16x256xf32> -> vector<16x256xf32>
    %76 = arith.addf %73, %75 : vector<16x256xf32>
    %77 = arith.negf %76 : vector<16x256xf32>
    %78 = math.exp %77 : vector<16x256xf32>
    %cst_33 = arith.constant 1.000000e+00 : f32
    %79 = vector.broadcast %cst_33 : f32 to vector<16x256xf32>
    %80 = arith.addf %79, %78 : vector<16x256xf32>
    %81 = arith.divf %79, %80 : vector<16x256xf32>
    %82 = vector.extract_strided_slice %81 {offsets = [0, 0], sizes = [16, 64], strides = [1, 1]} : vector<16x256xf32> to vector<16x64xf32>
    %83 = vector.extract_strided_slice %81 {offsets = [0, 64], sizes = [16, 64], strides = [1, 1]} : vector<16x256xf32> to vector<16x64xf32>
    %84 = vector.extract_strided_slice %81 {offsets = [0, 128], sizes = [16, 64], strides = [1, 1]} : vector<16x256xf32> to vector<16x64xf32>
    %cst_34 = arith.constant 2.000000e+00 : f32
    %85 = vector.broadcast %cst_34 : f32 to vector<16x64xf32>
    %86 = arith.mulf %85, %84 : vector<16x64xf32>
    %cst_35 = arith.constant 1.000000e+00 : f32
    %87 = vector.broadcast %cst_35 : f32 to vector<16x64xf32>
    %88 = arith.subf %86, %87 : vector<16x64xf32>
    %89 = vector.extract_strided_slice %81 {offsets = [0, 192], sizes = [16, 64], strides = [1, 1]} : vector<16x256xf32> to vector<16x64xf32>
    %90 = arith.mulf %83, %43 : vector<16x64xf32>
    %91 = arith.mulf %82, %88 : vector<16x64xf32>
    %92 = arith.addf %90, %91 : vector<16x64xf32>
    %93 = math.tanh %92 : vector<16x64xf32>
    %94 = arith.mulf %89, %93 : vector<16x64xf32>
    %95 = arith.truncf %94 : vector<16x64xf32> to vector<16x64xbf16>
    %cst_36 = arith.constant dense<0.000000e+00> : vector<16x256xf32>
    %96 = tpu.matmul %95, %17, %cst_36 {dimension_numbers = #tpu.dot_dimension_numbers<[1], [0], [0], [1], [0, 0, 1, 1], [], []>} : vector<16x64xbf16>, vector<64x256xbf16>, vector<16x256xf32> -> vector<16x256xf32>
    %97 = arith.truncf %69 : vector<16x64xf32> to vector<16x64xbf16>
    %cst_37 = arith.constant dense<0.000000e+00> : vector<16x256xf32>
    %98 = tpu.matmul %97, %18, %cst_37 {dimension_numbers = #tpu.dot_dimension_numbers<[1], [0], [0], [1], [0, 0, 1, 1], [], []>} : vector<16x64xbf16>, vector<64x256xbf16>, vector<16x256xf32> -> vector<16x256xf32>
    %99 = arith.addf %96, %98 : vector<16x256xf32>
    %100 = arith.addf %99, %21 : vector<16x256xf32>
    %101 = arith.negf %100 : vector<16x256xf32>
    %102 = math.exp %101 : vector<16x256xf32>
    %cst_38 = arith.constant 1.000000e+00 : f32
    %103 = vector.broadcast %cst_38 : f32 to vector<16x256xf32>
    %104 = arith.addf %103, %102 : vector<16x256xf32>
    %105 = arith.divf %103, %104 : vector<16x256xf32>
    %106 = vector.extract_strided_slice %105 {offsets = [0, 0], sizes = [16, 64], strides = [1, 1]} : vector<16x256xf32> to vector<16x64xf32>
    %107 = vector.extract_strided_slice %105 {offsets = [0, 64], sizes = [16, 64], strides = [1, 1]} : vector<16x256xf32> to vector<16x64xf32>
    %108 = vector.extract_strided_slice %105 {offsets = [0, 128], sizes = [16, 64], strides = [1, 1]} : vector<16x256xf32> to vector<16x64xf32>
    %cst_39 = arith.constant 2.000000e+00 : f32
    %109 = vector.broadcast %cst_39 : f32 to vector<16x64xf32>
    %110 = arith.mulf %109, %108 : vector<16x64xf32>
    %cst_40 = arith.constant 1.000000e+00 : f32
    %111 = vector.broadcast %cst_40 : f32 to vector<16x64xf32>
    %112 = arith.subf %110, %111 : vector<16x64xf32>
    %113 = vector.extract_strided_slice %105 {offsets = [0, 192], sizes = [16, 64], strides = [1, 1]} : vector<16x256xf32> to vector<16x64xf32>
    %114 = arith.mulf %107, %67 : vector<16x64xf32>
    %115 = arith.mulf %106, %112 : vector<16x64xf32>
    %116 = arith.addf %114, %115 : vector<16x64xf32>
    %117 = math.tanh %116 : vector<16x64xf32>
    %118 = arith.mulf %113, %117 : vector<16x64xf32>
    %c1_i32 = arith.constant 1 : i32
    %119 = vector.broadcast %c1_i32 : i32 to vector<16x64xi32>
    %120 = arith.cmpi eq, %22, %119 : vector<16x64xi32>
    %121 = arith.select %120, %118, %72 : vector<16x64xi1>, vector<16x64xf32>
    %c32 = arith.constant 32 : index
    %c0_41 = arith.constant 0 : index
    %122 = vector.load %arg14[%c32, %c0_41] : memref<192x256xf32, #tpu.memory_space<vmem>>, vector<16x256xf32>
    %123 = arith.truncf %94 : vector<16x64xf32> to vector<16x64xbf16>
    %cst_42 = arith.constant dense<0.000000e+00> : vector<16x256xf32>
    %124 = tpu.matmul %123, %16, %cst_42 {dimension_numbers = #tpu.dot_dimension_numbers<[1], [0], [0], [1], [0, 0, 1, 1], [], []>} : vector<16x64xbf16>, vector<64x256xbf16>, vector<16x256xf32> -> vector<16x256xf32>
    %125 = arith.addf %122, %124 : vector<16x256xf32>
    %126 = arith.negf %125 : vector<16x256xf32>
    %127 = math.exp %126 : vector<16x256xf32>
    %cst_43 = arith.constant 1.000000e+00 : f32
    %128 = vector.broadcast %cst_43 : f32 to vector<16x256xf32>
    %129 = arith.addf %128, %127 : vector<16x256xf32>
    %130 = arith.divf %128, %129 : vector<16x256xf32>
    %131 = vector.extract_strided_slice %130 {offsets = [0, 0], sizes = [16, 64], strides = [1, 1]} : vector<16x256xf32> to vector<16x64xf32>
    %132 = vector.extract_strided_slice %130 {offsets = [0, 64], sizes = [16, 64], strides = [1, 1]} : vector<16x256xf32> to vector<16x64xf32>
    %133 = vector.extract_strided_slice %130 {offsets = [0, 128], sizes = [16, 64], strides = [1, 1]} : vector<16x256xf32> to vector<16x64xf32>
    %cst_44 = arith.constant 2.000000e+00 : f32
    %134 = vector.broadcast %cst_44 : f32 to vector<16x64xf32>
    %135 = arith.mulf %134, %133 : vector<16x64xf32>
    %cst_45 = arith.constant 1.000000e+00 : f32
    %136 = vector.broadcast %cst_45 : f32 to vector<16x64xf32>
    %137 = arith.subf %135, %136 : vector<16x64xf32>
    %138 = vector.extract_strided_slice %130 {offsets = [0, 192], sizes = [16, 64], strides = [1, 1]} : vector<16x256xf32> to vector<16x64xf32>
    %139 = arith.mulf %132, %92 : vector<16x64xf32>
    %140 = arith.mulf %131, %137 : vector<16x64xf32>
    %141 = arith.addf %139, %140 : vector<16x64xf32>
    %142 = math.tanh %141 : vector<16x64xf32>
    %143 = arith.mulf %138, %142 : vector<16x64xf32>
    %144 = arith.truncf %143 : vector<16x64xf32> to vector<16x64xbf16>
    %cst_46 = arith.constant dense<0.000000e+00> : vector<16x256xf32>
    %145 = tpu.matmul %144, %17, %cst_46 {dimension_numbers = #tpu.dot_dimension_numbers<[1], [0], [0], [1], [0, 0, 1, 1], [], []>} : vector<16x64xbf16>, vector<64x256xbf16>, vector<16x256xf32> -> vector<16x256xf32>
    %146 = arith.truncf %118 : vector<16x64xf32> to vector<16x64xbf16>
    %cst_47 = arith.constant dense<0.000000e+00> : vector<16x256xf32>
    %147 = tpu.matmul %146, %18, %cst_47 {dimension_numbers = #tpu.dot_dimension_numbers<[1], [0], [0], [1], [0, 0, 1, 1], [], []>} : vector<16x64xbf16>, vector<64x256xbf16>, vector<16x256xf32> -> vector<16x256xf32>
    %148 = arith.addf %145, %147 : vector<16x256xf32>
    %149 = arith.addf %148, %21 : vector<16x256xf32>
    %150 = arith.negf %149 : vector<16x256xf32>
    %151 = math.exp %150 : vector<16x256xf32>
    %cst_48 = arith.constant 1.000000e+00 : f32
    %152 = vector.broadcast %cst_48 : f32 to vector<16x256xf32>
    %153 = arith.addf %152, %151 : vector<16x256xf32>
    %154 = arith.divf %152, %153 : vector<16x256xf32>
    %155 = vector.extract_strided_slice %154 {offsets = [0, 0], sizes = [16, 64], strides = [1, 1]} : vector<16x256xf32> to vector<16x64xf32>
    %156 = vector.extract_strided_slice %154 {offsets = [0, 64], sizes = [16, 64], strides = [1, 1]} : vector<16x256xf32> to vector<16x64xf32>
    %157 = vector.extract_strided_slice %154 {offsets = [0, 128], sizes = [16, 64], strides = [1, 1]} : vector<16x256xf32> to vector<16x64xf32>
    %cst_49 = arith.constant 2.000000e+00 : f32
    %158 = vector.broadcast %cst_49 : f32 to vector<16x64xf32>
    %159 = arith.mulf %158, %157 : vector<16x64xf32>
    %cst_50 = arith.constant 1.000000e+00 : f32
    %160 = vector.broadcast %cst_50 : f32 to vector<16x64xf32>
    %161 = arith.subf %159, %160 : vector<16x64xf32>
    %162 = vector.extract_strided_slice %154 {offsets = [0, 192], sizes = [16, 64], strides = [1, 1]} : vector<16x256xf32> to vector<16x64xf32>
    %163 = arith.mulf %156, %116 : vector<16x64xf32>
    %164 = arith.mulf %155, %161 : vector<16x64xf32>
    %165 = arith.addf %163, %164 : vector<16x64xf32>
    %166 = math.tanh %165 : vector<16x64xf32>
    %167 = arith.mulf %162, %166 : vector<16x64xf32>
    %c2_i32 = arith.constant 2 : i32
    %168 = vector.broadcast %c2_i32 : i32 to vector<16x64xi32>
    %169 = arith.cmpi eq, %22, %168 : vector<16x64xi32>
    %170 = arith.select %169, %167, %121 : vector<16x64xi1>, vector<16x64xf32>
    %c48 = arith.constant 48 : index
    %c0_51 = arith.constant 0 : index
    %171 = vector.load %arg14[%c48, %c0_51] : memref<192x256xf32, #tpu.memory_space<vmem>>, vector<16x256xf32>
    %172 = arith.truncf %143 : vector<16x64xf32> to vector<16x64xbf16>
    %cst_52 = arith.constant dense<0.000000e+00> : vector<16x256xf32>
    %173 = tpu.matmul %172, %16, %cst_52 {dimension_numbers = #tpu.dot_dimension_numbers<[1], [0], [0], [1], [0, 0, 1, 1], [], []>} : vector<16x64xbf16>, vector<64x256xbf16>, vector<16x256xf32> -> vector<16x256xf32>
    %174 = arith.addf %171, %173 : vector<16x256xf32>
    %175 = arith.negf %174 : vector<16x256xf32>
    %176 = math.exp %175 : vector<16x256xf32>
    %cst_53 = arith.constant 1.000000e+00 : f32
    %177 = vector.broadcast %cst_53 : f32 to vector<16x256xf32>
    %178 = arith.addf %177, %176 : vector<16x256xf32>
    %179 = arith.divf %177, %178 : vector<16x256xf32>
    %180 = vector.extract_strided_slice %179 {offsets = [0, 0], sizes = [16, 64], strides = [1, 1]} : vector<16x256xf32> to vector<16x64xf32>
    %181 = vector.extract_strided_slice %179 {offsets = [0, 64], sizes = [16, 64], strides = [1, 1]} : vector<16x256xf32> to vector<16x64xf32>
    %182 = vector.extract_strided_slice %179 {offsets = [0, 128], sizes = [16, 64], strides = [1, 1]} : vector<16x256xf32> to vector<16x64xf32>
    %cst_54 = arith.constant 2.000000e+00 : f32
    %183 = vector.broadcast %cst_54 : f32 to vector<16x64xf32>
    %184 = arith.mulf %183, %182 : vector<16x64xf32>
    %cst_55 = arith.constant 1.000000e+00 : f32
    %185 = vector.broadcast %cst_55 : f32 to vector<16x64xf32>
    %186 = arith.subf %184, %185 : vector<16x64xf32>
    %187 = vector.extract_strided_slice %179 {offsets = [0, 192], sizes = [16, 64], strides = [1, 1]} : vector<16x256xf32> to vector<16x64xf32>
    %188 = arith.mulf %181, %141 : vector<16x64xf32>
    %189 = arith.mulf %180, %186 : vector<16x64xf32>
    %190 = arith.addf %188, %189 : vector<16x64xf32>
    %191 = math.tanh %190 : vector<16x64xf32>
    %192 = arith.mulf %187, %191 : vector<16x64xf32>
    %193 = arith.truncf %192 : vector<16x64xf32> to vector<16x64xbf16>
    %cst_56 = arith.constant dense<0.000000e+00> : vector<16x256xf32>
    %194 = tpu.matmul %193, %17, %cst_56 {dimension_numbers = #tpu.dot_dimension_numbers<[1], [0], [0], [1], [0, 0, 1, 1], [], []>} : vector<16x64xbf16>, vector<64x256xbf16>, vector<16x256xf32> -> vector<16x256xf32>
    %195 = arith.truncf %167 : vector<16x64xf32> to vector<16x64xbf16>
    %cst_57 = arith.constant dense<0.000000e+00> : vector<16x256xf32>
    %196 = tpu.matmul %195, %18, %cst_57 {dimension_numbers = #tpu.dot_dimension_numbers<[1], [0], [0], [1], [0, 0, 1, 1], [], []>} : vector<16x64xbf16>, vector<64x256xbf16>, vector<16x256xf32> -> vector<16x256xf32>
    %197 = arith.addf %194, %196 : vector<16x256xf32>
    %198 = arith.addf %197, %21 : vector<16x256xf32>
    %199 = arith.negf %198 : vector<16x256xf32>
    %200 = math.exp %199 : vector<16x256xf32>
    %cst_58 = arith.constant 1.000000e+00 : f32
    %201 = vector.broadcast %cst_58 : f32 to vector<16x256xf32>
    %202 = arith.addf %201, %200 : vector<16x256xf32>
    %203 = arith.divf %201, %202 : vector<16x256xf32>
    %204 = vector.extract_strided_slice %203 {offsets = [0, 0], sizes = [16, 64], strides = [1, 1]} : vector<16x256xf32> to vector<16x64xf32>
    %205 = vector.extract_strided_slice %203 {offsets = [0, 64], sizes = [16, 64], strides = [1, 1]} : vector<16x256xf32> to vector<16x64xf32>
    %206 = vector.extract_strided_slice %203 {offsets = [0, 128], sizes = [16, 64], strides = [1, 1]} : vector<16x256xf32> to vector<16x64xf32>
    %cst_59 = arith.constant 2.000000e+00 : f32
    %207 = vector.broadcast %cst_59 : f32 to vector<16x64xf32>
    %208 = arith.mulf %207, %206 : vector<16x64xf32>
    %cst_60 = arith.constant 1.000000e+00 : f32
    %209 = vector.broadcast %cst_60 : f32 to vector<16x64xf32>
    %210 = arith.subf %208, %209 : vector<16x64xf32>
    %211 = vector.extract_strided_slice %203 {offsets = [0, 192], sizes = [16, 64], strides = [1, 1]} : vector<16x256xf32> to vector<16x64xf32>
    %212 = arith.mulf %205, %165 : vector<16x64xf32>
    %213 = arith.mulf %204, %210 : vector<16x64xf32>
    %214 = arith.addf %212, %213 : vector<16x64xf32>
    %215 = math.tanh %214 : vector<16x64xf32>
    %216 = arith.mulf %211, %215 : vector<16x64xf32>
    %c3_i32 = arith.constant 3 : i32
    %217 = vector.broadcast %c3_i32 : i32 to vector<16x64xi32>
    %218 = arith.cmpi eq, %22, %217 : vector<16x64xi32>
    %219 = arith.select %218, %216, %170 : vector<16x64xi1>, vector<16x64xf32>
    %c64 = arith.constant 64 : index
    %c0_61 = arith.constant 0 : index
    %220 = vector.load %arg14[%c64, %c0_61] : memref<192x256xf32, #tpu.memory_space<vmem>>, vector<16x256xf32>
    %221 = arith.truncf %192 : vector<16x64xf32> to vector<16x64xbf16>
    %cst_62 = arith.constant dense<0.000000e+00> : vector<16x256xf32>
    %222 = tpu.matmul %221, %16, %cst_62 {dimension_numbers = #tpu.dot_dimension_numbers<[1], [0], [0], [1], [0, 0, 1, 1], [], []>} : vector<16x64xbf16>, vector<64x256xbf16>, vector<16x256xf32> -> vector<16x256xf32>
    %223 = arith.addf %220, %222 : vector<16x256xf32>
    %224 = arith.negf %223 : vector<16x256xf32>
    %225 = math.exp %224 : vector<16x256xf32>
    %cst_63 = arith.constant 1.000000e+00 : f32
    %226 = vector.broadcast %cst_63 : f32 to vector<16x256xf32>
    %227 = arith.addf %226, %225 : vector<16x256xf32>
    %228 = arith.divf %226, %227 : vector<16x256xf32>
    %229 = vector.extract_strided_slice %228 {offsets = [0, 0], sizes = [16, 64], strides = [1, 1]} : vector<16x256xf32> to vector<16x64xf32>
    %230 = vector.extract_strided_slice %228 {offsets = [0, 64], sizes = [16, 64], strides = [1, 1]} : vector<16x256xf32> to vector<16x64xf32>
    %231 = vector.extract_strided_slice %228 {offsets = [0, 128], sizes = [16, 64], strides = [1, 1]} : vector<16x256xf32> to vector<16x64xf32>
    %cst_64 = arith.constant 2.000000e+00 : f32
    %232 = vector.broadcast %cst_64 : f32 to vector<16x64xf32>
    %233 = arith.mulf %232, %231 : vector<16x64xf32>
    %cst_65 = arith.constant 1.000000e+00 : f32
    %234 = vector.broadcast %cst_65 : f32 to vector<16x64xf32>
    %235 = arith.subf %233, %234 : vector<16x64xf32>
    %236 = vector.extract_strided_slice %228 {offsets = [0, 192], sizes = [16, 64], strides = [1, 1]} : vector<16x256xf32> to vector<16x64xf32>
    %237 = arith.mulf %230, %190 : vector<16x64xf32>
    %238 = arith.mulf %229, %235 : vector<16x64xf32>
    %239 = arith.addf %237, %238 : vector<16x64xf32>
    %240 = math.tanh %239 : vector<16x64xf32>
    %241 = arith.mulf %236, %240 : vector<16x64xf32>
    %242 = arith.truncf %241 : vector<16x64xf32> to vector<16x64xbf16>
    %cst_66 = arith.constant dense<0.000000e+00> : vector<16x256xf32>
    %243 = tpu.matmul %242, %17, %cst_66 {dimension_numbers = #tpu.dot_dimension_numbers<[1], [0], [0], [1], [0, 0, 1, 1], [], []>} : vector<16x64xbf16>, vector<64x256xbf16>, vector<16x256xf32> -> vector<16x256xf32>
    %244 = arith.truncf %216 : vector<16x64xf32> to vector<16x64xbf16>
    %cst_67 = arith.constant dense<0.000000e+00> : vector<16x256xf32>
    %245 = tpu.matmul %244, %18, %cst_67 {dimension_numbers = #tpu.dot_dimension_numbers<[1], [0], [0], [1], [0, 0, 1, 1], [], []>} : vector<16x64xbf16>, vector<64x256xbf16>, vector<16x256xf32> -> vector<16x256xf32>
    %246 = arith.addf %243, %245 : vector<16x256xf32>
    %247 = arith.addf %246, %21 : vector<16x256xf32>
    %248 = arith.negf %247 : vector<16x256xf32>
    %249 = math.exp %248 : vector<16x256xf32>
    %cst_68 = arith.constant 1.000000e+00 : f32
    %250 = vector.broadcast %cst_68 : f32 to vector<16x256xf32>
    %251 = arith.addf %250, %249 : vector<16x256xf32>
    %252 = arith.divf %250, %251 : vector<16x256xf32>
    %253 = vector.extract_strided_slice %252 {offsets = [0, 0], sizes = [16, 64], strides = [1, 1]} : vector<16x256xf32> to vector<16x64xf32>
    %254 = vector.extract_strided_slice %252 {offsets = [0, 64], sizes = [16, 64], strides = [1, 1]} : vector<16x256xf32> to vector<16x64xf32>
    %255 = vector.extract_strided_slice %252 {offsets = [0, 128], sizes = [16, 64], strides = [1, 1]} : vector<16x256xf32> to vector<16x64xf32>
    %cst_69 = arith.constant 2.000000e+00 : f32
    %256 = vector.broadcast %cst_69 : f32 to vector<16x64xf32>
    %257 = arith.mulf %256, %255 : vector<16x64xf32>
    %cst_70 = arith.constant 1.000000e+00 : f32
    %258 = vector.broadcast %cst_70 : f32 to vector<16x64xf32>
    %259 = arith.subf %257, %258 : vector<16x64xf32>
    %260 = vector.extract_strided_slice %252 {offsets = [0, 192], sizes = [16, 64], strides = [1, 1]} : vector<16x256xf32> to vector<16x64xf32>
    %261 = arith.mulf %254, %214 : vector<16x64xf32>
    %262 = arith.mulf %253, %259 : vector<16x64xf32>
    %263 = arith.addf %261, %262 : vector<16x64xf32>
    %264 = math.tanh %263 : vector<16x64xf32>
    %265 = arith.mulf %260, %264 : vector<16x64xf32>
    %c4_i32 = arith.constant 4 : i32
    %266 = vector.broadcast %c4_i32 : i32 to vector<16x64xi32>
    %267 = arith.cmpi eq, %22, %266 : vector<16x64xi32>
    %268 = arith.select %267, %265, %219 : vector<16x64xi1>, vector<16x64xf32>
    %c80 = arith.constant 80 : index
    %c0_71 = arith.constant 0 : index
    %269 = vector.load %arg14[%c80, %c0_71] : memref<192x256xf32, #tpu.memory_space<vmem>>, vector<16x256xf32>
    %270 = arith.truncf %241 : vector<16x64xf32> to vector<16x64xbf16>
    %cst_72 = arith.constant dense<0.000000e+00> : vector<16x256xf32>
    %271 = tpu.matmul %270, %16, %cst_72 {dimension_numbers = #tpu.dot_dimension_numbers<[1], [0], [0], [1], [0, 0, 1, 1], [], []>} : vector<16x64xbf16>, vector<64x256xbf16>, vector<16x256xf32> -> vector<16x256xf32>
    %272 = arith.addf %269, %271 : vector<16x256xf32>
    %273 = arith.negf %272 : vector<16x256xf32>
    %274 = math.exp %273 : vector<16x256xf32>
    %cst_73 = arith.constant 1.000000e+00 : f32
    %275 = vector.broadcast %cst_73 : f32 to vector<16x256xf32>
    %276 = arith.addf %275, %274 : vector<16x256xf32>
    %277 = arith.divf %275, %276 : vector<16x256xf32>
    %278 = vector.extract_strided_slice %277 {offsets = [0, 0], sizes = [16, 64], strides = [1, 1]} : vector<16x256xf32> to vector<16x64xf32>
    %279 = vector.extract_strided_slice %277 {offsets = [0, 64], sizes = [16, 64], strides = [1, 1]} : vector<16x256xf32> to vector<16x64xf32>
    %280 = vector.extract_strided_slice %277 {offsets = [0, 128], sizes = [16, 64], strides = [1, 1]} : vector<16x256xf32> to vector<16x64xf32>
    %cst_74 = arith.constant 2.000000e+00 : f32
    %281 = vector.broadcast %cst_74 : f32 to vector<16x64xf32>
    %282 = arith.mulf %281, %280 : vector<16x64xf32>
    %cst_75 = arith.constant 1.000000e+00 : f32
    %283 = vector.broadcast %cst_75 : f32 to vector<16x64xf32>
    %284 = arith.subf %282, %283 : vector<16x64xf32>
    %285 = vector.extract_strided_slice %277 {offsets = [0, 192], sizes = [16, 64], strides = [1, 1]} : vector<16x256xf32> to vector<16x64xf32>
    %286 = arith.mulf %279, %239 : vector<16x64xf32>
    %287 = arith.mulf %278, %284 : vector<16x64xf32>
    %288 = arith.addf %286, %287 : vector<16x64xf32>
    %289 = math.tanh %288 : vector<16x64xf32>
    %290 = arith.mulf %285, %289 : vector<16x64xf32>
    %291 = arith.truncf %290 : vector<16x64xf32> to vector<16x64xbf16>
    %cst_76 = arith.constant dense<0.000000e+00> : vector<16x256xf32>
    %292 = tpu.matmul %291, %17, %cst_76 {dimension_numbers = #tpu.dot_dimension_numbers<[1], [0], [0], [1], [0, 0, 1, 1], [], []>} : vector<16x64xbf16>, vector<64x256xbf16>, vector<16x256xf32> -> vector<16x256xf32>
    %293 = arith.truncf %265 : vector<16x64xf32> to vector<16x64xbf16>
    %cst_77 = arith.constant dense<0.000000e+00> : vector<16x256xf32>
    %294 = tpu.matmul %293, %18, %cst_77 {dimension_numbers = #tpu.dot_dimension_numbers<[1], [0], [0], [1], [0, 0, 1, 1], [], []>} : vector<16x64xbf16>, vector<64x256xbf16>, vector<16x256xf32> -> vector<16x256xf32>
    %295 = arith.addf %292, %294 : vector<16x256xf32>
    %296 = arith.addf %295, %21 : vector<16x256xf32>
    %297 = arith.negf %296 : vector<16x256xf32>
    %298 = math.exp %297 : vector<16x256xf32>
    %cst_78 = arith.constant 1.000000e+00 : f32
    %299 = vector.broadcast %cst_78 : f32 to vector<16x256xf32>
    %300 = arith.addf %299, %298 : vector<16x256xf32>
    %301 = arith.divf %299, %300 : vector<16x256xf32>
    %302 = vector.extract_strided_slice %301 {offsets = [0, 0], sizes = [16, 64], strides = [1, 1]} : vector<16x256xf32> to vector<16x64xf32>
    %303 = vector.extract_strided_slice %301 {offsets = [0, 64], sizes = [16, 64], strides = [1, 1]} : vector<16x256xf32> to vector<16x64xf32>
    %304 = vector.extract_strided_slice %301 {offsets = [0, 128], sizes = [16, 64], strides = [1, 1]} : vector<16x256xf32> to vector<16x64xf32>
    %cst_79 = arith.constant 2.000000e+00 : f32
    %305 = vector.broadcast %cst_79 : f32 to vector<16x64xf32>
    %306 = arith.mulf %305, %304 : vector<16x64xf32>
    %cst_80 = arith.constant 1.000000e+00 : f32
    %307 = vector.broadcast %cst_80 : f32 to vector<16x64xf32>
    %308 = arith.subf %306, %307 : vector<16x64xf32>
    %309 = vector.extract_strided_slice %301 {offsets = [0, 192], sizes = [16, 64], strides = [1, 1]} : vector<16x256xf32> to vector<16x64xf32>
    %310 = arith.mulf %303, %263 : vector<16x64xf32>
    %311 = arith.mulf %302, %308 : vector<16x64xf32>
    %312 = arith.addf %310, %311 : vector<16x64xf32>
    %313 = math.tanh %312 : vector<16x64xf32>
    %314 = arith.mulf %309, %313 : vector<16x64xf32>
    %c5_i32 = arith.constant 5 : i32
    %315 = vector.broadcast %c5_i32 : i32 to vector<16x64xi32>
    %316 = arith.cmpi eq, %22, %315 : vector<16x64xi32>
    %317 = arith.select %316, %314, %268 : vector<16x64xi1>, vector<16x64xf32>
    %c96 = arith.constant 96 : index
    %c0_81 = arith.constant 0 : index
    %318 = vector.load %arg14[%c96, %c0_81] : memref<192x256xf32, #tpu.memory_space<vmem>>, vector<16x256xf32>
    %319 = arith.truncf %290 : vector<16x64xf32> to vector<16x64xbf16>
    %cst_82 = arith.constant dense<0.000000e+00> : vector<16x256xf32>
    %320 = tpu.matmul %319, %16, %cst_82 {dimension_numbers = #tpu.dot_dimension_numbers<[1], [0], [0], [1], [0, 0, 1, 1], [], []>} : vector<16x64xbf16>, vector<64x256xbf16>, vector<16x256xf32> -> vector<16x256xf32>
    %321 = arith.addf %318, %320 : vector<16x256xf32>
    %322 = arith.negf %321 : vector<16x256xf32>
    %323 = math.exp %322 : vector<16x256xf32>
    %cst_83 = arith.constant 1.000000e+00 : f32
    %324 = vector.broadcast %cst_83 : f32 to vector<16x256xf32>
    %325 = arith.addf %324, %323 : vector<16x256xf32>
    %326 = arith.divf %324, %325 : vector<16x256xf32>
    %327 = vector.extract_strided_slice %326 {offsets = [0, 0], sizes = [16, 64], strides = [1, 1]} : vector<16x256xf32> to vector<16x64xf32>
    %328 = vector.extract_strided_slice %326 {offsets = [0, 64], sizes = [16, 64], strides = [1, 1]} : vector<16x256xf32> to vector<16x64xf32>
    %329 = vector.extract_strided_slice %326 {offsets = [0, 128], sizes = [16, 64], strides = [1, 1]} : vector<16x256xf32> to vector<16x64xf32>
    %cst_84 = arith.constant 2.000000e+00 : f32
    %330 = vector.broadcast %cst_84 : f32 to vector<16x64xf32>
    %331 = arith.mulf %330, %329 : vector<16x64xf32>
    %cst_85 = arith.constant 1.000000e+00 : f32
    %332 = vector.broadcast %cst_85 : f32 to vector<16x64xf32>
    %333 = arith.subf %331, %332 : vector<16x64xf32>
    %334 = vector.extract_strided_slice %326 {offsets = [0, 192], sizes = [16, 64], strides = [1, 1]} : vector<16x256xf32> to vector<16x64xf32>
    %335 = arith.mulf %328, %288 : vector<16x64xf32>
    %336 = arith.mulf %327, %333 : vector<16x64xf32>
    %337 = arith.addf %335, %336 : vector<16x64xf32>
    %338 = math.tanh %337 : vector<16x64xf32>
    %339 = arith.mulf %334, %338 : vector<16x64xf32>
    %340 = arith.truncf %339 : vector<16x64xf32> to vector<16x64xbf16>
    %cst_86 = arith.constant dense<0.000000e+00> : vector<16x256xf32>
    %341 = tpu.matmul %340, %17, %cst_86 {dimension_numbers = #tpu.dot_dimension_numbers<[1], [0], [0], [1], [0, 0, 1, 1], [], []>} : vector<16x64xbf16>, vector<64x256xbf16>, vector<16x256xf32> -> vector<16x256xf32>
    %342 = arith.truncf %314 : vector<16x64xf32> to vector<16x64xbf16>
    %cst_87 = arith.constant dense<0.000000e+00> : vector<16x256xf32>
    %343 = tpu.matmul %342, %18, %cst_87 {dimension_numbers = #tpu.dot_dimension_numbers<[1], [0], [0], [1], [0, 0, 1, 1], [], []>} : vector<16x64xbf16>, vector<64x256xbf16>, vector<16x256xf32> -> vector<16x256xf32>
    %344 = arith.addf %341, %343 : vector<16x256xf32>
    %345 = arith.addf %344, %21 : vector<16x256xf32>
    %346 = arith.negf %345 : vector<16x256xf32>
    %347 = math.exp %346 : vector<16x256xf32>
    %cst_88 = arith.constant 1.000000e+00 : f32
    %348 = vector.broadcast %cst_88 : f32 to vector<16x256xf32>
    %349 = arith.addf %348, %347 : vector<16x256xf32>
    %350 = arith.divf %348, %349 : vector<16x256xf32>
    %351 = vector.extract_strided_slice %350 {offsets = [0, 0], sizes = [16, 64], strides = [1, 1]} : vector<16x256xf32> to vector<16x64xf32>
    %352 = vector.extract_strided_slice %350 {offsets = [0, 64], sizes = [16, 64], strides = [1, 1]} : vector<16x256xf32> to vector<16x64xf32>
    %353 = vector.extract_strided_slice %350 {offsets = [0, 128], sizes = [16, 64], strides = [1, 1]} : vector<16x256xf32> to vector<16x64xf32>
    %cst_89 = arith.constant 2.000000e+00 : f32
    %354 = vector.broadcast %cst_89 : f32 to vector<16x64xf32>
    %355 = arith.mulf %354, %353 : vector<16x64xf32>
    %cst_90 = arith.constant 1.000000e+00 : f32
    %356 = vector.broadcast %cst_90 : f32 to vector<16x64xf32>
    %357 = arith.subf %355, %356 : vector<16x64xf32>
    %358 = vector.extract_strided_slice %350 {offsets = [0, 192], sizes = [16, 64], strides = [1, 1]} : vector<16x256xf32> to vector<16x64xf32>
    %359 = arith.mulf %352, %312 : vector<16x64xf32>
    %360 = arith.mulf %351, %357 : vector<16x64xf32>
    %361 = arith.addf %359, %360 : vector<16x64xf32>
    %362 = math.tanh %361 : vector<16x64xf32>
    %363 = arith.mulf %358, %362 : vector<16x64xf32>
    %c6_i32 = arith.constant 6 : i32
    %364 = vector.broadcast %c6_i32 : i32 to vector<16x64xi32>
    %365 = arith.cmpi eq, %22, %364 : vector<16x64xi32>
    %366 = arith.select %365, %363, %317 : vector<16x64xi1>, vector<16x64xf32>
    %c112 = arith.constant 112 : index
    %c0_91 = arith.constant 0 : index
    %367 = vector.load %arg14[%c112, %c0_91] : memref<192x256xf32, #tpu.memory_space<vmem>>, vector<16x256xf32>
    %368 = arith.truncf %339 : vector<16x64xf32> to vector<16x64xbf16>
    %cst_92 = arith.constant dense<0.000000e+00> : vector<16x256xf32>
    %369 = tpu.matmul %368, %16, %cst_92 {dimension_numbers = #tpu.dot_dimension_numbers<[1], [0], [0], [1], [0, 0, 1, 1], [], []>} : vector<16x64xbf16>, vector<64x256xbf16>, vector<16x256xf32> -> vector<16x256xf32>
    %370 = arith.addf %367, %369 : vector<16x256xf32>
    %371 = arith.negf %370 : vector<16x256xf32>
    %372 = math.exp %371 : vector<16x256xf32>
    %cst_93 = arith.constant 1.000000e+00 : f32
    %373 = vector.broadcast %cst_93 : f32 to vector<16x256xf32>
    %374 = arith.addf %373, %372 : vector<16x256xf32>
    %375 = arith.divf %373, %374 : vector<16x256xf32>
    %376 = vector.extract_strided_slice %375 {offsets = [0, 0], sizes = [16, 64], strides = [1, 1]} : vector<16x256xf32> to vector<16x64xf32>
    %377 = vector.extract_strided_slice %375 {offsets = [0, 64], sizes = [16, 64], strides = [1, 1]} : vector<16x256xf32> to vector<16x64xf32>
    %378 = vector.extract_strided_slice %375 {offsets = [0, 128], sizes = [16, 64], strides = [1, 1]} : vector<16x256xf32> to vector<16x64xf32>
    %cst_94 = arith.constant 2.000000e+00 : f32
    %379 = vector.broadcast %cst_94 : f32 to vector<16x64xf32>
    %380 = arith.mulf %379, %378 : vector<16x64xf32>
    %cst_95 = arith.constant 1.000000e+00 : f32
    %381 = vector.broadcast %cst_95 : f32 to vector<16x64xf32>
    %382 = arith.subf %380, %381 : vector<16x64xf32>
    %383 = vector.extract_strided_slice %375 {offsets = [0, 192], sizes = [16, 64], strides = [1, 1]} : vector<16x256xf32> to vector<16x64xf32>
    %384 = arith.mulf %377, %337 : vector<16x64xf32>
    %385 = arith.mulf %376, %382 : vector<16x64xf32>
    %386 = arith.addf %384, %385 : vector<16x64xf32>
    %387 = math.tanh %386 : vector<16x64xf32>
    %388 = arith.mulf %383, %387 : vector<16x64xf32>
    %389 = arith.truncf %388 : vector<16x64xf32> to vector<16x64xbf16>
    %cst_96 = arith.constant dense<0.000000e+00> : vector<16x256xf32>
    %390 = tpu.matmul %389, %17, %cst_96 {dimension_numbers = #tpu.dot_dimension_numbers<[1], [0], [0], [1], [0, 0, 1, 1], [], []>} : vector<16x64xbf16>, vector<64x256xbf16>, vector<16x256xf32> -> vector<16x256xf32>
    %391 = arith.truncf %363 : vector<16x64xf32> to vector<16x64xbf16>
    %cst_97 = arith.constant dense<0.000000e+00> : vector<16x256xf32>
    %392 = tpu.matmul %391, %18, %cst_97 {dimension_numbers = #tpu.dot_dimension_numbers<[1], [0], [0], [1], [0, 0, 1, 1], [], []>} : vector<16x64xbf16>, vector<64x256xbf16>, vector<16x256xf32> -> vector<16x256xf32>
    %393 = arith.addf %390, %392 : vector<16x256xf32>
    %394 = arith.addf %393, %21 : vector<16x256xf32>
    %395 = arith.negf %394 : vector<16x256xf32>
    %396 = math.exp %395 : vector<16x256xf32>
    %cst_98 = arith.constant 1.000000e+00 : f32
    %397 = vector.broadcast %cst_98 : f32 to vector<16x256xf32>
    %398 = arith.addf %397, %396 : vector<16x256xf32>
    %399 = arith.divf %397, %398 : vector<16x256xf32>
    %400 = vector.extract_strided_slice %399 {offsets = [0, 0], sizes = [16, 64], strides = [1, 1]} : vector<16x256xf32> to vector<16x64xf32>
    %401 = vector.extract_strided_slice %399 {offsets = [0, 64], sizes = [16, 64], strides = [1, 1]} : vector<16x256xf32> to vector<16x64xf32>
    %402 = vector.extract_strided_slice %399 {offsets = [0, 128], sizes = [16, 64], strides = [1, 1]} : vector<16x256xf32> to vector<16x64xf32>
    %cst_99 = arith.constant 2.000000e+00 : f32
    %403 = vector.broadcast %cst_99 : f32 to vector<16x64xf32>
    %404 = arith.mulf %403, %402 : vector<16x64xf32>
    %cst_100 = arith.constant 1.000000e+00 : f32
    %405 = vector.broadcast %cst_100 : f32 to vector<16x64xf32>
    %406 = arith.subf %404, %405 : vector<16x64xf32>
    %407 = vector.extract_strided_slice %399 {offsets = [0, 192], sizes = [16, 64], strides = [1, 1]} : vector<16x256xf32> to vector<16x64xf32>
    %408 = arith.mulf %401, %361 : vector<16x64xf32>
    %409 = arith.mulf %400, %406 : vector<16x64xf32>
    %410 = arith.addf %408, %409 : vector<16x64xf32>
    %411 = math.tanh %410 : vector<16x64xf32>
    %412 = arith.mulf %407, %411 : vector<16x64xf32>
    %c7_i32 = arith.constant 7 : i32
    %413 = vector.broadcast %c7_i32 : i32 to vector<16x64xi32>
    %414 = arith.cmpi eq, %22, %413 : vector<16x64xi32>
    %415 = arith.select %414, %412, %366 : vector<16x64xi1>, vector<16x64xf32>
    %c128 = arith.constant 128 : index
    %c0_101 = arith.constant 0 : index
    %416 = vector.load %arg14[%c128, %c0_101] : memref<192x256xf32, #tpu.memory_space<vmem>>, vector<16x256xf32>
    %417 = arith.truncf %388 : vector<16x64xf32> to vector<16x64xbf16>
    %cst_102 = arith.constant dense<0.000000e+00> : vector<16x256xf32>
    %418 = tpu.matmul %417, %16, %cst_102 {dimension_numbers = #tpu.dot_dimension_numbers<[1], [0], [0], [1], [0, 0, 1, 1], [], []>} : vector<16x64xbf16>, vector<64x256xbf16>, vector<16x256xf32> -> vector<16x256xf32>
    %419 = arith.addf %416, %418 : vector<16x256xf32>
    %420 = arith.negf %419 : vector<16x256xf32>
    %421 = math.exp %420 : vector<16x256xf32>
    %cst_103 = arith.constant 1.000000e+00 : f32
    %422 = vector.broadcast %cst_103 : f32 to vector<16x256xf32>
    %423 = arith.addf %422, %421 : vector<16x256xf32>
    %424 = arith.divf %422, %423 : vector<16x256xf32>
    %425 = vector.extract_strided_slice %424 {offsets = [0, 0], sizes = [16, 64], strides = [1, 1]} : vector<16x256xf32> to vector<16x64xf32>
    %426 = vector.extract_strided_slice %424 {offsets = [0, 64], sizes = [16, 64], strides = [1, 1]} : vector<16x256xf32> to vector<16x64xf32>
    %427 = vector.extract_strided_slice %424 {offsets = [0, 128], sizes = [16, 64], strides = [1, 1]} : vector<16x256xf32> to vector<16x64xf32>
    %cst_104 = arith.constant 2.000000e+00 : f32
    %428 = vector.broadcast %cst_104 : f32 to vector<16x64xf32>
    %429 = arith.mulf %428, %427 : vector<16x64xf32>
    %cst_105 = arith.constant 1.000000e+00 : f32
    %430 = vector.broadcast %cst_105 : f32 to vector<16x64xf32>
    %431 = arith.subf %429, %430 : vector<16x64xf32>
    %432 = vector.extract_strided_slice %424 {offsets = [0, 192], sizes = [16, 64], strides = [1, 1]} : vector<16x256xf32> to vector<16x64xf32>
    %433 = arith.mulf %426, %386 : vector<16x64xf32>
    %434 = arith.mulf %425, %431 : vector<16x64xf32>
    %435 = arith.addf %433, %434 : vector<16x64xf32>
    %436 = math.tanh %435 : vector<16x64xf32>
    %437 = arith.mulf %432, %436 : vector<16x64xf32>
    %438 = arith.truncf %437 : vector<16x64xf32> to vector<16x64xbf16>
    %cst_106 = arith.constant dense<0.000000e+00> : vector<16x256xf32>
    %439 = tpu.matmul %438, %17, %cst_106 {dimension_numbers = #tpu.dot_dimension_numbers<[1], [0], [0], [1], [0, 0, 1, 1], [], []>} : vector<16x64xbf16>, vector<64x256xbf16>, vector<16x256xf32> -> vector<16x256xf32>
    %440 = arith.truncf %412 : vector<16x64xf32> to vector<16x64xbf16>
    %cst_107 = arith.constant dense<0.000000e+00> : vector<16x256xf32>
    %441 = tpu.matmul %440, %18, %cst_107 {dimension_numbers = #tpu.dot_dimension_numbers<[1], [0], [0], [1], [0, 0, 1, 1], [], []>} : vector<16x64xbf16>, vector<64x256xbf16>, vector<16x256xf32> -> vector<16x256xf32>
    %442 = arith.addf %439, %441 : vector<16x256xf32>
    %443 = arith.addf %442, %21 : vector<16x256xf32>
    %444 = arith.negf %443 : vector<16x256xf32>
    %445 = math.exp %444 : vector<16x256xf32>
    %cst_108 = arith.constant 1.000000e+00 : f32
    %446 = vector.broadcast %cst_108 : f32 to vector<16x256xf32>
    %447 = arith.addf %446, %445 : vector<16x256xf32>
    %448 = arith.divf %446, %447 : vector<16x256xf32>
    %449 = vector.extract_strided_slice %448 {offsets = [0, 0], sizes = [16, 64], strides = [1, 1]} : vector<16x256xf32> to vector<16x64xf32>
    %450 = vector.extract_strided_slice %448 {offsets = [0, 64], sizes = [16, 64], strides = [1, 1]} : vector<16x256xf32> to vector<16x64xf32>
    %451 = vector.extract_strided_slice %448 {offsets = [0, 128], sizes = [16, 64], strides = [1, 1]} : vector<16x256xf32> to vector<16x64xf32>
    %cst_109 = arith.constant 2.000000e+00 : f32
    %452 = vector.broadcast %cst_109 : f32 to vector<16x64xf32>
    %453 = arith.mulf %452, %451 : vector<16x64xf32>
    %cst_110 = arith.constant 1.000000e+00 : f32
    %454 = vector.broadcast %cst_110 : f32 to vector<16x64xf32>
    %455 = arith.subf %453, %454 : vector<16x64xf32>
    %456 = vector.extract_strided_slice %448 {offsets = [0, 192], sizes = [16, 64], strides = [1, 1]} : vector<16x256xf32> to vector<16x64xf32>
    %457 = arith.mulf %450, %410 : vector<16x64xf32>
    %458 = arith.mulf %449, %455 : vector<16x64xf32>
    %459 = arith.addf %457, %458 : vector<16x64xf32>
    %460 = math.tanh %459 : vector<16x64xf32>
    %461 = arith.mulf %456, %460 : vector<16x64xf32>
    %c8_i32 = arith.constant 8 : i32
    %462 = vector.broadcast %c8_i32 : i32 to vector<16x64xi32>
    %463 = arith.cmpi eq, %22, %462 : vector<16x64xi32>
    %464 = arith.select %463, %461, %415 : vector<16x64xi1>, vector<16x64xf32>
    %c144 = arith.constant 144 : index
    %c0_111 = arith.constant 0 : index
    %465 = vector.load %arg14[%c144, %c0_111] : memref<192x256xf32, #tpu.memory_space<vmem>>, vector<16x256xf32>
    %466 = arith.truncf %437 : vector<16x64xf32> to vector<16x64xbf16>
    %cst_112 = arith.constant dense<0.000000e+00> : vector<16x256xf32>
    %467 = tpu.matmul %466, %16, %cst_112 {dimension_numbers = #tpu.dot_dimension_numbers<[1], [0], [0], [1], [0, 0, 1, 1], [], []>} : vector<16x64xbf16>, vector<64x256xbf16>, vector<16x256xf32> -> vector<16x256xf32>
    %468 = arith.addf %465, %467 : vector<16x256xf32>
    %469 = arith.negf %468 : vector<16x256xf32>
    %470 = math.exp %469 : vector<16x256xf32>
    %cst_113 = arith.constant 1.000000e+00 : f32
    %471 = vector.broadcast %cst_113 : f32 to vector<16x256xf32>
    %472 = arith.addf %471, %470 : vector<16x256xf32>
    %473 = arith.divf %471, %472 : vector<16x256xf32>
    %474 = vector.extract_strided_slice %473 {offsets = [0, 0], sizes = [16, 64], strides = [1, 1]} : vector<16x256xf32> to vector<16x64xf32>
    %475 = vector.extract_strided_slice %473 {offsets = [0, 64], sizes = [16, 64], strides = [1, 1]} : vector<16x256xf32> to vector<16x64xf32>
    %476 = vector.extract_strided_slice %473 {offsets = [0, 128], sizes = [16, 64], strides = [1, 1]} : vector<16x256xf32> to vector<16x64xf32>
    %cst_114 = arith.constant 2.000000e+00 : f32
    %477 = vector.broadcast %cst_114 : f32 to vector<16x64xf32>
    %478 = arith.mulf %477, %476 : vector<16x64xf32>
    %cst_115 = arith.constant 1.000000e+00 : f32
    %479 = vector.broadcast %cst_115 : f32 to vector<16x64xf32>
    %480 = arith.subf %478, %479 : vector<16x64xf32>
    %481 = vector.extract_strided_slice %473 {offsets = [0, 192], sizes = [16, 64], strides = [1, 1]} : vector<16x256xf32> to vector<16x64xf32>
    %482 = arith.mulf %475, %435 : vector<16x64xf32>
    %483 = arith.mulf %474, %480 : vector<16x64xf32>
    %484 = arith.addf %482, %483 : vector<16x64xf32>
    %485 = math.tanh %484 : vector<16x64xf32>
    %486 = arith.mulf %481, %485 : vector<16x64xf32>
    %487 = arith.truncf %486 : vector<16x64xf32> to vector<16x64xbf16>
    %cst_116 = arith.constant dense<0.000000e+00> : vector<16x256xf32>
    %488 = tpu.matmul %487, %17, %cst_116 {dimension_numbers = #tpu.dot_dimension_numbers<[1], [0], [0], [1], [0, 0, 1, 1], [], []>} : vector<16x64xbf16>, vector<64x256xbf16>, vector<16x256xf32> -> vector<16x256xf32>
    %489 = arith.truncf %461 : vector<16x64xf32> to vector<16x64xbf16>
    %cst_117 = arith.constant dense<0.000000e+00> : vector<16x256xf32>
    %490 = tpu.matmul %489, %18, %cst_117 {dimension_numbers = #tpu.dot_dimension_numbers<[1], [0], [0], [1], [0, 0, 1, 1], [], []>} : vector<16x64xbf16>, vector<64x256xbf16>, vector<16x256xf32> -> vector<16x256xf32>
    %491 = arith.addf %488, %490 : vector<16x256xf32>
    %492 = arith.addf %491, %21 : vector<16x256xf32>
    %493 = arith.negf %492 : vector<16x256xf32>
    %494 = math.exp %493 : vector<16x256xf32>
    %cst_118 = arith.constant 1.000000e+00 : f32
    %495 = vector.broadcast %cst_118 : f32 to vector<16x256xf32>
    %496 = arith.addf %495, %494 : vector<16x256xf32>
    %497 = arith.divf %495, %496 : vector<16x256xf32>
    %498 = vector.extract_strided_slice %497 {offsets = [0, 0], sizes = [16, 64], strides = [1, 1]} : vector<16x256xf32> to vector<16x64xf32>
    %499 = vector.extract_strided_slice %497 {offsets = [0, 64], sizes = [16, 64], strides = [1, 1]} : vector<16x256xf32> to vector<16x64xf32>
    %500 = vector.extract_strided_slice %497 {offsets = [0, 128], sizes = [16, 64], strides = [1, 1]} : vector<16x256xf32> to vector<16x64xf32>
    %cst_119 = arith.constant 2.000000e+00 : f32
    %501 = vector.broadcast %cst_119 : f32 to vector<16x64xf32>
    %502 = arith.mulf %501, %500 : vector<16x64xf32>
    %cst_120 = arith.constant 1.000000e+00 : f32
    %503 = vector.broadcast %cst_120 : f32 to vector<16x64xf32>
    %504 = arith.subf %502, %503 : vector<16x64xf32>
    %505 = vector.extract_strided_slice %497 {offsets = [0, 192], sizes = [16, 64], strides = [1, 1]} : vector<16x256xf32> to vector<16x64xf32>
    %506 = arith.mulf %499, %459 : vector<16x64xf32>
    %507 = arith.mulf %498, %504 : vector<16x64xf32>
    %508 = arith.addf %506, %507 : vector<16x64xf32>
    %509 = math.tanh %508 : vector<16x64xf32>
    %510 = arith.mulf %505, %509 : vector<16x64xf32>
    %c9_i32 = arith.constant 9 : i32
    %511 = vector.broadcast %c9_i32 : i32 to vector<16x64xi32>
    %512 = arith.cmpi eq, %22, %511 : vector<16x64xi32>
    %513 = arith.select %512, %510, %464 : vector<16x64xi1>, vector<16x64xf32>
    %c160 = arith.constant 160 : index
    %c0_121 = arith.constant 0 : index
    %514 = vector.load %arg14[%c160, %c0_121] : memref<192x256xf32, #tpu.memory_space<vmem>>, vector<16x256xf32>
    %515 = arith.truncf %486 : vector<16x64xf32> to vector<16x64xbf16>
    %cst_122 = arith.constant dense<0.000000e+00> : vector<16x256xf32>
    %516 = tpu.matmul %515, %16, %cst_122 {dimension_numbers = #tpu.dot_dimension_numbers<[1], [0], [0], [1], [0, 0, 1, 1], [], []>} : vector<16x64xbf16>, vector<64x256xbf16>, vector<16x256xf32> -> vector<16x256xf32>
    %517 = arith.addf %514, %516 : vector<16x256xf32>
    %518 = arith.negf %517 : vector<16x256xf32>
    %519 = math.exp %518 : vector<16x256xf32>
    %cst_123 = arith.constant 1.000000e+00 : f32
    %520 = vector.broadcast %cst_123 : f32 to vector<16x256xf32>
    %521 = arith.addf %520, %519 : vector<16x256xf32>
    %522 = arith.divf %520, %521 : vector<16x256xf32>
    %523 = vector.extract_strided_slice %522 {offsets = [0, 0], sizes = [16, 64], strides = [1, 1]} : vector<16x256xf32> to vector<16x64xf32>
    %524 = vector.extract_strided_slice %522 {offsets = [0, 64], sizes = [16, 64], strides = [1, 1]} : vector<16x256xf32> to vector<16x64xf32>
    %525 = vector.extract_strided_slice %522 {offsets = [0, 128], sizes = [16, 64], strides = [1, 1]} : vector<16x256xf32> to vector<16x64xf32>
    %cst_124 = arith.constant 2.000000e+00 : f32
    %526 = vector.broadcast %cst_124 : f32 to vector<16x64xf32>
    %527 = arith.mulf %526, %525 : vector<16x64xf32>
    %cst_125 = arith.constant 1.000000e+00 : f32
    %528 = vector.broadcast %cst_125 : f32 to vector<16x64xf32>
    %529 = arith.subf %527, %528 : vector<16x64xf32>
    %530 = vector.extract_strided_slice %522 {offsets = [0, 192], sizes = [16, 64], strides = [1, 1]} : vector<16x256xf32> to vector<16x64xf32>
    %531 = arith.mulf %524, %484 : vector<16x64xf32>
    %532 = arith.mulf %523, %529 : vector<16x64xf32>
    %533 = arith.addf %531, %532 : vector<16x64xf32>
    %534 = math.tanh %533 : vector<16x64xf32>
    %535 = arith.mulf %530, %534 : vector<16x64xf32>
    %536 = arith.truncf %535 : vector<16x64xf32> to vector<16x64xbf16>
    %cst_126 = arith.constant dense<0.000000e+00> : vector<16x256xf32>
    %537 = tpu.matmul %536, %17, %cst_126 {dimension_numbers = #tpu.dot_dimension_numbers<[1], [0], [0], [1], [0, 0, 1, 1], [], []>} : vector<16x64xbf16>, vector<64x256xbf16>, vector<16x256xf32> -> vector<16x256xf32>
    %538 = arith.truncf %510 : vector<16x64xf32> to vector<16x64xbf16>
    %cst_127 = arith.constant dense<0.000000e+00> : vector<16x256xf32>
    %539 = tpu.matmul %538, %18, %cst_127 {dimension_numbers = #tpu.dot_dimension_numbers<[1], [0], [0], [1], [0, 0, 1, 1], [], []>} : vector<16x64xbf16>, vector<64x256xbf16>, vector<16x256xf32> -> vector<16x256xf32>
    %540 = arith.addf %537, %539 : vector<16x256xf32>
    %541 = arith.addf %540, %21 : vector<16x256xf32>
    %542 = arith.negf %541 : vector<16x256xf32>
    %543 = math.exp %542 : vector<16x256xf32>
    %cst_128 = arith.constant 1.000000e+00 : f32
    %544 = vector.broadcast %cst_128 : f32 to vector<16x256xf32>
    %545 = arith.addf %544, %543 : vector<16x256xf32>
    %546 = arith.divf %544, %545 : vector<16x256xf32>
    %547 = vector.extract_strided_slice %546 {offsets = [0, 0], sizes = [16, 64], strides = [1, 1]} : vector<16x256xf32> to vector<16x64xf32>
    %548 = vector.extract_strided_slice %546 {offsets = [0, 64], sizes = [16, 64], strides = [1, 1]} : vector<16x256xf32> to vector<16x64xf32>
    %549 = vector.extract_strided_slice %546 {offsets = [0, 128], sizes = [16, 64], strides = [1, 1]} : vector<16x256xf32> to vector<16x64xf32>
    %cst_129 = arith.constant 2.000000e+00 : f32
    %550 = vector.broadcast %cst_129 : f32 to vector<16x64xf32>
    %551 = arith.mulf %550, %549 : vector<16x64xf32>
    %cst_130 = arith.constant 1.000000e+00 : f32
    %552 = vector.broadcast %cst_130 : f32 to vector<16x64xf32>
    %553 = arith.subf %551, %552 : vector<16x64xf32>
    %554 = vector.extract_strided_slice %546 {offsets = [0, 192], sizes = [16, 64], strides = [1, 1]} : vector<16x256xf32> to vector<16x64xf32>
    %555 = arith.mulf %548, %508 : vector<16x64xf32>
    %556 = arith.mulf %547, %553 : vector<16x64xf32>
    %557 = arith.addf %555, %556 : vector<16x64xf32>
    %558 = math.tanh %557 : vector<16x64xf32>
    %559 = arith.mulf %554, %558 : vector<16x64xf32>
    %c10_i32 = arith.constant 10 : i32
    %560 = vector.broadcast %c10_i32 : i32 to vector<16x64xi32>
    %561 = arith.cmpi eq, %22, %560 : vector<16x64xi32>
    %562 = arith.select %561, %559, %513 : vector<16x64xi1>, vector<16x64xf32>
    %c176 = arith.constant 176 : index
    %c0_131 = arith.constant 0 : index
    %563 = vector.load %arg14[%c176, %c0_131] : memref<192x256xf32, #tpu.memory_space<vmem>>, vector<16x256xf32>
    %564 = arith.truncf %535 : vector<16x64xf32> to vector<16x64xbf16>
    %cst_132 = arith.constant dense<0.000000e+00> : vector<16x256xf32>
    %565 = tpu.matmul %564, %16, %cst_132 {dimension_numbers = #tpu.dot_dimension_numbers<[1], [0], [0], [1], [0, 0, 1, 1], [], []>} : vector<16x64xbf16>, vector<64x256xbf16>, vector<16x256xf32> -> vector<16x256xf32>
    %566 = arith.addf %563, %565 : vector<16x256xf32>
    %567 = arith.negf %566 : vector<16x256xf32>
    %568 = math.exp %567 : vector<16x256xf32>
    %cst_133 = arith.constant 1.000000e+00 : f32
    %569 = vector.broadcast %cst_133 : f32 to vector<16x256xf32>
    %570 = arith.addf %569, %568 : vector<16x256xf32>
    %571 = arith.divf %569, %570 : vector<16x256xf32>
    %572 = vector.extract_strided_slice %571 {offsets = [0, 0], sizes = [16, 64], strides = [1, 1]} : vector<16x256xf32> to vector<16x64xf32>
    %573 = vector.extract_strided_slice %571 {offsets = [0, 64], sizes = [16, 64], strides = [1, 1]} : vector<16x256xf32> to vector<16x64xf32>
    %574 = vector.extract_strided_slice %571 {offsets = [0, 128], sizes = [16, 64], strides = [1, 1]} : vector<16x256xf32> to vector<16x64xf32>
    %cst_134 = arith.constant 2.000000e+00 : f32
    %575 = vector.broadcast %cst_134 : f32 to vector<16x64xf32>
    %576 = arith.mulf %575, %574 : vector<16x64xf32>
    %cst_135 = arith.constant 1.000000e+00 : f32
    %577 = vector.broadcast %cst_135 : f32 to vector<16x64xf32>
    %578 = arith.subf %576, %577 : vector<16x64xf32>
    %579 = vector.extract_strided_slice %571 {offsets = [0, 192], sizes = [16, 64], strides = [1, 1]} : vector<16x256xf32> to vector<16x64xf32>
    %580 = arith.mulf %573, %533 : vector<16x64xf32>
    %581 = arith.mulf %572, %578 : vector<16x64xf32>
    %582 = arith.addf %580, %581 : vector<16x64xf32>
    %583 = math.tanh %582 : vector<16x64xf32>
    %584 = arith.mulf %579, %583 : vector<16x64xf32>
    %585 = arith.truncf %584 : vector<16x64xf32> to vector<16x64xbf16>
    %cst_136 = arith.constant dense<0.000000e+00> : vector<16x256xf32>
    %586 = tpu.matmul %585, %17, %cst_136 {dimension_numbers = #tpu.dot_dimension_numbers<[1], [0], [0], [1], [0, 0, 1, 1], [], []>} : vector<16x64xbf16>, vector<64x256xbf16>, vector<16x256xf32> -> vector<16x256xf32>
    %587 = arith.truncf %559 : vector<16x64xf32> to vector<16x64xbf16>
    %cst_137 = arith.constant dense<0.000000e+00> : vector<16x256xf32>
    %588 = tpu.matmul %587, %18, %cst_137 {dimension_numbers = #tpu.dot_dimension_numbers<[1], [0], [0], [1], [0, 0, 1, 1], [], []>} : vector<16x64xbf16>, vector<64x256xbf16>, vector<16x256xf32> -> vector<16x256xf32>
    %589 = arith.addf %586, %588 : vector<16x256xf32>
    %590 = arith.addf %589, %21 : vector<16x256xf32>
    %591 = arith.negf %590 : vector<16x256xf32>
    %592 = math.exp %591 : vector<16x256xf32>
    %cst_138 = arith.constant 1.000000e+00 : f32
    %593 = vector.broadcast %cst_138 : f32 to vector<16x256xf32>
    %594 = arith.addf %593, %592 : vector<16x256xf32>
    %595 = arith.divf %593, %594 : vector<16x256xf32>
    %596 = vector.extract_strided_slice %595 {offsets = [0, 0], sizes = [16, 64], strides = [1, 1]} : vector<16x256xf32> to vector<16x64xf32>
    %597 = vector.extract_strided_slice %595 {offsets = [0, 64], sizes = [16, 64], strides = [1, 1]} : vector<16x256xf32> to vector<16x64xf32>
    %598 = vector.extract_strided_slice %595 {offsets = [0, 128], sizes = [16, 64], strides = [1, 1]} : vector<16x256xf32> to vector<16x64xf32>
    %cst_139 = arith.constant 2.000000e+00 : f32
    %599 = vector.broadcast %cst_139 : f32 to vector<16x64xf32>
    %600 = arith.mulf %599, %598 : vector<16x64xf32>
    %cst_140 = arith.constant 1.000000e+00 : f32
    %601 = vector.broadcast %cst_140 : f32 to vector<16x64xf32>
    %602 = arith.subf %600, %601 : vector<16x64xf32>
    %603 = vector.extract_strided_slice %595 {offsets = [0, 192], sizes = [16, 64], strides = [1, 1]} : vector<16x256xf32> to vector<16x64xf32>
    %604 = arith.mulf %597, %557 : vector<16x64xf32>
    %605 = arith.mulf %596, %602 : vector<16x64xf32>
    %606 = arith.addf %604, %605 : vector<16x64xf32>
    %607 = math.tanh %606 : vector<16x64xf32>
    %608 = arith.mulf %603, %607 : vector<16x64xf32>
    %c11_i32 = arith.constant 11 : i32
    %609 = vector.broadcast %c11_i32 : i32 to vector<16x64xi32>
    %610 = arith.cmpi eq, %22, %609 : vector<16x64xi32>
    %611 = arith.select %610, %608, %562 : vector<16x64xi1>, vector<16x64xf32>
    %c0_141 = arith.constant 0 : index
    %c0_142 = arith.constant 0 : index
    %612 = vector.load %arg9[%c0_141, %c0_142] : memref<64x32xf32, #tpu.memory_space<vmem>>, vector<64x32xf32>
    %cst_143 = arith.constant dense<0.000000e+00> : vector<16x32xf32>
    %613 = tpu.matmul %611, %612, %cst_143 {dimension_numbers = #tpu.dot_dimension_numbers<[1], [0], [0], [1], [0, 0, 1, 1], [], []>} : vector<16x64xf32>, vector<64x32xf32>, vector<16x32xf32> -> vector<16x32xf32>
    %c0_144 = arith.constant 0 : index
    %c0_145 = arith.constant 0 : index
    %614 = vector.load %arg10[%c0_144, %c0_145] : memref<1x32xf32, #tpu.memory_space<vmem>>, vector<1x32xf32>
    %615 = vector.broadcast %614 : vector<1x32xf32> to vector<16x32xf32>
    %616 = arith.addf %613, %615 : vector<16x32xf32>
    %cst_146 = arith.constant 0.000000e+00 : f32
    %617 = vector.broadcast %cst_146 : f32 to vector<16x32xf32>
    %618 = arith.cmpf ogt, %616, %617 : vector<16x32xf32>
    %cst_147 = arith.constant 0.00999999977 : f32
    %619 = vector.broadcast %cst_147 : f32 to vector<16x32xf32>
    %620 = arith.mulf %619, %616 : vector<16x32xf32>
    %621 = arith.select %618, %616, %620 : vector<16x32xi1>, vector<16x32xf32>
    %c0_148 = arith.constant 0 : index
    %c0_149 = arith.constant 0 : index
    %622 = vector.load %arg11[%c0_148, %c0_149] : memref<32x1xf32, #tpu.memory_space<vmem>>, vector<32x1xf32>
    %cst_150 = arith.constant dense<0.000000e+00> : vector<16x1xf32>
    %623 = tpu.matmul %621, %622, %cst_150 {dimension_numbers = #tpu.dot_dimension_numbers<[1], [0], [0], [1], [0, 0, 1, 1], [], []>} : vector<16x32xf32>, vector<32x1xf32>, vector<16x1xf32> -> vector<16x1xf32>
    %c0_151 = arith.constant 0 : index
    %c0_152 = arith.constant 0 : index
    %624 = vector.load %arg12[%c0_151, %c0_152] : memref<1x1xf32, #tpu.memory_space<vmem>>, vector<1x1xf32>
    %625 = vector.broadcast %624 : vector<1x1xf32> to vector<16x1xf32>
    %626 = arith.addf %623, %625 : vector<16x1xf32>
    %627 = arith.negf %626 : vector<16x1xf32>
    %628 = math.exp %627 : vector<16x1xf32>
    %cst_153 = arith.constant 1.000000e+00 : f32
    %629 = vector.broadcast %cst_153 : f32 to vector<16x1xf32>
    %630 = arith.addf %629, %628 : vector<16x1xf32>
    %631 = arith.divf %629, %630 : vector<16x1xf32>
    %c0_154 = arith.constant 0 : index
    %c0_155 = arith.constant 0 : index
    %632 = vector.load %arg13[%c0_154, %c0_155] : memref<16x1xf32, #tpu.memory_space<vmem>>, vector<16x1xf32>
    tpu.vector_store %arg13[%c0_154, %c0_155], %631 {strides = array<i32>} : memref<16x1xf32, #tpu.memory_space<vmem>>, vector<16x1xf32>,
    return
  }
}

</mosaic_0001>

<bundles_post_ra>
// kernel: double_lstm_classifier_forward.1
= control target key start
LH: loop header
LB: loop body
LE: loop exit
PB: predicated region body
PF: predicated region fallthrough
CT: control target
= control target key end

     0   :  { %v7075_v0 = vmov 0   ;;  %v5187_v27 = vmov 0.0   ;;  %v47_v38 = vlaneseq  ;;  %vm389_vm4 = vcmask 523264   ;;  %s7061_s0 = inlined_call_operand.vmem [shape: s32[192,1], index: 0, kind: input, shape index: {}]   ;;  %s7062_s1 = inlined_call_operand.vmem [shape: s32[192,1], index: 1, kind: input, shape index: {}]   ;;  %s7063_s3 = inlined_call_operand.vmem [shape: f32[64,256], index: 3, kind: input, shape index: {}]   ;;  %s7064_s5 = inlined_call_operand.vmem [shape: bf16[64,256], index: 5, kind: input, shape index: {}]   ;;  %s7065_s4 = inlined_call_operand.vmem [shape: f32[1,256], index: 4, kind: input, shape index: {}]   ;;  %s7066_s7 = inlined_call_operand.vmem [shape: bf16[64,256], index: 7, kind: input, shape index: {}]   ;;  %s7067_s6 = inlined_call_operand.vmem [shape: bf16[64,256], index: 6, kind: input, shape index: {}]   ;;  %s7068_s8 = inlined_call_operand.vmem [shape: f32[1,256], index: 8, kind: input, shape index: {}]   ;;  %s7069_s9 = inlined_call_operand.vmem [shape: f32[64,32], index: 9, kind: input, shape index: {}]   ;;  %s7070_s2 = inlined_call_operand.vmem [shape: s32[16,64], index: 2, kind: input, shape index: {}]   ;;  %s7071_s11 = inlined_call_operand.vmem [shape: f32[32,1], index: 11, kind: input, shape index: {}]   ;;  %s7072_s12 = inlined_call_operand.<no memory space> [shape: f32[1,1], index: 12, kind: input, shape index: {}]   ;;  %s7073_s10 = inlined_call_operand.vmem [shape: f32[1,32], index: 10, kind: input, shape index: {}]   ;;  %s7074_s13 = inlined_call_operand.vmem [shape: f32[16,1], index: 13, kind: output, shape index: {}]  }
   0x1   :  { %4591 = vset.pattern.permute.xlu1 %v7075_v0  ;;  %4590 = vset.pattern.permute.xlu0 %v7075_v0  ;;  %v50_v1 = vld [vmem:[%s7061_s0 + $0x8] sm:$0xff]  ;;  %v49_v2 = vld [vmem:[%s7061_s0] sm:$0xff]  ;;  %v364_v6 = vld [vmem:[%s7063_s3 + $0x18] sm:$0xff] }
   0x2   :  { %v170_v3 = vld [vmem:[%s7062_s1 + $0x8] sm:$0xff]  ;;  %77 = vperm.xlu1 %4591, %v50_v1   ;;  %74 = vperm.xlu0 %4590, %v49_v2   ;;  %v169_v4 = vld [vmem:[%s7062_s1] sm:$0xff]  ;;  %v363_v9 = vld [vmem:[%s7063_s3 + $0x10] sm:$0xff]  ;;  %v5374_v41 = vand.u32 127, %v47_v38  ;;  %v5394_v50 = vshrl.u32 %v47_v38, 7 }
   0x3   :  { %v362_v5 = vld [vmem:[%s7063_s3 + $0x8] sm:$0xff]  ;;  %v361_v8 = vld [vmem:[%s7063_s3] sm:$0xff]  ;;  %836 = vmatprep.mubr.bf16.mxu1 %v7075_v0  ;;  %v368_v14 = vld [vmem:[%s7063_s3 + $0x38] sm:$0xff]  ;;  %526 = vmatprep.mubr.f32.mxu0 %v5187_v27 }
   0x4   :  { %v4499_v7 = vpack.c.bf16 %v364_v6, %v362_v5  ;;  %v4501_v10 = vpack.c.bf16 %v363_v9, %v361_v8  ;;  %v5289_v11 = vld [vmem:[%s7064_s5 + $0x4] ss:$8 sps:$4 sm:$0xff]   ;;  %v5294_v12 = vld [vmem:[%s7064_s5] ss:$8 sps:$4 sm:$0xff]   ;;  %v367_v17 = vld [vmem:[%s7063_s3 + $0x30] sm:$0xff]  ;;  %v381_v51 = vsub.s32 0, %v5394_v50 }
   0x5   :  { %v366_v13 = vld [vmem:[%s7063_s3 + $0x28] sm:$0xff]  ;;  %v365_v15 = vld [vmem:[%s7063_s3 + $0x20] sm:$0xff]  ;;  %804 = vmatprep.subr.bf16.mxu1 %v5289_v11  ;;  %v5312_v19 = vld [vmem:[%s7064_s5 + $0x14] ss:$8 sps:$4 sm:$0xff]   ;;  %v385_v53 = vsub.s32 1, %v5394_v50 }
   0x6   :  { %4500 = vmatprep.subr.bf16.mxu0 %v4499_v7  ;;  %197 = vperm.xlu1 %4591, %v170_v3   ;;  %v4503_v16 = vpack.c.bf16 %v368_v14, %v366_v13  ;;  %v4505_v18 = vpack.c.bf16 %v367_v17, %v365_v15  ;;  %v5317_v20 = vld [vmem:[%s7064_s5 + $0x10] ss:$8 sps:$4 sm:$0xff]   ;;  %v370_v21 = vld [vmem:[%s7063_s3 + $0x48] sm:$0xff]  ;;  %v369_v23 = vld [vmem:[%s7063_s3 + $0x40] sm:$0xff] }
   0x7   :  { %194 = vperm.xlu0 %4590, %v169_v4   ;;  %4502 = vmatpush1.bf16.msra.mxu0 %v4501_v10  ;;  %v372_v22 = vld [vmem:[%s7063_s3 + $0x58] sm:$0xff]  ;;  %v371_v24 = vld [vmem:[%s7063_s3 + $0x50] sm:$0xff]  ;;  %v5336_v26 = vld [vmem:[%s7064_s5 + $0x24] ss:$8 sps:$4 sm:$0xff]  }
   0x8   :  { %805 = vmatpush1.bf16.msra.mxu1 %v5294_v12  ;;  %4504 = vmatprep.subr.bf16.mxu0 %v4503_v16  ;;  %v4507_v25 = vpack.c.bf16 %v372_v22, %v370_v21  ;;  %v374_v28 = vld [vmem:[%s7063_s3 + $0x68] sm:$0xff]  ;;  %v376_v29 = vld [vmem:[%s7063_s3 + $0x78] sm:$0xff]  ;;  %v4509_v30 = vpack.c.bf16 %v371_v24, %v369_v23  ;;  %v373_v33 = vld [vmem:[%s7063_s3 + $0x60] sm:$0xff] }
   0x9   :  { %806 = vmatprep.subr.bf16.mxu1 %v5312_v19  ;;  %v5348_v31 = vld [vmem:[%s7064_s5 + $0x20] ss:$8 sps:$4 sm:$0xff]   ;;  %v4511_v32 = vpack.c.bf16 %v376_v29, %v374_v28  ;;  %v375_v34 = vld [vmem:[%s7063_s3 + $0x70] sm:$0xff]  ;;  %v5427_v38 = vld [vmem:[%s7066_s7 + $0x4] ss:$8 sps:$4 sm:$0xff]  }
   0xa   :  { %v5361_v35 = vld [vmem:[%s7064_s5 + $0x34] ss:$8 sps:$4 sm:$0xff]   ;;  %v4513_v36 = vpack.c.bf16 %v375_v34, %v373_v33  ;;  %v5367_v37 = vld [vmem:[%s7064_s5 + $0x30] ss:$8 sps:$4 sm:$0xff]   ;;  %v377_v52 = vld [vmem:[%s7065_s4] sm:$0x3] }
   0xb   :  { %4506 = vmatpush1.bf16.msra.mxu0 %v4505_v18  ;;  %v5403_v54 = vrot.slane %v377_v52, %v381_v51  ;;  %v5407_v55 = vrot.slane %v377_v52, %v385_v53  ;;  %s5188_s4 = smov 64   ;;  %v51_v34 = vld [vmem:[%s7061_s0 + $0x10] sm:$0xff] }
   0xc   :  { %807 = vmatpush1.bf16.msra.mxu1 %v5317_v20  ;;  %4508 = vmatprep.subr.bf16.mxu0 %v4507_v25  ;;  %v5493_v52 = vld [vmem:[%s7067_s6 + $0x10] ss:$8 sps:$4 sm:$0xff]  }
   0xd   :  { %808 = vmatprep.subr.bf16.mxu1 %v5336_v26 }
   0xf   :  { %4510 = vmatpush1.bf16.msra.mxu0 %v4509_v30 }
  0x10   :  { %809 = vmatpush1.bf16.msra.mxu1 %v5348_v31  ;;  %4512 = vmatprep.subr.bf16.mxu0 %v4511_v32 }
  0x11   :  { %810 = vmatprep.subr.bf16.mxu1 %v5361_v35 }
  0x13   :  { %4514 = vmatpush1.bf16.msra.mxu0 %v4513_v36  ;;  %v52_v36 = vld [vmem:[%s7061_s0 + $0x18] sm:$0xff] }
  0x14   :  { %811 = vmatpush1.bf16.msra.mxu1 %v5367_v37  ;;  %1395 = vmatprep.subr.bf16.mxu0 %v5289_v11 }
  0x15   :  { %938 = vmatprep.subr.bf16.mxu1 %v5427_v38 }
  0x17   :  { %837 = vmatmul.mubr.bf16.vlgmr.msra.gmra.mrb[0].mxu1 %v7075_v0 }
  0x18   :  { %970 = vmatprep.mubr.bf16.mxu1 %v7075_v0 }
  0x81   :  { %v78_v39 = vpop.permute.xlu1 %77  ;;  %v75_v40 = vpop.permute.xlu0 %74 }
  0x82   :  { %vm146_vm1 = vcmp.eq.s32.totalorder %v78_v39, %v5374_v41  ;;  %vm145_vm2 = vcmp.eq.s32.totalorder %v75_v40, %v5374_v41  ;;  %v5432_v39 = vld [vmem:[%s7066_s7] ss:$8 sps:$4 sm:$0xff]   ;;  %v5438_v40 = vld [vmem:[%s7066_s7 + $0x14] ss:$8 sps:$4 sm:$0xff]  }
  0x83   :  { %939 = vmatpush1.bf16.msra.mxu1 %v5432_v39 }
  0x84   :  { %940 = vmatprep.subr.bf16.mxu1 %v5438_v40 }
  0x85   :  { %v198_v42 = vpop.permute.xlu1 %197 }
  0x86   :  { %v195_v43 = vpop.permute.xlu0 %194  ;;  %vm266_vm3 = vcmp.eq.s32.totalorder %v198_v42, %v5374_v41  ;;  %v5444_v42 = vld [vmem:[%s7066_s7 + $0x10] ss:$8 sps:$4 sm:$0xff]  }
  0x87   :  { %vm265_vm0 = vcmp.eq.s32.totalorder %v195_v43, %v5374_v41  ;;  %vm290_vm6 = vmor %vm146_vm1, %vm266_vm3  ;;  %v5450_v43 = vld [vmem:[%s7066_s7 + $0x24] ss:$8 sps:$4 sm:$0xff]   ;;  %941 = vmatpush1.bf16.msra.mxu1 %v5444_v42 }
  0x88   :  { %vm289_vm5 = vmor %vm145_vm2, %vm265_vm0  ;;  %v4196_v45 = vsel %vm290_vm6, 1.0, %v5187_v27  ;;  %942 = vmatprep.subr.bf16.mxu1 %v5450_v43 }
  0x89   :  { %v4195_v44 = vsel %vm289_vm5, 1.0, %v5187_v27 }
  0x8a   :  { %4219 = vmatmul.mubr.msk.f32.vlgmr.msra.gmra.mrb[0].mxu0 %vm389_vm4, %v4195_v44  ;;  %v5456_v44 = vld [vmem:[%s7066_s7 + $0x20] ss:$8 sps:$4 sm:$0xff]  }
  0x8b   :  { %532 = vmatprep.mubr.f32.mxu0 %v5187_v27  ;;  %1396 = vmatpush1.bf16.msra.mxu0 %v5294_v12 }
  0x8c   :  { %1397 = vmatprep.subr.bf16.mxu0 %v5312_v19  ;;  %943 = vmatpush1.bf16.msra.mxu1 %v5456_v44 }
  0x8e   :  { %4220 = vmatmul.mubr.msk.f32.gmra.mrb[2].mxu0 %vm389_vm4, %v4196_v45  ;;  %v5462_v45 = vld [vmem:[%s7066_s7 + $0x34] ss:$8 sps:$4 sm:$0xff]  }
  0x8f   :  { %538 = vmatprep.mubr.f32.mxu0 %v5187_v27  ;;  %1398 = vmatpush1.bf16.msra.mxu0 %v5317_v20 }
  0x90   :  { %1399 = vmatprep.subr.bf16.mxu0 %v5336_v26  ;;  %944 = vmatprep.subr.bf16.mxu1 %v5462_v45 }
  0x93   :  { %1400 = vmatpush1.bf16.msra.mxu0 %v5348_v31 }
  0x94   :  { %1401 = vmatprep.subr.bf16.mxu0 %v5361_v35 }
  0x97   :  { %1402 = vmatpush1.bf16.msra.mxu0 %v5367_v37 }
  0x98   :  { %1654 = vmatprep.subr.bf16.mxu0 %v5289_v11 }
  0xea   :  { %v838_v46 = vpop.f32.mrb[0].mxu1 }
  0xeb   :  { %v840_v47 = vpop.f32.mrb[1].mxu1 }
  0xec   :  { %v842_v48 = vpop.f32.mrb[2].mxu1 }
  0xed   :  { %v844_v49 = vpop.f32.mrb[3].mxu1 }
 0x15d   :  { %v528_v56 = vpop.f32.mrb[0].mxu0 }
 0x15e   :  { %v529_v57 = vadd.f32 %v528_v56, %v5403_v54  ;;  %v530_v58 = vpop.f32.mrb[1].mxu0  ;;  %v5500_v56 = vld [vmem:[%s7067_s6 + $0x24] ss:$8 sps:$4 sm:$0xff]  }
 0x15f   :  { %v531_v59 = vadd.f32 %v530_v58, %v5407_v55  ;;  %v5512_v58 = vld [vmem:[%s7067_s6 + $0x34] ss:$8 sps:$4 sm:$0xff]  }
 0x160   :  { %v847_v60 = vadd.f32 %v838_v46, %v529_v57  ;;  %v5468_v46 = vld [vmem:[%s7066_s7 + $0x30] ss:$8 sps:$4 sm:$0xff]   ;;  %v5506_v57 = vld [vmem:[%s7067_s6 + $0x20] ss:$8 sps:$4 sm:$0xff]  }
 0x161   :  { %v848_v61 = vadd.f32 %v840_v47, %v531_v59  ;;  %v534_v62 = vpop.f32.mrb[2].mxu0  ;;  %v5474_v47 = vld [vmem:[%s7067_s6 + $0x4] ss:$8 sps:$4 sm:$0xff]   ;;  %945 = vmatpush1.bf16.msra.mxu1 %v5468_v46  ;;  %v5518_v59 = vld [vmem:[%s7067_s6 + $0x30] ss:$8 sps:$4 sm:$0xff]  }
 0x162   :  { %v4251_v63 = vmul.f32 -1.442695, %v847_v60  ;;  %v535_v1 = vadd.f32 %v534_v62, %v5403_v54  ;;  %v536_v2 = vpop.f32.mrb[3].mxu0  ;;  %1027 = vmatprep.subr.bf16.mxu1 %v5474_v47 }
 0x163   :  { %v4252_v3 = vmul.f32 -1.442695, %v848_v61  ;;  %v537_v4 = vadd.f32 %v536_v2, %v5407_v55 }
 0x164   :  { %4628 = vpow2.f32 %v4251_v63  ;;  %v849_v5 = vadd.f32 %v842_v48, %v535_v1  ;;  %v5480_v48 = vld [vmem:[%s7067_s6] ss:$8 sps:$4 sm:$0xff]   ;;  %971 = vmatmul.mubr.bf16.vlgmr.msra.gmra.mrb[4].mxu1 %v7075_v0 }
 0x165   :  { %4630 = vpow2.f32 %v4252_v3  ;;  %v850_v6 = vadd.f32 %v844_v49, %v537_v4  ;;  %v5486_v49 = vld [vmem:[%s7067_s6 + $0x14] ss:$8 sps:$4 sm:$0xff]   ;;  %1028 = vmatpush1.bf16.msra.mxu1 %v5480_v48  ;;  %1059 = vmatprep.mubr.bf16.mxu1 %v7075_v0 }
 0x166   :  { %v4253_v7 = vmul.f32 -1.442695, %v849_v5  ;;  %1029 = vmatprep.subr.bf16.mxu1 %v5486_v49 }
 0x167   :  { %v4254_v8 = vmul.f32 -1.442695, %v850_v6 }
 0x168   :  { %4632 = vpow2.f32 %v4253_v7 }
 0x169   :  { %4634 = vpow2.f32 %v4254_v8  ;;  %1030 = vmatpush1.bf16.msra.mxu1 %v5493_v52  ;;  %v172_v8 = vld [vmem:[%s7062_s1 + $0x18] sm:$0xff] }
 0x16a   :  { %1031 = vmatprep.subr.bf16.mxu1 %v5500_v56 }
 0x16d   :  { %1032 = vmatpush1.bf16.msra.mxu1 %v5506_v57 }
 0x16e   :  { %v4629_v9 = vpop.eup %4628  ;;  %1033 = vmatprep.subr.bf16.mxu1 %v5512_v58 }
 0x16f   :  { %v4631_v10 = vpop.eup %4630  ;;  %v863_v14 = vadd.f32 1.0, %v4629_v9 }
 0x170   :  { %v864_v13 = vadd.f32 1.0, %v4631_v10 }
 0x171   :  { %1034 = vmatpush1.bf16.msra.mxu1 %v5518_v59 }
 0x172   :  { %v4633_v15 = vpop.eup %4632  ;;  %4636 = vrcp.f32 %v864_v13  ;;  %1136 = vmatprep.subr.bf16.mxu1 %v5289_v11  ;;  %v171_v11 = vld [vmem:[%s7062_s1 + $0x10] sm:$0xff] }
 0x173   :  { %v4635_v16 = vpop.eup %4634  ;;  %4638 = vrcp.f32 %v863_v14  ;;  %v865_v18 = vadd.f32 1.0, %v4633_v15 }
 0x174   :  { %v866_v17 = vadd.f32 1.0, %v4635_v16 }
 0x176   :  { %4640 = vrcp.f32 %v866_v17 }
 0x177   :  { %4642 = vrcp.f32 %v865_v18 }
 0x17c   :  { %v5413_v21 = vpop.eup %4636 }
 0x17d   :  { %v875_v22 = vmul.f32 2.0, %v5413_v21  ;;  %v4639_v23 = vpop.eup %4638 }
 0x17e   :  { %v879_v60 = vmul.f32 0.0, %v4639_v23 }
 0x17f   :  { %v4255_v24 = vadd.f32 -1.0, %v875_v22 }
 0x180   :  { %v4641_v25 = vpop.eup %4640 }
 0x181   :  { %v881_v28 = vmul.f32 %v4639_v23, %v4255_v24  ;;  %v876_v29 = vmul.f32 2.0, %v4641_v25  ;;  %v4643_v32 = vpop.eup %4642 }
 0x182   :  { %v880_v63 = vmul.f32 0.0, %v4643_v32 }
 0x183   :  { %885 = vrot.lane.b32.xlu0 %v881_v28, %s5188_s4  ;;  %v4256_v30 = vadd.f32 -1.0, %v876_v29 }
 0x185   :  { %v882_v33 = vmul.f32 %v4643_v32, %v4256_v30 }
 0x187   :  { %887 = vrot.lane.b32.xlu1 %v882_v33, %s5188_s4 }
 0x18b   :  { %80 = vperm.xlu1 %4591, %v51_v34  }
 0x18f   :  { %83 = vperm.xlu1 %4591, %v52_v36  }
 0x1f5   :  { %v886_v61 = vpop.permute.xlu0 %885 }
 0x1f6   :  { %v5523_v62 = vadd.f32 %v886_v61, %v879_v60 }
 0x1f8   :  { %4644 = vtanh.f32 %v5523_v62 }
 0x1f9   :  { %v888_v1 = vpop.permute.xlu1 %887 }
 0x1fa   :  { %v5526_v2 = vadd.f32 %v888_v1, %v880_v63 }
 0x1fc   :  { %4646 = vtanh.f32 %v5526_v2 }
 0x202   :  { %v4645_v3 = vpop.eup %4644 }
 0x203   :  { %v895_v5 = vmul.f32 %v4645_v3, %v5413_v21 }
 0x206   :  { %v4647_v4 = vpop.eup %4646 }
 0x207   :  { %v896_v6 = vmul.f32 %v4647_v4, %v4641_v25 }
 0x209   :  { %v897_v7 = vpack.c.bf16 %v896_v6, %v895_v5 }
 0x20a   :  { %v81_v10 = vpop.permute.xlu1 %80 }
 0x20b   :  { %982 = vrot.lane.b32.xlu0 %v897_v7, %s5188_s4  ;;  %vm147_vm7 = vcmp.eq.s32.totalorder %v81_v10, %v5374_v41 }
 0x20f   :  { %200 = vperm.xlu0 %4590, %v171_v11  }
 0x213   :  { %203 = vperm.xlu0 %4590, %v172_v8  }
 0x27d   :  { %v983_v9 = vpop.permute.xlu0 %982 }
 0x27e   :  { %4273 = vmatmul.mubr.msk.bf16.vlgmr.msra.gmra.mrb[4].mxu1 %vm389_vm4, %v983_v9 }
 0x27f   :  { %1137 = vmatpush1.bf16.msra.mxu1 %v5294_v12  ;;  %1168 = vmatprep.mubr.bf16.mxu1 %v7075_v0 }
 0x280   :  { %1138 = vmatprep.subr.bf16.mxu1 %v5312_v19  ;;  %v84_v19 = vpop.permute.xlu1 %83 }
 0x281   :  { %vm148_vm10 = vcmp.eq.s32.totalorder %v84_v19, %v5374_v41 }
 0x283   :  { %1139 = vmatpush1.bf16.msra.mxu1 %v5317_v20 }
 0x284   :  { %1140 = vmatprep.subr.bf16.mxu1 %v5336_v26 }
 0x287   :  { %1141 = vmatpush1.bf16.msra.mxu1 %v5348_v31 }
 0x288   :  { %1142 = vmatprep.subr.bf16.mxu1 %v5361_v35  ;;  %v743_v35 = vld [vmem:[%s7068_s8] sm:$0x3] }
 0x289   :  { %v5576_v13 = vrot.slane %v743_v35, %v385_v53 }
 0x28b   :  { %1143 = vmatpush1.bf16.msra.mxu1 %v5367_v37  ;;  %v5572_v37 = vrot.slane %v743_v35, %v381_v51 }
 0x28c   :  { %1237 = vmatprep.subr.bf16.mxu1 %v5427_v38 }
 0x28e   :  { %4280 = vmatmul.mubr.msk.bf16.vlgmr.msra.gmra.mrb[8].mxu1 %vm389_vm4, %v983_v9  ;;  %v201_v12 = vpop.permute.xlu0 %200 }
 0x28f   :  { %vm267_vm8 = vcmp.eq.s32.totalorder %v201_v12, %v5374_v41  ;;  %1238 = vmatpush1.bf16.msra.mxu1 %v5432_v39  ;;  %1269 = vmatprep.mubr.bf16.mxu1 %v7075_v0 }
 0x290   :  { %vm291_vm9 = vmor %vm147_vm7, %vm267_vm8  ;;  %1239 = vmatprep.subr.bf16.mxu1 %v5438_v40 }
 0x291   :  { %v4197_v20 = vsel %vm291_vm9, 1.0, %v5187_v27 }
 0x292   :  { %4221 = vmatmul.mubr.msk.f32.gmra.mrb[4].mxu0 %vm389_vm4, %v4197_v20  ;;  %v204_v26 = vpop.permute.xlu0 %203 }
 0x293   :  { %vm268_vm11 = vcmp.eq.s32.totalorder %v204_v26, %v5374_v41  ;;  %544 = vmatprep.mubr.f32.mxu0 %v5187_v27  ;;  %1240 = vmatpush1.bf16.msra.mxu1 %v5444_v42 }
 0x294   :  { %vm292_vm12 = vmor %vm148_vm10, %vm268_vm11  ;;  %1241 = vmatprep.subr.bf16.mxu1 %v5450_v43 }
 0x295   :  { %v4198_v31 = vsel %vm292_vm12, 1.0, %v5187_v27 }
 0x296   :  { %4222 = vmatmul.mubr.msk.f32.gmra.mrb[6].mxu0 %vm389_vm4, %v4198_v31 }
 0x297   :  { %550 = vmatprep.mubr.f32.mxu0 %v5187_v27  ;;  %1242 = vmatpush1.bf16.msra.mxu1 %v5456_v44 }
 0x298   :  { %1243 = vmatprep.subr.bf16.mxu1 %v5462_v45 }
 0x29b   :  { %1244 = vmatpush1.bf16.msra.mxu1 %v5468_v46 }
 0x29c   :  { %1286 = vmatprep.subr.bf16.mxu1 %v5474_v47 }
 0x351   :  { %v1061_v14 = vpop.f32.mrb[4].mxu1 }
 0x352   :  { %v1070_v15 = vadd.f32 %v1061_v14, %v5572_v37  ;;  %v1063_v16 = vpop.f32.mrb[5].mxu1 }
 0x353   :  { %v1071_v17 = vadd.f32 %v1063_v16, %v5576_v13  ;;  %v1065_v18 = vpop.f32.mrb[6].mxu1 }
 0x354   :  { %v4274_v21 = vmul.f32 -1.442695, %v1070_v15  ;;  %v1072_v22 = vadd.f32 %v1065_v18, %v5572_v37  ;;  %v1067_v23 = vpop.f32.mrb[7].mxu1 }
 0x355   :  { %v4275_v24 = vmul.f32 -1.442695, %v1071_v17  ;;  %v1073_v25 = vadd.f32 %v1067_v23, %v5576_v13 }
 0x356   :  { %4648 = vpow2.f32 %v4274_v21  ;;  %v4276_v51 = vmul.f32 -1.442695, %v1072_v22 }
 0x357   :  { %4650 = vpow2.f32 %v4275_v24  ;;  %v4277_v50 = vmul.f32 -1.442695, %v1073_v25 }
 0x358   :  { %4652 = vpow2.f32 %v4276_v51 }
 0x359   :  { %4654 = vpow2.f32 %v4277_v50 }
 0x360   :  { %v4649_v53 = vpop.eup %4648 }
 0x361   :  { %v4651_v28 = vpop.eup %4650  ;;  %v1170_v29 = vpop.f32.mrb[8].mxu1  ;;  %v1086_v60 = vadd.f32 1.0, %v4649_v53  ;;  %v53_v53 = vld [vmem:[%s7061_s0 + $0x20] sm:$0xff] }
 0x362   :  { %v4653_v30 = vpop.eup %4652  ;;  %v1087_v32 = vadd.f32 1.0, %v4651_v28  ;;  %v1172_v33 = vpop.f32.mrb[9].mxu1 }
 0x363   :  { %v4655_v34 = vpop.eup %4654  ;;  %v1174_v36 = vpop.f32.mrb[10].mxu1  ;;  %v1088_v3 = vadd.f32 1.0, %v4653_v30  ;;  %v173_v30 = vld [vmem:[%s7062_s1 + $0x20] sm:$0xff] }
 0x364   :  { %4656 = vrcp.f32 %v1087_v32  ;;  %v1089_v61 = vadd.f32 1.0, %v4655_v34  ;;  %v1176_v63 = vpop.f32.mrb[11].mxu1  ;;  %v54_v34 = vld [vmem:[%s7061_s0 + $0x28] sm:$0xff] }
 0x365   :  { %v540_v1 = vpop.f32.mrb[4].mxu0 }
 0x366   :  { %4658 = vrcp.f32 %v1089_v61  ;;  %v541_v4 = vadd.f32 %v540_v1, %v5403_v54  ;;  %v542_v5 = vpop.f32.mrb[5].mxu0  ;;  %v174_v61 = vld [vmem:[%s7062_s1 + $0x28] sm:$0xff] }
 0x367   :  { %v543_v6 = vadd.f32 %v542_v5, %v5407_v55  ;;  %4660 = vrcp.f32 %v1086_v60 }
 0x368   :  { %v1179_v7 = vadd.f32 %v1170_v29, %v541_v4  ;;  %4662 = vrcp.f32 %v1088_v3 }
 0x369   :  { %v1180_v11 = vadd.f32 %v1172_v33, %v543_v6  ;;  %v546_v8 = vpop.f32.mrb[6].mxu0 }
 0x36a   :  { %v4281_v9 = vmul.f32 -1.442695, %v1179_v7  ;;  %v547_v10 = vadd.f32 %v546_v8, %v5403_v54  ;;  %v548_v12 = vpop.f32.mrb[7].mxu0 }
 0x36b   :  { %v4282_v19 = vmul.f32 -1.442695, %v1180_v11  ;;  %v549_v20 = vadd.f32 %v548_v12, %v5407_v55 }
 0x36c   :  { %4664 = vpow2.f32 %v4281_v9  ;;  %v1181_v26 = vadd.f32 %v1174_v36, %v547_v10  ;;  %v55_v10 = vld [vmem:[%s7061_s0 + $0x30] sm:$0xff] }
 0x36d   :  { %4666 = vpow2.f32 %v4282_v19  ;;  %v1182_v31 = vadd.f32 %v1176_v63, %v549_v20  ;;  %v56_v19 = vld [vmem:[%s7061_s0 + $0x38] sm:$0xff]  ;;  %v175_v20 = vld [vmem:[%s7062_s1 + $0x30] sm:$0xff] }
 0x36e   :  { %v5586_v35 = vpop.eup %4656  ;;  %v4283_v14 = vmul.f32 -1.442695, %v1181_v26  ;;  %v57_v26 = vld [vmem:[%s7061_s0 + $0x40] sm:$0xff] }
 0x36f   :  { %v4284_v15 = vmul.f32 -1.442695, %v1182_v31  ;;  %v1098_v16 = vmul.f32 2.0, %v5586_v35  ;;  %v176_v31 = vld [vmem:[%s7062_s1 + $0x38] sm:$0xff] }
 0x370   :  { %v5589_v17 = vpop.eup %4658  ;;  %4668 = vpow2.f32 %v4283_v14  ;;  %v58_v14 = vld [vmem:[%s7061_s0 + $0x48] sm:$0xff] }
 0x371   :  { %4670 = vpow2.f32 %v4284_v15  ;;  %v4278_v18 = vadd.f32 -1.0, %v1098_v16  ;;  %v1099_v21 = vmul.f32 2.0, %v5589_v17  ;;  %v5592_v22 = vpop.eup %4660  ;;  %v177_v15 = vld [vmem:[%s7062_s1 + $0x40] sm:$0xff]  ;;  %v59_v16 = vld [vmem:[%s7061_s0 + $0x50] sm:$0xff] }
 0x372   :  { %v5595_v25 = vpop.eup %4662 }
 0x373   :  { %v1104_v23 = vmul.f32 %v5592_v22, %v4278_v18  ;;  %v4279_v24 = vadd.f32 -1.0, %v1099_v21  ;;  %v178_v18 = vld [vmem:[%s7062_s1 + $0x48] sm:$0xff]  ;;  %v60_v21 = vld [vmem:[%s7061_s0 + $0x58] sm:$0xff] }
 0x375   :  { %1108 = vrot.lane.b32.xlu1 %v1104_v23, %s5188_s4  ;;  %v1105_v51 = vmul.f32 %v5595_v25, %v4279_v24  ;;  %v179_v23 = vld [vmem:[%s7062_s1 + $0x50] sm:$0xff]  ;;  %v61_v24 = vld [vmem:[%s7061_s0 + $0x60] sm:$0xff] }
 0x376   :  { %v4665_v50 = vpop.eup %4664 }
 0x377   :  { %v4667_v28 = vpop.eup %4666  ;;  %1110 = vrot.lane.b32.xlu0 %v1105_v51, %s5188_s4  ;;  %v1195_v32 = vadd.f32 1.0, %v4665_v50  ;;  %v180_v51 = vld [vmem:[%s7062_s1 + $0x58] sm:$0xff]  ;;  %v62_v50 = vld [vmem:[%s7061_s0 + $0x68] sm:$0xff] }
 0x378   :  { %v1196_v29 = vadd.f32 1.0, %v4667_v28  ;;  %v63_v28 = vld [vmem:[%s7061_s0 + $0x70] sm:$0xff] }
 0x379   :  { %86 = vperm.xlu1 %4591, %v53_v53   ;;  %v181_v53 = vld [vmem:[%s7062_s1 + $0x60] sm:$0xff] }
 0x37a   :  { %v4669_v33 = vpop.eup %4668  ;;  %4672 = vrcp.f32 %v1196_v29  ;;  %v182_v29 = vld [vmem:[%s7062_s1 + $0x68] sm:$0xff] }
 0x37b   :  { %v4671_v36 = vpop.eup %4670  ;;  %206 = vperm.xlu0 %4590, %v173_v30   ;;  %4674 = vrcp.f32 %v1195_v32  ;;  %v1197_v63 = vadd.f32 1.0, %v4669_v33  ;;  %v64_v30 = vld [vmem:[%s7061_s0 + $0x78] sm:$0xff]  ;;  %v183_v32 = vld [vmem:[%s7062_s1 + $0x70] sm:$0xff]  ;;  %v65_v33 = vld [vmem:[%s7061_s0 + $0x80] sm:$0xff] }
 0x37c   :  { %v1198_v60 = vadd.f32 1.0, %v4671_v36  ;;  %v66_v36 = vld [vmem:[%s7061_s0 + $0x88] sm:$0xff] }
 0x37d   :  { %89 = vperm.xlu1 %4591, %v54_v34   ;;  %v184_v34 = vld [vmem:[%s7062_s1 + $0x78] sm:$0xff] }
 0x37e   :  { %4676 = vrcp.f32 %v1198_v60  ;;  %v185_v60 = vld [vmem:[%s7062_s1 + $0x80] sm:$0xff] }
 0x37f   :  { %209 = vperm.xlu0 %4590, %v174_v61   ;;  %4678 = vrcp.f32 %v1197_v63  ;;  %v67_v61 = vld [vmem:[%s7061_s0 + $0x90] sm:$0xff]  ;;  %v186_v63 = vld [vmem:[%s7062_s1 + $0x88] sm:$0xff] }
 0x384   :  { %v5612_v1 = vpop.eup %4672 }
 0x385   :  { %v1207_v3 = vmul.f32 2.0, %v5612_v1  ;;  %v5615_v4 = vpop.eup %4674 }
 0x387   :  { %v4285_v5 = vadd.f32 -1.0, %v1207_v3  ;;  %v68_v3 = vld [vmem:[%s7061_s0 + $0x98] sm:$0xff] }
 0x388   :  { %v5617_v6 = vpop.eup %4676 }
 0x389   :  { %v1213_v7 = vmul.f32 %v5615_v4, %v4285_v5  ;;  %v1208_v11 = vmul.f32 2.0, %v5617_v6  ;;  %v5622_v9 = vpop.eup %4678  ;;  %v187_v5 = vld [vmem:[%s7062_s1 + $0x90] sm:$0xff] }
 0x38b   :  { %1217 = vrot.lane.b32.xlu1 %v1213_v7, %s5188_s4  ;;  %v4286_v8 = vadd.f32 -1.0, %v1208_v11  ;;  %v188_v7 = vld [vmem:[%s7062_s1 + $0x98] sm:$0xff]  ;;  %v69_v11 = vld [vmem:[%s7061_s0 + $0xa0] sm:$0xff] }
 0x38d   :  { %v1214_v12 = vmul.f32 %v5622_v9, %v4286_v8  ;;  %v70_v8 = vld [vmem:[%s7061_s0 + $0xa8] sm:$0xff] }
 0x38f   :  { %92 = vperm.xlu1 %4591, %v55_v10   ;;  %1219 = vrot.lane.b32.xlu0 %v1214_v12, %s5188_s4  ;;  %v71_v10 = vld [vmem:[%s7061_s0 + $0xb0] sm:$0xff]  ;;  %v1102_v12 = vmul.f32 0.0, %v5592_v22 }
 0x393   :  { %95 = vperm.xlu1 %4591, %v56_v19   ;;  %212 = vperm.xlu0 %4590, %v175_v20  }
 0x397   :  { %98 = vperm.xlu1 %4591, %v57_v26   ;;  %215 = vperm.xlu0 %4590, %v176_v31   ;;  %v1103_v26 = vmul.f32 0.0, %v5595_v25 }
 0x39b   :  { %101 = vperm.xlu1 %4591, %v58_v14   ;;  %218 = vperm.xlu0 %4590, %v177_v15  }
 0x39f   :  { %104 = vperm.xlu1 %4591, %v59_v16   ;;  %221 = vperm.xlu0 %4590, %v178_v18  }
 0x3a3   :  { %107 = vperm.xlu1 %4591, %v60_v21   ;;  %224 = vperm.xlu0 %4590, %v179_v23  }
 0x3a7   :  { %110 = vperm.xlu1 %4591, %v61_v24   ;;  %227 = vperm.xlu0 %4590, %v180_v51  }
 0x3ab   :  { %113 = vperm.xlu1 %4591, %v62_v50   ;;  %230 = vperm.xlu0 %4590, %v181_v53   ;;  %v1211_v50 = vmul.f32 %v5615_v4, %v5523_v62  ;;  %v191_v4 = vld [vmem:[%s7062_s1 + $0xb0] sm:$0xff] }
 0x3af   :  { %116 = vperm.xlu1 %4591, %v63_v28   ;;  %233 = vperm.xlu0 %4590, %v182_v29   ;;  %v190_v28 = vld [vmem:[%s7062_s1 + $0xa8] sm:$0xff] }
 0x3b3   :  { %119 = vperm.xlu1 %4591, %v64_v30   ;;  %236 = vperm.xlu0 %4590, %v183_v32   ;;  %v1212_v32 = vmul.f32 %v5622_v9, %v5526_v2  ;;  %v72_v2 = vld [vmem:[%s7061_s0 + $0xb8] sm:$0xff] }
 0x3b7   :  { %122 = vperm.xlu1 %4591, %v65_v33   ;;  %239 = vperm.xlu0 %4590, %v184_v34  }
 0x3bb   :  { %125 = vperm.xlu1 %4591, %v66_v36   ;;  %242 = vperm.xlu0 %4590, %v185_v60  }
 0x3bf   :  { %128 = vperm.xlu1 %4591, %v67_v61   ;;  %245 = vperm.xlu0 %4590, %v186_v63  }
 0x3c3   :  { %131 = vperm.xlu1 %4591, %v68_v3   ;;  %248 = vperm.xlu0 %4590, %v187_v5  }
 0x3c7   :  { %251 = vperm.xlu0 %4590, %v188_v7  }
 0x3cb   :  { %134 = vperm.xlu0 %4590, %v69_v11   ;;  %v192_v11 = vld [vmem:[%s7062_s1 + $0xb8] sm:$0xff] }
 0x3cf   :  { %137 = vperm.xlu0 %4590, %v70_v8  }
 0x3d3   :  { %140 = vperm.xlu0 %4590, %v71_v10  }
 0x3e7   :  { %v1109_v19 = vpop.permute.xlu1 %1108 }
 0x3e8   :  { %v5720_v20 = vadd.f32 %v1109_v19, %v1102_v12 }
 0x3e9   :  { %v1111_v31 = vpop.permute.xlu0 %1110 }
 0x3ea   :  { %4680 = vtanh.f32 %v5720_v20  ;;  %v5724_v14 = vadd.f32 %v1111_v31, %v1103_v26 }
 0x3ec   :  { %4682 = vtanh.f32 %v5724_v14 }
 0x3f4   :  { %v4681_v15 = vpop.eup %4680 }
 0x3f5   :  { %v5728_v18 = vmul.f32 %v4681_v15, %v5586_v35  ;;  %v189_v35 = vld [vmem:[%s7062_s1 + $0xa0] sm:$0xff] }
 0x3f6   :  { %v4683_v16 = vpop.eup %4682 }
 0x3f7   :  { %7081 = vst [vmem:[#allocation4_spill] sm:$0xff] %v5728_v18  ;;  %v5731_v21 = vmul.f32 %v4683_v16, %v5589_v17 }
 0x3f8   :  { %v87_v22 = vpop.permute.xlu1 %86 }
 0x3f9   :  { %7082 = vst [vmem:[#allocation5_spill] sm:$0xff] %v5731_v21  ;;  %v1230_v23 = vpack.c.bf16 %v5731_v21, %v5728_v18  ;;  %vm149_vm13 = vcmp.eq.s32.totalorder %v87_v22, %v5374_v41 }
 0x3fa   :  { %v207_v25 = vpop.permute.xlu0 %206 }
 0x3fb   :  { %vm269_vm14 = vcmp.eq.s32.totalorder %v207_v25, %v5374_v41  ;;  %1232 = vrot.lane.b32.xlu1 %v1230_v23, %s5188_s4 }
 0x3fc   :  { %vm293_vm15 = vmor %vm149_vm13, %vm269_vm14  ;;  %v90_v24 = vpop.permute.xlu1 %89 }
 0x3fd   :  { %v4199_v17 = vsel %vm293_vm15, 1.0, %v5187_v27  ;;  %vm150_vm0 = vcmp.eq.s32.totalorder %v90_v24, %v5374_v41 }
 0x3fe   :  { %4223 = vmatmul.mubr.msk.f32.gmra.mrb[8].mxu0 %vm389_vm4, %v4199_v17  ;;  %v210_v51 = vpop.permute.xlu0 %209 }
 0x3ff   :  { %vm270_vm1 = vcmp.eq.s32.totalorder %v210_v51, %v5374_v41  ;;  %254 = vperm.xlu1 %4591, %v189_v35   ;;  %556 = vmatprep.mubr.f32.mxu0 %v5187_v27 }
 0x400   :  { %vm294_vm2 = vmor %vm150_vm0, %vm270_vm1  ;;  %v1218_v53 = vpop.permute.xlu1 %1217 }
 0x401   :  { %v5751_v29 = vadd.f32 %v1218_v53, %v1211_v50  ;;  %v4200_v30 = vsel %vm294_vm2, 1.0, %v5187_v27 }
 0x402   :  { %4224 = vmatmul.mubr.msk.f32.gmra.mrb[10].mxu0 %vm389_vm4, %v4200_v30  ;;  %v1220_v33 = vpop.permute.xlu0 %1219 }
 0x403   :  { %4684 = vtanh.f32 %v5751_v29  ;;  %v5758_v62 = vadd.f32 %v1220_v33, %v1212_v32  ;;  %257 = vperm.xlu1 %4591, %v190_v28   ;;  %562 = vmatprep.mubr.f32.mxu0 %v5187_v27 }
 0x405   :  { %4686 = vtanh.f32 %v5758_v62 }
 0x407   :  { %260 = vperm.xlu1 %4591, %v191_v4  }
 0x40b   :  { %143 = vperm.xlu1 %4591, %v72_v2  }
 0x40d   :  { %v4685_v9 = vpop.eup %4684 }
 0x40e   :  { %v93_v34 = vpop.permute.xlu1 %92  ;;  %v1227_v60 = vmul.f32 %v4685_v9, %v5612_v1 }
 0x40f   :  { %v4687_v36 = vpop.eup %4686  ;;  %vm151_vm3 = vcmp.eq.s32.totalorder %v93_v34, %v5374_v41 }
 0x410   :  { %v1228_v61 = vmul.f32 %v4687_v36, %v5617_v6 }
 0x412   :  { %v96_v63 = vpop.permute.xlu1 %95  ;;  %v213_v3 = vpop.permute.xlu0 %212  ;;  %v1229_v5 = vpack.c.bf16 %v1228_v61, %v1227_v60 }
 0x413   :  { %vm271_vm5 = vcmp.eq.s32.totalorder %v213_v3, %v5374_v41  ;;  %vm152_vm7 = vcmp.eq.s32.totalorder %v96_v63, %v5374_v41 }
 0x414   :  { %vm295_vm6 = vmor %vm151_vm3, %vm271_vm5  ;;  %1281 = vrot.lane.b32.xlu0 %v1229_v5, %s5188_s4 }
 0x415   :  { %v4201_v7 = vsel %vm295_vm6, 1.0, %v5187_v27 }
 0x416   :  { %v99_v8 = vpop.permute.xlu1 %98  ;;  %4225 = vmatmul.mubr.msk.f32.gmra.mrb[12].mxu0 %vm389_vm4, %v4201_v7  ;;  %v216_v1 = vpop.permute.xlu0 %215 }
 0x417   :  { %vm272_vm8 = vcmp.eq.s32.totalorder %v216_v1, %v5374_v41  ;;  %568 = vmatprep.mubr.f32.mxu0 %v5187_v27  ;;  %vm153_vm10 = vcmp.eq.s32.totalorder %v99_v8, %v5374_v41 }
 0x418   :  { %vm296_vm9 = vmor %vm152_vm7, %vm272_vm8  ;;  %263 = vperm.xlu0 %4590, %v192_v11  }
 0x419   :  { %v4202_v6 = vsel %vm296_vm9, 1.0, %v5187_v27 }
 0x41a   :  { %v102_v10 = vpop.permute.xlu1 %101  ;;  %4226 = vmatmul.mubr.msk.f32.gmra.mrb[14].mxu0 %vm389_vm4, %v4202_v6  ;;  %v219_v12 = vpop.permute.xlu0 %218 }
 0x41b   :  { %vm273_vm11 = vcmp.eq.s32.totalorder %v219_v12, %v5374_v41  ;;  %574 = vmatprep.mubr.f32.mxu0 %v5187_v27  ;;  %vm154_vm13 = vcmp.eq.s32.totalorder %v102_v10, %v5374_v41 }
 0x41c   :  { %vm297_vm12 = vmor %vm153_vm10, %vm273_vm11 }
 0x41d   :  { %v4203_v19 = vsel %vm297_vm12, 1.0, %v5187_v27 }
 0x41e   :  { %v105_v26 = vpop.permute.xlu1 %104  ;;  %4227 = vmatmul.mubr.msk.f32.gmra.mrb[16].mxu0 %vm389_vm4, %v4203_v19  ;;  %v222_v31 = vpop.permute.xlu0 %221 }
 0x41f   :  { %vm274_vm14 = vcmp.eq.s32.totalorder %v222_v31, %v5374_v41  ;;  %580 = vmatprep.mubr.f32.mxu0 %v5187_v27  ;;  %vm155_vm0 = vcmp.eq.s32.totalorder %v105_v26, %v5374_v41 }
 0x420   :  { %vm298_vm15 = vmor %vm154_vm13, %vm274_vm14 }
 0x421   :  { %v4204_v15 = vsel %vm298_vm15, 1.0, %v5187_v27 }
 0x422   :  { %v108_v16 = vpop.permute.xlu1 %107  ;;  %4228 = vmatmul.mubr.msk.f32.gmra.mrb[18].mxu0 %vm389_vm4, %v4204_v15  ;;  %v225_v22 = vpop.permute.xlu0 %224 }
 0x423   :  { %vm275_vm1 = vcmp.eq.s32.totalorder %v225_v22, %v5374_v41  ;;  %586 = vmatprep.mubr.f32.mxu0 %v5187_v27  ;;  %vm156_vm3 = vcmp.eq.s32.totalorder %v108_v16, %v5374_v41 }
 0x424   :  { %vm299_vm2 = vmor %vm155_vm0, %vm275_vm1 }
 0x425   :  { %v4205_v23 = vsel %vm299_vm2, 1.0, %v5187_v27 }
 0x426   :  { %v111_v25 = vpop.permute.xlu1 %110  ;;  %4229 = vmatmul.mubr.msk.f32.gmra.mrb[20].mxu0 %vm389_vm4, %v4205_v23  ;;  %v228_v24 = vpop.permute.xlu0 %227 }
 0x427   :  { %vm276_vm5 = vcmp.eq.s32.totalorder %v228_v24, %v5374_v41  ;;  %592 = vmatprep.mubr.f32.mxu0 %v5187_v27  ;;  %vm157_vm7 = vcmp.eq.s32.totalorder %v111_v25, %v5374_v41 }
 0x428   :  { %vm300_vm6 = vmor %vm156_vm3, %vm276_vm5 }
 0x429   :  { %v4206_v35 = vsel %vm300_vm6, 1.0, %v5187_v27 }
 0x42a   :  { %v114_v17 = vpop.permute.xlu1 %113  ;;  %4230 = vmatmul.mubr.msk.f32.gmra.mrb[22].mxu0 %vm389_vm4, %v4206_v35  ;;  %v231_v51 = vpop.permute.xlu0 %230 }
 0x42b   :  { %vm277_vm8 = vcmp.eq.s32.totalorder %v231_v51, %v5374_v41  ;;  %598 = vmatprep.mubr.f32.mxu0 %v5187_v27  ;;  %vm158_vm10 = vcmp.eq.s32.totalorder %v114_v17, %v5374_v41 }
 0x42c   :  { %vm301_vm9 = vmor %vm157_vm7, %vm277_vm8 }
 0x42d   :  { %v4207_v50 = vsel %vm301_vm9, 1.0, %v5187_v27 }
 0x42e   :  { %v117_v53 = vpop.permute.xlu1 %116  ;;  %4231 = vmatmul.mubr.msk.f32.gmra.mrb[24].mxu0 %vm389_vm4, %v4207_v50  ;;  %v234_v28 = vpop.permute.xlu0 %233 }
 0x42f   :  { %vm278_vm11 = vcmp.eq.s32.totalorder %v234_v28, %v5374_v41  ;;  %604 = vmatprep.mubr.f32.mxu0 %v5187_v27  ;;  %vm159_vm13 = vcmp.eq.s32.totalorder %v117_v53, %v5374_v41 }
 0x430   :  { %vm302_vm12 = vmor %vm158_vm10, %vm278_vm11 }
 0x431   :  { %v4208_v30 = vsel %vm302_vm12, 1.0, %v5187_v27 }
 0x432   :  { %v120_v32 = vpop.permute.xlu1 %119  ;;  %4232 = vmatmul.mubr.msk.f32.gmra.mrb[26].mxu0 %vm389_vm4, %v4208_v30  ;;  %v237_v33 = vpop.permute.xlu0 %236 }
 0x433   :  { %vm279_vm14 = vcmp.eq.s32.totalorder %v237_v33, %v5374_v41  ;;  %610 = vmatprep.mubr.f32.mxu0 %v5187_v27  ;;  %vm160_vm0 = vcmp.eq.s32.totalorder %v120_v32, %v5374_v41 }
 0x434   :  { %vm303_vm15 = vmor %vm159_vm13, %vm279_vm14 }
 0x435   :  { %v4209_v4 = vsel %vm303_vm15, 1.0, %v5187_v27 }
 0x436   :  { %v123_v2 = vpop.permute.xlu1 %122  ;;  %4233 = vmatmul.mubr.msk.f32.gmra.mrb[28].mxu0 %vm389_vm4, %v4209_v4  ;;  %v240_v9 = vpop.permute.xlu0 %239 }
 0x437   :  { %vm280_vm1 = vcmp.eq.s32.totalorder %v240_v9, %v5374_v41  ;;  %616 = vmatprep.mubr.f32.mxu0 %v5187_v27  ;;  %vm161_vm3 = vcmp.eq.s32.totalorder %v123_v2, %v5374_v41 }
 0x438   :  { %vm304_vm2 = vmor %vm160_vm0, %vm280_vm1 }
 0x439   :  { %v4210_v34 = vsel %vm304_vm2, 1.0, %v5187_v27 }
 0x43a   :  { %v126_v36 = vpop.permute.xlu1 %125  ;;  %4234 = vmatmul.mubr.msk.f32.gmra.mrb[30].mxu0 %vm389_vm4, %v4210_v34  ;;  %v243_v60 = vpop.permute.xlu0 %242 }
 0x43b   :  { %vm281_vm5 = vcmp.eq.s32.totalorder %v243_v60, %v5374_v41  ;;  %622 = vmatprep.mubr.f32.mxu0 %v5187_v27  ;;  %vm162_vm7 = vcmp.eq.s32.totalorder %v126_v36, %v5374_v41 }
 0x43c   :  { %vm305_vm6 = vmor %vm161_vm3, %vm281_vm5 }
 0x43d   :  { %v4211_v61 = vsel %vm305_vm6, 1.0, %v5187_v27 }
 0x43e   :  { %v129_v63 = vpop.permute.xlu1 %128  ;;  %4235 = vmatmul.mubr.msk.f32.gmra.mrb[32].mxu0 %vm389_vm4, %v4211_v61  ;;  %v246_v3 = vpop.permute.xlu0 %245 }
 0x43f   :  { %vm282_vm8 = vcmp.eq.s32.totalorder %v246_v3, %v5374_v41  ;;  %628 = vmatprep.mubr.f32.mxu0 %v5187_v27  ;;  %vm163_vm10 = vcmp.eq.s32.totalorder %v129_v63, %v5374_v41 }
 0x440   :  { %vm306_vm9 = vmor %vm162_vm7, %vm282_vm8 }
 0x441   :  { %v4212_v5 = vsel %vm306_vm9, 1.0, %v5187_v27 }
 0x442   :  { %4236 = vmatmul.mubr.msk.f32.gmra.mrb[34].mxu0 %vm389_vm4, %v4212_v5  ;;  %v249_v7 = vpop.permute.xlu0 %248  ;;  %v132_v11 = vpop.permute.xlu1 %131 }
 0x443   :  { %vm283_vm11 = vcmp.eq.s32.totalorder %v249_v7, %v5374_v41  ;;  %634 = vmatprep.mubr.f32.mxu0 %v5187_v27  ;;  %vm164_vm13 = vcmp.eq.s32.totalorder %v132_v11, %v5374_v41 }
 0x444   :  { %vm307_vm12 = vmor %vm163_vm10, %vm283_vm11 }
 0x445   :  { %v4213_v8 = vsel %vm307_vm12, 1.0, %v5187_v27 }
 0x446   :  { %4237 = vmatmul.mubr.msk.f32.gmra.mrb[36].mxu0 %vm389_vm4, %v4213_v8  ;;  %v252_v1 = vpop.permute.xlu0 %251 }
 0x447   :  { %vm284_vm14 = vcmp.eq.s32.totalorder %v252_v1, %v5374_v41  ;;  %640 = vmatprep.mubr.f32.mxu0 %v5187_v27 }
 0x448   :  { %vm308_vm15 = vmor %vm164_vm13, %vm284_vm14 }
 0x449   :  { %v4214_v6 = vsel %vm308_vm15, 1.0, %v5187_v27 }
 0x44a   :  { %4238 = vmatmul.mubr.msk.f32.gmra.mrb[38].mxu0 %vm389_vm4, %v4214_v6  ;;  %v135_v12 = vpop.permute.xlu0 %134 }
 0x44b   :  { %646 = vmatprep.mubr.f32.mxu0 %v5187_v27  ;;  %vm165_vm0 = vcmp.eq.s32.totalorder %v135_v12, %v5374_v41 }
 0x44e   :  { %v138_v19 = vpop.permute.xlu0 %137 }
 0x44f   :  { %vm166_vm3 = vcmp.eq.s32.totalorder %v138_v19, %v5374_v41 }
 0x46d   :  { %v1233_v10 = vpop.permute.xlu1 %1232 }
 0x46e   :  { %4287 = vmatmul.mubr.msk.bf16.vlgmr.msra.gmra.mrb[12].mxu1 %vm389_vm4, %v1233_v10 }
 0x46f   :  { %1287 = vmatpush1.bf16.msra.mxu1 %v5480_v48  ;;  %1318 = vmatprep.mubr.bf16.mxu1 %v7075_v0 }
 0x470   :  { %1288 = vmatprep.subr.bf16.mxu1 %v5486_v49  ;;  %v141_v49 = vpop.permute.xlu0 %140 }
 0x471   :  { %vm167_vm7 = vcmp.eq.s32.totalorder %v141_v49, %v5374_v41 }
 0x473   :  { %1289 = vmatpush1.bf16.msra.mxu1 %v5493_v52 }
 0x474   :  { %1290 = vmatprep.subr.bf16.mxu1 %v5500_v56 }
 0x477   :  { %1291 = vmatpush1.bf16.msra.mxu1 %v5506_v57 }
 0x478   :  { %1292 = vmatprep.subr.bf16.mxu1 %v5512_v58 }
 0x47b   :  { %1293 = vmatpush1.bf16.msra.mxu1 %v5518_v59 }
 0x47c   :  { %1496 = vmatprep.subr.bf16.mxu1 %v5427_v38 }
 0x47e   :  { %v255_v26 = vpop.permute.xlu1 %254 }
 0x47f   :  { %vm285_vm1 = vcmp.eq.s32.totalorder %v255_v26, %v5374_v41 }
 0x480   :  { %vm309_vm2 = vmor %vm165_vm0, %vm285_vm1 }
 0x481   :  { %v4215_v48 = vsel %vm309_vm2, 1.0, %v5187_v27 }
 0x482   :  { %v258_v52 = vpop.permute.xlu1 %257  ;;  %4239 = vmatmul.mubr.msk.f32.gmra.mrb[40].mxu0 %vm389_vm4, %v4215_v48 }
 0x483   :  { %vm286_vm5 = vcmp.eq.s32.totalorder %v258_v52, %v5374_v41  ;;  %652 = vmatprep.mubr.f32.mxu0 %v5187_v27 }
 0x484   :  { %vm310_vm6 = vmor %vm166_vm3, %vm286_vm5 }
 0x485   :  { %v4216_v56 = vsel %vm310_vm6, 1.0, %v5187_v27 }
 0x486   :  { %v261_v57 = vpop.permute.xlu1 %260  ;;  %4240 = vmatmul.mubr.msk.f32.gmra.mrb[42].mxu0 %vm389_vm4, %v4216_v56  ;;  %v1282_v58 = vpop.permute.xlu0 %1281 }
 0x487   :  { %vm287_vm8 = vcmp.eq.s32.totalorder %v261_v57, %v5374_v41  ;;  %4288 = vmatmul.mubr.msk.bf16.vlgmr.msra.gmra.mrb[12].mxu1 %vm389_vm4, %v1282_v58  ;;  %658 = vmatprep.mubr.f32.mxu0 %v5187_v27 }
 0x488   :  { %vm311_vm9 = vmor %vm167_vm7, %vm287_vm8  ;;  %1497 = vmatpush1.bf16.msra.mxu1 %v5432_v39  ;;  %1528 = vmatprep.mubr.bf16.mxu1 %v7075_v0 }
 0x489   :  { %v4217_v59 = vsel %vm311_vm9, 1.0, %v5187_v27  ;;  %1498 = vmatprep.subr.bf16.mxu1 %v5438_v40 }
 0x48a   :  { %4241 = vmatmul.mubr.msk.f32.gmra.mrb[44].mxu0 %vm389_vm4, %v4217_v59  ;;  %v144_v39 = vpop.permute.xlu1 %143 }
 0x48b   :  { %664 = vmatprep.mubr.f32.mxu0 %v5187_v27  ;;  %vm168_vm10 = vcmp.eq.s32.totalorder %v144_v39, %v5374_v41 }
 0x48c   :  { %1499 = vmatpush1.bf16.msra.mxu1 %v5444_v42  ;;  %v5888_v42 = vld [vmem:[%s7064_s5] ss:$8 sps:$4 sm:$0xff]  }
 0x48d   :  { %1500 = vmatprep.subr.bf16.mxu1 %v5450_v43  ;;  %v5907_v43 = vld [vmem:[%s7064_s5 + $0x24] ss:$8 sps:$4 sm:$0xff]  }
 0x490   :  { %1501 = vmatpush1.bf16.msra.mxu1 %v5456_v44  ;;  %v5913_v44 = vld [vmem:[%s7064_s5 + $0x20] ss:$8 sps:$4 sm:$0xff]  }
 0x491   :  { %1502 = vmatprep.subr.bf16.mxu1 %v5462_v45  ;;  %v5919_v45 = vld [vmem:[%s7064_s5 + $0x34] ss:$8 sps:$4 sm:$0xff]  }
 0x494   :  { %1503 = vmatpush1.bf16.msra.mxu1 %v5468_v46  ;;  %v5925_v46 = vld [vmem:[%s7064_s5 + $0x30] ss:$8 sps:$4 sm:$0xff]  }
 0x495   :  { %1545 = vmatprep.subr.bf16.mxu1 %v5474_v47 }
 0x497   :  { %v264_v31 = vpop.permute.xlu0 %263 }
 0x498   :  { %vm288_vm11 = vcmp.eq.s32.totalorder %v264_v31, %v5374_v41  ;;  %v5895_v41 = vld [vmem:[%s7064_s5 + $0x14] ss:$8 sps:$4 sm:$0xff]  }
 0x499   :  { %vm312_vm12 = vmor %vm168_vm10, %vm288_vm11 }
 0x49a   :  { %v4218_v40 = vsel %vm312_vm12, 1.0, %v5187_v27  ;;  %v5901_v27 = vld [vmem:[%s7064_s5 + $0x10] ss:$8 sps:$4 sm:$0xff]  }
 0x49b   :  { %4242 = vmatmul.mubr.msk.f32.gmra.mrb[46].mxu0 %vm389_vm4, %v4218_v40 }
 0x49c   :  { %1427 = vmatprep.mubr.bf16.mxu0 %v7075_v0 }
 0x49f   :  { %4295 = vmatmul.mubr.msk.bf16.vlgmr.msra.gmra.mrb[48].mxu0 %vm389_vm4, %v1282_v58 }
 0x4a0   :  { %1655 = vmatpush1.bf16.msra.mxu0 %v5888_v42  ;;  %1686 = vmatprep.mubr.bf16.mxu0 %v7075_v0 }
 0x4a1   :  { %1656 = vmatprep.subr.bf16.mxu0 %v5895_v41 }
 0x4a4   :  { %1657 = vmatpush1.bf16.msra.mxu0 %v5901_v27 }
 0x4a5   :  { %1658 = vmatprep.subr.bf16.mxu0 %v5907_v43 }
 0x4a8   :  { %1659 = vmatpush1.bf16.msra.mxu0 %v5913_v44 }
 0x4a9   :  { %1660 = vmatprep.subr.bf16.mxu0 %v5919_v45 }
 0x4ac   :  { %1661 = vmatpush1.bf16.msra.mxu0 %v5925_v46 }
 0x4ad   :  { %1755 = vmatprep.subr.bf16.mxu0 %v5427_v38 }
 0x4d1   :  { %v5929_v47 = vpop.f32.mrb[8].mxu0 }
 0x4d2   :  { %v5931_v15 = vpop.f32.mrb[9].mxu0 }
 0x4d5   :  { %v5933_v16 = vpop.f32.mrb[10].mxu0 }
 0x4d6   :  { %v5935_v22 = vpop.f32.mrb[11].mxu0 }
 0x4e9   :  { %v5937_v23 = vpop.f32.mrb[12].mxu0 }
 0x4ea   :  { %v5939_v25 = vpop.f32.mrb[13].mxu0 }
 0x4ed   :  { %v5941_v24 = vpop.f32.mrb[14].mxu0 }
 0x4ee   :  { %v5943_v35 = vpop.f32.mrb[15].mxu0 }
 0x4f1   :  { %v5945_v17 = vpop.f32.mrb[16].mxu0 }
 0x4f2   :  { %v5947_v51 = vpop.f32.mrb[17].mxu0 }
 0x4f5   :  { %v5949_v38 = vpop.f32.mrb[18].mxu0 }
 0x4f6   :  { %v5951_v50 = vpop.f32.mrb[19].mxu0 }
 0x4f9   :  { %v5953_v53 = vpop.f32.mrb[20].mxu0 }
 0x4fa   :  { %v5955_v28 = vpop.f32.mrb[21].mxu0 }
 0x4fd   :  { %v5957_v30 = vpop.f32.mrb[22].mxu0 }
 0x4fe   :  { %v5959_v32 = vpop.f32.mrb[23].mxu0 }
 0x501   :  { %v5961_v33 = vpop.f32.mrb[24].mxu0 }
 0x502   :  { %7083 = vst [vmem:[#allocation6_spill] sm:$0xff] %v5961_v33  ;;  %v5963_v4 = vpop.f32.mrb[25].mxu0 }
 0x503   :  { %7084 = vst [vmem:[#allocation7_spill] sm:$0xff] %v5963_v4 }
 0x505   :  { %v5965_v2 = vpop.f32.mrb[26].mxu0 }
 0x506   :  { %7085 = vst [vmem:[#allocation8_spill] sm:$0xff] %v5965_v2  ;;  %v5967_v9 = vpop.f32.mrb[27].mxu0 }
 0x507   :  { %7086 = vst [vmem:[#allocation9_spill] sm:$0xff] %v5967_v9 }
 0x509   :  { %v5969_v34 = vpop.f32.mrb[28].mxu0 }
 0x50a   :  { %7087 = vst [vmem:[#allocation10_spill] sm:$0xff] %v5969_v34  ;;  %v5971_v36 = vpop.f32.mrb[29].mxu0 }
 0x50b   :  { %7088 = vst [vmem:[#allocation11_spill] sm:$0xff] %v5971_v36 }
 0x50d   :  { %v5973_v60 = vpop.f32.mrb[30].mxu0 }
 0x50e   :  { %7089 = vst [vmem:[#allocation12_spill] sm:$0xff] %v5973_v60  ;;  %v5975_v61 = vpop.f32.mrb[31].mxu0 }
 0x50f   :  { %7090 = vst [vmem:[#allocation13_spill] sm:$0xff] %v5975_v61 }
 0x511   :  { %v5977_v63 = vpop.f32.mrb[32].mxu0 }
 0x512   :  { %7091 = vst [vmem:[#allocation14_spill] sm:$0xff] %v5977_v63  ;;  %v5979_v3 = vpop.f32.mrb[33].mxu0 }
 0x513   :  { %7092 = vst [vmem:[#allocation15_spill] sm:$0xff] %v5979_v3  ;;  %v573_v3 = vadd.f32 %v5943_v35, %v5407_v55 }
 0x515   :  { %v5981_v5 = vpop.f32.mrb[34].mxu0 }
 0x516   :  { %7093 = vst [vmem:[#allocation16_spill] sm:$0xff] %v5981_v5  ;;  %v5983_v7 = vpop.f32.mrb[35].mxu0 }
 0x517   :  { %7094 = vst [vmem:[#allocation17_spill] sm:$0xff] %v5983_v7 }
 0x519   :  { %v5985_v11 = vpop.f32.mrb[36].mxu0 }
 0x51a   :  { %7095 = vst [vmem:[#allocation18_spill] sm:$0xff] %v5985_v11  ;;  %v5987_v8 = vpop.f32.mrb[37].mxu0 }
 0x51b   :  { %7096 = vst [vmem:[#allocation19_spill] sm:$0xff] %v5987_v8 }
 0x51d   :  { %v5989_v1 = vpop.f32.mrb[38].mxu0 }
 0x51e   :  { %7097 = vst [vmem:[#allocation20_spill] sm:$0xff] %v5989_v1  ;;  %v5991_v6 = vpop.f32.mrb[39].mxu0  ;;  %v571_v1 = vadd.f32 %v5941_v24, %v5403_v54 }
 0x51f   :  { %7098 = vst [vmem:[#allocation21_spill] sm:$0xff] %v5991_v6 }
 0x555   :  { %v5993_v10 = vpop.f32.mrb[40].mxu0 }
 0x556   :  { %7099 = vst [vmem:[#allocation22_spill] sm:$0xff] %v5993_v10  ;;  %v5995_v12 = vpop.f32.mrb[41].mxu0 }
 0x557   :  { %7100 = vst [vmem:[#allocation23_spill] sm:$0xff] %v5995_v12 }
 0x559   :  { %v5997_v19 = vpop.f32.mrb[42].mxu0 }
 0x55a   :  { %7101 = vst [vmem:[#allocation24_spill] sm:$0xff] %v5997_v19  ;;  %v5999_v26 = vpop.f32.mrb[43].mxu0  ;;  %v1320_v48 = vpop.f32.mrb[12].mxu1 }
 0x55b   :  { %7102 = vst [vmem:[#allocation25_spill] sm:$0xff] %v5999_v26  ;;  %v1329_v49 = vadd.f32 %v1320_v48, %v5572_v37  ;;  %v1322_v52 = vpop.f32.mrb[13].mxu1 }
 0x55c   :  { %v1330_v56 = vadd.f32 %v1322_v52, %v5576_v13  ;;  %v1324_v57 = vpop.f32.mrb[14].mxu1 }
 0x55d   :  { %v4289_v58 = vmul.f32 -1.442695, %v1329_v49  ;;  %v1331_v59 = vadd.f32 %v1324_v57, %v5572_v37  ;;  %v6004_v39 = vpop.f32.mrb[44].mxu0  ;;  %v1326_v31 = vpop.f32.mrb[15].mxu1 }
 0x55e   :  { %7103 = vst [vmem:[#allocation26_spill] sm:$0xff] %v6004_v39  ;;  %v4290_v40 = vmul.f32 -1.442695, %v1330_v56  ;;  %v1332_v0 = vadd.f32 %v1326_v31, %v5576_v13  ;;  %v6007_v21 = vpop.f32.mrb[45].mxu0 }
 0x55f   :  { %7104 = vst [vmem:[#allocation27_spill] sm:$0xff] %v6007_v21  ;;  %4688 = vpow2.f32 %v4289_v58  ;;  %v4291_v18 = vmul.f32 -1.442695, %v1331_v59  ;;  %v553_v58 = vadd.f32 %v5929_v47, %v5403_v54 }
 0x560   :  { %4690 = vpow2.f32 %v4290_v40  ;;  %v4292_v26 = vmul.f32 -1.442695, %v1332_v0  ;;  %v555_v0 = vadd.f32 %v5931_v15, %v5407_v55 }
 0x561   :  { %4692 = vpow2.f32 %v4291_v18 }
 0x562   :  { %4694 = vpow2.f32 %v4292_v26  ;;  %v559_v26 = vadd.f32 %v5933_v16, %v5403_v54 }
 0x569   :  { %v4689_v48 = vpop.eup %4688 }
 0x56a   :  { %v4691_v52 = vpop.eup %4690  ;;  %v1345_v57 = vadd.f32 1.0, %v4689_v48 }
 0x56b   :  { %v4693_v19 = vpop.eup %4692  ;;  %v1346_v49 = vadd.f32 1.0, %v4691_v52 }
 0x56c   :  { %v4695_v12 = vpop.eup %4694  ;;  %v1347_v56 = vadd.f32 1.0, %v4693_v19  ;;  %v561_v19 = vadd.f32 %v5935_v22, %v5407_v55 }
 0x56d   :  { %4696 = vrcp.f32 %v1346_v49  ;;  %v1348_v39 = vadd.f32 1.0, %v4695_v12 }
 0x56e   :  { %v6009_v10 = vpop.f32.mrb[46].mxu0 }
 0x56f   :  { %7105 = vst [vmem:[#allocation28_spill] sm:$0xff] %v6009_v10  ;;  %4698 = vrcp.f32 %v1348_v39  ;;  %v6011_v31 = vpop.f32.mrb[47].mxu0 }
 0x570   :  { %7106 = vst [vmem:[#allocation29_spill] sm:$0xff] %v6011_v31  ;;  %4700 = vrcp.f32 %v1345_v57 }
 0x571   :  { %4702 = vrcp.f32 %v1347_v56 }
 0x572   :  { %v1429_v18 = vpop.f32.mrb[48].mxu0 }
 0x573   :  { %v1438_v59 = vadd.f32 %v1429_v18, %v553_v58  ;;  %v1431_v12 = vpop.f32.mrb[49].mxu0 }
 0x574   :  { %v1439_v39 = vadd.f32 %v1431_v12, %v555_v0  ;;  %v1433_v40 = vpop.f32.mrb[50].mxu0 }
 0x575   :  { %v4296_v48 = vmul.f32 -1.442695, %v1438_v59  ;;  %v1440_v52 = vadd.f32 %v1433_v40, %v559_v26  ;;  %v1435_v49 = vpop.f32.mrb[51].mxu0 }
 0x576   :  { %v4297_v47 = vmul.f32 -1.442695, %v1439_v39  ;;  %v1441_v57 = vadd.f32 %v1435_v49, %v561_v19 }
 0x577   :  { %v4697_v31 = vpop.eup %4696  ;;  %4704 = vpow2.f32 %v4296_v48  ;;  %v4298_v15 = vmul.f32 -1.442695, %v1440_v52 }
 0x578   :  { %4706 = vpow2.f32 %v4297_v47  ;;  %v4299_v10 = vmul.f32 -1.442695, %v1441_v57  ;;  %v1357_v21 = vmul.f32 2.0, %v4697_v31 }
 0x579   :  { %v4699_v16 = vpop.eup %4698  ;;  %4708 = vpow2.f32 %v4298_v15 }
 0x57a   :  { %4710 = vpow2.f32 %v4299_v10  ;;  %v4293_v56 = vadd.f32 -1.0, %v1357_v21  ;;  %v1358_v58 = vmul.f32 2.0, %v4699_v16  ;;  %v4701_v18 = vpop.eup %4700 }
 0x57b   :  { %v4703_v12 = vpop.eup %4702 }
 0x57c   :  { %v1363_v22 = vmul.f32 %v4701_v18, %v4293_v56  ;;  %v4294_v0 = vadd.f32 -1.0, %v1358_v58 }
 0x57e   :  { %1367 = vrot.lane.b32.xlu1 %v1363_v22, %s5188_s4  ;;  %v1364_v26 = vmul.f32 %v4703_v12, %v4294_v0 }
 0x580   :  { %1369 = vrot.lane.b32.xlu0 %v1364_v26, %s5188_s4 }
 0x581   :  { %v4705_v59 = vpop.eup %4704 }
 0x582   :  { %v4707_v19 = vpop.eup %4706  ;;  %v1454_v52 = vadd.f32 1.0, %v4705_v59  ;;  %v1361_v59 = vmul.f32 %v4701_v18, %v5720_v20 }
 0x583   :  { %v4709_v39 = vpop.eup %4708  ;;  %v1455_v40 = vadd.f32 1.0, %v4707_v19 }
 0x584   :  { %v4711_v48 = vpop.eup %4710  ;;  %v1456_v10 = vadd.f32 1.0, %v4709_v39 }
 0x585   :  { %4712 = vrcp.f32 %v1455_v40  ;;  %v1457_v49 = vadd.f32 1.0, %v4711_v48  ;;  %v1362_v48 = vmul.f32 %v4703_v12, %v5724_v14 }
 0x587   :  { %4714 = vrcp.f32 %v1457_v49 }
 0x588   :  { %4716 = vrcp.f32 %v1454_v52 }
 0x589   :  { %4718 = vrcp.f32 %v1456_v10 }
 0x58f   :  { %v4713_v21 = vpop.eup %4712 }
 0x590   :  { %v1466_v47 = vmul.f32 2.0, %v4713_v21 }
 0x591   :  { %v4715_v57 = vpop.eup %4714 }
 0x592   :  { %v4300_v15 = vadd.f32 -1.0, %v1466_v47  ;;  %v1467_v56 = vmul.f32 2.0, %v4715_v57  ;;  %v4717_v58 = vpop.eup %4716 }
 0x593   :  { %v4719_v26 = vpop.eup %4718  ;;  %v1470_v14 = vmul.f32 %v4717_v58, %v5751_v29 }
 0x594   :  { %v1472_v22 = vmul.f32 %v4717_v58, %v4300_v15  ;;  %v4301_v0 = vadd.f32 -1.0, %v1467_v56  ;;  %v7109_v58 = vmov 0  }
 0x596   :  { %1476 = vrot.lane.b32.xlu1 %v1472_v22, %s5188_s4  ;;  %v1473_v19 = vmul.f32 %v4719_v26, %v4301_v0  ;;  %v1471_v22 = vmul.f32 %v4719_v26, %v5758_v62  ;;  %v6053_v62 = vld [vmem:[%s7067_s6] ss:$8 sps:$4 sm:$0xff]   ;;  %v6072_v26 = vld [vmem:[%s7067_s6 + $0x24] ss:$8 sps:$4 sm:$0xff]  }
 0x598   :  { %1478 = vrot.lane.b32.xlu0 %v1473_v19, %s5188_s4 }
 0x5f0   :  { %v1368_v39 = vpop.permute.xlu1 %1367 }
 0x5f1   :  { %v6026_v40 = vadd.f32 %v1368_v39, %v1361_v59 }
 0x5f2   :  { %v1370_v52 = vpop.permute.xlu0 %1369 }
 0x5f3   :  { %4720 = vtanh.f32 %v6026_v40  ;;  %v6030_v49 = vadd.f32 %v1370_v52, %v1362_v48  ;;  %v6078_v52 = vld [vmem:[%s7067_s6 + $0x20] ss:$8 sps:$4 sm:$0xff]  }
 0x5f5   :  { %4722 = vtanh.f32 %v6030_v49 }
 0x5fd   :  { %v4721_v10 = vpop.eup %4720 }
 0x5fe   :  { %v6033_v15 = vmul.f32 %v4721_v10, %v4697_v31  ;;  %v6084_v10 = vld [vmem:[%s7067_s6 + $0x34] ss:$8 sps:$4 sm:$0xff]  }
 0x5ff   :  { %v4723_v47 = vpop.eup %4722 }
 0x600   :  { %7107 = vst [vmem:[#allocation30_spill] sm:$0xff] %v6033_v15  ;;  %v6035_v56 = vmul.f32 %v4723_v47, %v4699_v16  ;;  %v6090_v47 = vld [vmem:[%s7067_s6 + $0x30] ss:$8 sps:$4 sm:$0xff]  }
 0x602   :  { %7108 = vst [vmem:[#allocation31_spill] sm:$0xff] %v6035_v56  ;;  %v1489_v20 = vpack.c.bf16 %v6035_v56, %v6033_v15  ;;  %v567_v56 = vadd.f32 %v5939_v25, %v5407_v55 }
 0x604   :  { %1491 = vrot.lane.b32.xlu1 %v1489_v20, %s5188_s4  ;;  %v6096_v20 = vld [vmem:[%s7064_s5 + $0x4] ss:$8 sps:$4 sm:$0xff]  }
 0x608   :  { %v1477_v18 = vpop.permute.xlu1 %1476 }
 0x609   :  { %v6041_v12 = vadd.f32 %v1477_v18, %v1470_v14  ;;  %v6104_v18 = vld [vmem:[%s7066_s7] ss:$8 sps:$4 sm:$0xff]  }
 0x60a   :  { %v1479_v0 = vpop.permute.xlu0 %1478 }
 0x60b   :  { %4724 = vtanh.f32 %v6041_v12  ;;  %v6045_v19 = vadd.f32 %v1479_v0, %v1471_v22  ;;  %v6111_v22 = vld [vmem:[%s7066_s7 + $0x14] ss:$8 sps:$4 sm:$0xff]   ;;  %v6120_v0 = vld [vmem:[%s7066_s7 + $0x10] ss:$8 sps:$4 sm:$0xff]  }
 0x60d   :  { %4726 = vtanh.f32 %v6045_v19 }
 0x615   :  { %v4725_v31 = vpop.eup %4724 }
 0x616   :  { %v1486_v59 = vmul.f32 %v4725_v31, %v4713_v21  ;;  %v6060_v21 = vld [vmem:[%s7067_s6 + $0x14] ss:$8 sps:$4 sm:$0xff]   ;;  %v6127_v31 = vld [vmem:[%s7066_s7 + $0x24] ss:$8 sps:$4 sm:$0xff]  }
 0x617   :  { %v4727_v16 = vpop.eup %4726 }
 0x618   :  { %v1487_v39 = vmul.f32 %v4727_v16, %v4715_v57  ;;  %v6066_v57 = vld [vmem:[%s7067_s6 + $0x10] ss:$8 sps:$4 sm:$0xff]   ;;  %v6134_v16 = vld [vmem:[%s7066_s7 + $0x20] ss:$8 sps:$4 sm:$0xff]  }
 0x61a   :  { %v1488_v48 = vpack.c.bf16 %v1487_v39, %v1486_v59  ;;  %v6141_v59 = vld [vmem:[%s7066_s7 + $0x34] ss:$8 sps:$4 sm:$0xff]   ;;  %v6148_v39 = vld [vmem:[%s7066_s7 + $0x30] ss:$8 sps:$4 sm:$0xff]  }
 0x61c   :  { %1540 = vrot.lane.b32.xlu0 %v1488_v48, %s5188_s4  ;;  %v6155_v48 = vld [vmem:[%s7067_s6 + $0x4] ss:$8 sps:$4 sm:$0xff]  }
 0x676   :  { %v1492_v29 = vpop.permute.xlu1 %1491 }
 0x677   :  { %4302 = vmatmul.mubr.msk.bf16.vlgmr.msra.gmra.mrb[16].mxu1 %vm389_vm4, %v1492_v29  ;;  %v6161_v29 = vld [vmem:[%s7066_s7 + $0x4] ss:$8 sps:$4 sm:$0xff]  }
 0x678   :  { %1546 = vmatpush1.bf16.msra.mxu1 %v6053_v62  ;;  %1577 = vmatprep.mubr.bf16.mxu1 %v7109_v58 }
 0x679   :  { %1547 = vmatprep.subr.bf16.mxu1 %v6060_v21 }
 0x67c   :  { %1548 = vmatpush1.bf16.msra.mxu1 %v6066_v57 }
 0x67d   :  { %1549 = vmatprep.subr.bf16.mxu1 %v6072_v26 }
 0x680   :  { %1550 = vmatpush1.bf16.msra.mxu1 %v6078_v52 }
 0x681   :  { %1551 = vmatprep.subr.bf16.mxu1 %v6084_v10 }
 0x684   :  { %1552 = vmatpush1.bf16.msra.mxu1 %v6090_v47 }
 0x685   :  { %1913 = vmatprep.subr.bf16.mxu1 %v6096_v20 }
 0x68e   :  { %v1541_v14 = vpop.permute.xlu0 %1540 }
 0x68f   :  { %4303 = vmatmul.mubr.msk.bf16.vlgmr.msra.gmra.mrb[16].mxu1 %vm389_vm4, %v1541_v14  ;;  %4310 = vmatmul.mubr.msk.bf16.vlgmr.msra.gmra.mrb[52].mxu0 %vm389_vm4, %v1541_v14  ;;  %v565_v14 = vadd.f32 %v5937_v23, %v5403_v54 }
 0x690   :  { %1756 = vmatpush1.bf16.msra.mxu0 %v6104_v18  ;;  %1914 = vmatpush1.bf16.msra.mxu1 %v5888_v42 }
 0x691   :  { %1757 = vmatprep.subr.bf16.mxu0 %v6111_v22  ;;  %1915 = vmatprep.subr.bf16.mxu1 %v5895_v41 }
 0x692   :  { %1787 = vmatprep.mubr.bf16.mxu0 %v7109_v58  ;;  %1945 = vmatprep.mubr.bf16.mxu1 %v7109_v58 }
 0x694   :  { %1758 = vmatpush1.bf16.msra.mxu0 %v6120_v0  ;;  %1916 = vmatpush1.bf16.msra.mxu1 %v5901_v27 }
 0x695   :  { %1759 = vmatprep.subr.bf16.mxu0 %v6127_v31  ;;  %1917 = vmatprep.subr.bf16.mxu1 %v5907_v43 }
 0x698   :  { %1760 = vmatpush1.bf16.msra.mxu0 %v6134_v16  ;;  %1918 = vmatpush1.bf16.msra.mxu1 %v5913_v44 }
 0x699   :  { %1761 = vmatprep.subr.bf16.mxu0 %v6141_v59  ;;  %1919 = vmatprep.subr.bf16.mxu1 %v5919_v45 }
 0x69c   :  { %1762 = vmatpush1.bf16.msra.mxu0 %v6148_v39  ;;  %1920 = vmatpush1.bf16.msra.mxu1 %v5925_v46 }
 0x69d   :  { %1804 = vmatprep.subr.bf16.mxu0 %v6155_v48  ;;  %2014 = vmatprep.subr.bf16.mxu1 %v6161_v29 }
 0x762   :  { %v1579_v15 = vpop.f32.mrb[16].mxu1  ;;  %v1688_v6 = vpop.f32.mrb[52].mxu0 }
 0x763   :  { %v1588_v8 = vadd.f32 %v1579_v15, %v5572_v37  ;;  %v1697_v11 = vadd.f32 %v1688_v6, %v565_v14  ;;  %v1581_v7 = vpop.f32.mrb[17].mxu1  ;;  %v1690_v5 = vpop.f32.mrb[53].mxu0 }
 0x764   :  { %v1589_v63 = vadd.f32 %v1581_v7, %v5576_v13  ;;  %v1698_v61 = vadd.f32 %v1690_v5, %v567_v56  ;;  %v1583_v23 = vpop.f32.mrb[18].mxu1  ;;  %v1692_v60 = vpop.f32.mrb[54].mxu0 }
 0x765   :  { %v4304_v36 = vmul.f32 -1.442695, %v1588_v8  ;;  %v1590_v25 = vadd.f32 %v1583_v23, %v5572_v37  ;;  %v1699_v34 = vadd.f32 %v1692_v60, %v571_v1  ;;  %v1585_v9 = vpop.f32.mrb[19].mxu1  ;;  %v1694_v2 = vpop.f32.mrb[55].mxu0  ;;  %v4311_v14 = vmul.f32 -1.442695, %v1697_v11 }
 0x766   :  { %v4305_v24 = vmul.f32 -1.442695, %v1589_v63  ;;  %v4312_v4 = vmul.f32 -1.442695, %v1698_v61  ;;  %v1591_v6 = vadd.f32 %v1585_v9, %v5576_v13  ;;  %v1700_v15 = vadd.f32 %v1694_v2, %v573_v3 }
 0x767   :  { %4728 = vpow2.f32 %v4304_v36  ;;  %v4306_v33 = vmul.f32 -1.442695, %v1590_v25  ;;  %v4313_v7 = vmul.f32 -1.442695, %v1699_v34 }
 0x768   :  { %4730 = vpow2.f32 %v4305_v24  ;;  %v4307_v35 = vmul.f32 -1.442695, %v1591_v6  ;;  %v4314_v5 = vmul.f32 -1.442695, %v1700_v15 }
 0x769   :  { %4732 = vpow2.f32 %v4312_v4 }
 0x76a   :  { %4734 = vpow2.f32 %v4311_v14 }
 0x76b   :  { %4736 = vpow2.f32 %v4306_v33 }
 0x76c   :  { %4738 = vpow2.f32 %v4307_v35 }
 0x76d   :  { %4740 = vpow2.f32 %v4314_v5 }
 0x76e   :  { %4742 = vpow2.f32 %v4313_v7 }
 0x771   :  { %v4729_v60 = vpop.eup %4728 }
 0x772   :  { %v4731_v8 = vpop.eup %4730  ;;  %v1604_v9 = vadd.f32 1.0, %v4729_v60 }
 0x773   :  { %v4733_v63 = vpop.eup %4732  ;;  %v1605_v61 = vadd.f32 1.0, %v4731_v8 }
 0x774   :  { %v4735_v1 = vpop.eup %4734  ;;  %v1714_v2 = vadd.f32 1.0, %v4733_v63 }
 0x775   :  { %v4737_v3 = vpop.eup %4736  ;;  %4744 = vrcp.f32 %v1605_v61  ;;  %v1713_v56 = vadd.f32 1.0, %v4735_v1 }
 0x776   :  { %v4739_v36 = vpop.eup %4738  ;;  %4746 = vrcp.f32 %v1714_v2  ;;  %v1606_v34 = vadd.f32 1.0, %v4737_v3 }
 0x777   :  { %v4741_v11 = vpop.eup %4740  ;;  %v1607_v4 = vadd.f32 1.0, %v4739_v36  ;;  %4748 = vrcp.f32 %v1604_v9 }
 0x778   :  { %v1716_v33 = vadd.f32 1.0, %v4741_v11  ;;  %v4743_v23 = vpop.eup %4742 }
 0x779   :  { %4750 = vrcp.f32 %v1607_v4  ;;  %v1715_v25 = vadd.f32 1.0, %v4743_v23 }
 0x77a   :  { %4752 = vrcp.f32 %v1716_v33 }
 0x77b   :  { %4754 = vrcp.f32 %v1713_v56 }
 0x77c   :  { %4756 = vrcp.f32 %v1606_v34 }
 0x77d   :  { %4758 = vrcp.f32 %v1715_v25 }
 0x77f   :  { %v4745_v24 = vpop.eup %4744 }
 0x780   :  { %v4747_v6 = vpop.eup %4746  ;;  %v1616_v15 = vmul.f32 2.0, %v4745_v24 }
 0x781   :  { %v1725_v14 = vmul.f32 2.0, %v4747_v6  ;;  %v4749_v35 = vpop.eup %4748 }
 0x782   :  { %v4308_v5 = vadd.f32 -1.0, %v1616_v15  ;;  %v1620_v34 = vmul.f32 %v4749_v35, %v6026_v40 }
 0x783   :  { %v4751_v7 = vpop.eup %4750  ;;  %v4315_v61 = vadd.f32 -1.0, %v1725_v14 }
 0x784   :  { %v4753_v60 = vpop.eup %4752  ;;  %v1622_v8 = vmul.f32 %v4749_v35, %v4308_v5  ;;  %v1617_v63 = vmul.f32 2.0, %v4751_v7 }
 0x785   :  { %v1726_v1 = vmul.f32 2.0, %v4753_v60  ;;  %v4755_v9 = vpop.eup %4754 }
 0x786   :  { %1626 = vrot.lane.b32.xlu1 %v1622_v8, %s5188_s4  ;;  %v4309_v2 = vadd.f32 -1.0, %v1617_v63  ;;  %v4757_v3 = vpop.eup %4756  ;;  %v1731_v11 = vmul.f32 %v4755_v9, %v4315_v61  ;;  %v1729_v14 = vmul.f32 %v4755_v9, %v6041_v12 }
 0x787   :  { %v4316_v4 = vadd.f32 -1.0, %v1726_v1  ;;  %v4759_v56 = vpop.eup %4758  ;;  %v1621_v15 = vmul.f32 %v4757_v3, %v6030_v49 }
 0x788   :  { %v1623_v36 = vmul.f32 %v4757_v3, %v4309_v2  ;;  %v1730_v1 = vmul.f32 %v4759_v56, %v6045_v19 }
 0x789   :  { %v1732_v33 = vmul.f32 %v4759_v56, %v4316_v4 }
 0x78a   :  { %1628 = vrot.lane.b32.xlu0 %v1623_v36, %s5188_s4  ;;  %1735 = vrot.lane.b32.xlu1 %v1731_v11, %s5188_s4 }
 0x78e   :  { %1737 = vrot.lane.b32.xlu0 %v1732_v33, %s5188_s4 }
 0x7f8   :  { %v1627_v23 = vpop.permute.xlu1 %1626 }
 0x7f9   :  { %v6181_v25 = vadd.f32 %v1627_v23, %v1620_v34  ;;  %v583_v34 = vadd.f32 %v5949_v38, %v5403_v54 }
 0x7fb   :  { %4760 = vtanh.f32 %v6181_v25 }
 0x7fc   :  { %v1629_v5 = vpop.permute.xlu0 %1628  ;;  %v1736_v8 = vpop.permute.xlu1 %1735 }
 0x7fd   :  { %v6186_v63 = vadd.f32 %v1629_v5, %v1621_v15  ;;  %v6188_v61 = vadd.f32 %v1736_v8, %v1729_v14  ;;  %v585_v14 = vadd.f32 %v5951_v50, %v5407_v55 }
 0x7ff   :  { %4762 = vtanh.f32 %v6186_v63 }
 0x800   :  { %v1738_v40 = vpop.permute.xlu0 %1737  ;;  %4764 = vtanh.f32 %v6188_v61 }
 0x801   :  { %v6193_v35 = vadd.f32 %v1738_v40, %v1730_v1 }
 0x803   :  { %4766 = vtanh.f32 %v6193_v35 }
 0x805   :  { %v4761_v49 = vpop.eup %4760 }
 0x806   :  { %v6196_v9 = vmul.f32 %v4761_v49, %v4745_v24 }
 0x809   :  { %v4763_v12 = vpop.eup %4762 }
 0x80a   :  { %v6198_v2 = vmul.f32 %v4763_v12, %v4751_v7  ;;  %v4765_v3 = vpop.eup %4764  ;;  %v579_v7 = vadd.f32 %v5947_v51, %v5407_v55 }
 0x80b   :  { %v1745_v19 = vmul.f32 %v4765_v3, %v4747_v6  ;;  %v577_v6 = vadd.f32 %v5945_v17, %v5403_v54 }
 0x80c   :  { %v1748_v36 = vpack.c.bf16 %v6198_v2, %v6196_v9 }
 0x80d   :  { %v4767_v11 = vpop.eup %4766 }
 0x80e   :  { %1750 = vrot.lane.b32.xlu1 %v1748_v36, %s5188_s4  ;;  %v1746_v4 = vmul.f32 %v4767_v11, %v4753_v60 }
 0x810   :  { %v1747_v56 = vpack.c.bf16 %v1746_v4, %v1745_v19 }
 0x812   :  { %1799 = vrot.lane.b32.xlu0 %v1747_v56, %s5188_s4 }
 0x880   :  { %v1751_v33 = vpop.permute.xlu1 %1750 }
 0x881   :  { %4317 = vmatmul.mubr.msk.bf16.vlgmr.msra.gmra.mrb[56].mxu0 %vm389_vm4, %v1751_v33 }
 0x882   :  { %1805 = vmatpush1.bf16.msra.mxu0 %v6053_v62  ;;  %1836 = vmatprep.mubr.bf16.mxu0 %v7109_v58 }
 0x883   :  { %1806 = vmatprep.subr.bf16.mxu0 %v6060_v21 }
 0x884   :  { %v1800_v24 = vpop.permute.xlu0 %1799 }
 0x885   :  { %4325 = vmatmul.mubr.msk.bf16.vlgmr.msra.gmra.mrb[20].mxu1 %vm389_vm4, %v1800_v24 }
 0x886   :  { %1807 = vmatpush1.bf16.msra.mxu0 %v6066_v57  ;;  %2015 = vmatpush1.bf16.msra.mxu1 %v6104_v18 }
 0x887   :  { %1808 = vmatprep.subr.bf16.mxu0 %v6072_v26  ;;  %2016 = vmatprep.subr.bf16.mxu1 %v6111_v22 }
 0x888   :  { %2046 = vmatprep.mubr.bf16.mxu1 %v7109_v58 }
 0x88a   :  { %1809 = vmatpush1.bf16.msra.mxu0 %v6078_v52  ;;  %2017 = vmatpush1.bf16.msra.mxu1 %v6120_v0 }
 0x88b   :  { %1810 = vmatprep.subr.bf16.mxu0 %v6084_v10  ;;  %2018 = vmatprep.subr.bf16.mxu1 %v6127_v31 }
 0x88e   :  { %1811 = vmatpush1.bf16.msra.mxu0 %v6090_v47  ;;  %2019 = vmatpush1.bf16.msra.mxu1 %v6134_v16 }
 0x88f   :  { %2172 = vmatprep.subr.bf16.mxu0 %v6096_v20  ;;  %2020 = vmatprep.subr.bf16.mxu1 %v6141_v59 }
 0x891   :  { %4318 = vmatmul.mubr.msk.bf16.vlgmr.msra.gmra.mrb[56].mxu0 %vm389_vm4, %v1800_v24 }
 0x892   :  { %2173 = vmatpush1.bf16.msra.mxu0 %v5888_v42  ;;  %2021 = vmatpush1.bf16.msra.mxu1 %v6148_v39 }
 0x893   :  { %2174 = vmatprep.subr.bf16.mxu0 %v5895_v41  ;;  %2063 = vmatprep.subr.bf16.mxu1 %v6155_v48 }
 0x894   :  { %2204 = vmatprep.mubr.bf16.mxu0 %v7109_v58 }
 0x896   :  { %2175 = vmatpush1.bf16.msra.mxu0 %v5901_v27 }
 0x897   :  { %2176 = vmatprep.subr.bf16.mxu0 %v5907_v43 }
 0x89a   :  { %2177 = vmatpush1.bf16.msra.mxu0 %v5913_v44 }
 0x89b   :  { %2178 = vmatprep.subr.bf16.mxu0 %v5919_v45 }
 0x89e   :  { %2179 = vmatpush1.bf16.msra.mxu0 %v5925_v46 }
 0x89f   :  { %2273 = vmatprep.subr.bf16.mxu0 %v6161_v29 }
 0x958   :  { %v1947_v60 = vpop.f32.mrb[20].mxu1 }
 0x959   :  { %v1956_v23 = vadd.f32 %v1947_v60, %v577_v6  ;;  %v1949_v15 = vpop.f32.mrb[21].mxu1 }
 0x95a   :  { %v1957_v5 = vadd.f32 %v1949_v15, %v579_v7  ;;  %v1951_v8 = vpop.f32.mrb[22].mxu1 }
 0x95b   :  { %v1958_v1 = vadd.f32 %v1951_v8, %v583_v34  ;;  %v1953_v40 = vpop.f32.mrb[23].mxu1  ;;  %v4326_v7 = vmul.f32 -1.442695, %v1956_v23 }
 0x95c   :  { %v1959_v49 = vadd.f32 %v1953_v40, %v585_v14  ;;  %v4327_v12 = vmul.f32 -1.442695, %v1957_v5 }
 0x95d   :  { %v4328_v60 = vmul.f32 -1.442695, %v1958_v1 }
 0x95e   :  { %v4329_v17 = vmul.f32 -1.442695, %v1959_v49  ;;  %4768 = vpow2.f32 %v4327_v12 }
 0x960   :  { %4770 = vpow2.f32 %v4329_v17 }
 0x964   :  { %v1838_v3 = vpop.f32.mrb[56].mxu0 }
 0x965   :  { %v1847_v36 = vadd.f32 %v1838_v3, %v5572_v37  ;;  %v1840_v51 = vpop.f32.mrb[57].mxu0 }
 0x966   :  { %v1848_v11 = vadd.f32 %v1840_v51, %v5576_v13  ;;  %v1842_v19 = vpop.f32.mrb[58].mxu0 }
 0x967   :  { %v1849_v38 = vadd.f32 %v1842_v19, %v5572_v37  ;;  %v1844_v4 = vpop.f32.mrb[59].mxu0  ;;  %v4319_v56 = vmul.f32 -1.442695, %v1847_v36 }
 0x968   :  { %v1850_v50 = vadd.f32 %v1844_v4, %v5576_v13  ;;  %v4320_v33 = vmul.f32 -1.442695, %v1848_v11  ;;  %v4769_v34 = vpop.eup %4768 }
 0x969   :  { %v4321_v24 = vmul.f32 -1.442695, %v1849_v38  ;;  %4772 = vpow2.f32 %v4319_v56  ;;  %v1973_v14 = vadd.f32 1.0, %v4769_v34 }
 0x96a   :  { %v4322_v6 = vmul.f32 -1.442695, %v1850_v50  ;;  %4774 = vpow2.f32 %v4320_v33  ;;  %v4771_v15 = vpop.eup %4770 }
 0x96b   :  { %4776 = vpow2.f32 %v4321_v24  ;;  %v1975_v5 = vadd.f32 1.0, %v4771_v15 }
 0x96c   :  { %4778 = vpow2.f32 %v4322_v6 }
 0x96d   :  { %4780 = vpow2.f32 %v4326_v7 }
 0x96e   :  { %4782 = vpow2.f32 %v4328_v60 }
 0x96f   :  { %4784 = vrcp.f32 %v1973_v14 }
 0x970   :  { %4786 = vrcp.f32 %v1975_v5 }
 0x973   :  { %v4773_v8 = vpop.eup %4772 }
 0x974   :  { %v4775_v40 = vpop.eup %4774  ;;  %v1863_v17 = vadd.f32 1.0, %v4773_v8 }
 0x975   :  { %v4777_v49 = vpop.eup %4776  ;;  %v1864_v12 = vadd.f32 1.0, %v4775_v40 }
 0x976   :  { %v4779_v3 = vpop.eup %4778  ;;  %v1865_v51 = vadd.f32 1.0, %v4777_v49 }
 0x977   :  { %4788 = vrcp.f32 %v1864_v12  ;;  %v1866_v23 = vadd.f32 1.0, %v4779_v3  ;;  %v4781_v36 = vpop.eup %4780 }
 0x978   :  { %v4783_v1 = vpop.eup %4782  ;;  %v1972_v11 = vadd.f32 1.0, %v4781_v36 }
 0x979   :  { %4790 = vrcp.f32 %v1866_v23  ;;  %v1974_v19 = vadd.f32 1.0, %v4783_v1  ;;  %v4785_v38 = vpop.eup %4784 }
 0x97a   :  { %4792 = vrcp.f32 %v1863_v17  ;;  %v4787_v4 = vpop.eup %4786  ;;  %v1984_v33 = vmul.f32 2.0, %v4785_v38 }
 0x97b   :  { %4794 = vrcp.f32 %v1865_v51  ;;  %v1985_v60 = vmul.f32 2.0, %v4787_v4 }
 0x97c   :  { %4796 = vrcp.f32 %v1972_v11  ;;  %v4330_v5 = vadd.f32 -1.0, %v1984_v33 }
 0x97d   :  { %4798 = vrcp.f32 %v1974_v19  ;;  %v4331_v49 = vadd.f32 -1.0, %v1985_v60 }
 0x981   :  { %v4789_v50 = vpop.eup %4788 }
 0x982   :  { %v1875_v56 = vmul.f32 2.0, %v4789_v50 }
 0x983   :  { %v4791_v24 = vpop.eup %4790 }
 0x984   :  { %v4323_v6 = vadd.f32 -1.0, %v1875_v56  ;;  %v1876_v7 = vmul.f32 2.0, %v4791_v24  ;;  %v4793_v34 = vpop.eup %4792 }
 0x985   :  { %v4795_v8 = vpop.eup %4794  ;;  %v1879_v36 = vmul.f32 %v4793_v34, %v6181_v25 }
 0x986   :  { %v1881_v15 = vmul.f32 %v4793_v34, %v4323_v6  ;;  %v4324_v14 = vadd.f32 -1.0, %v1876_v7  ;;  %v4797_v12 = vpop.eup %4796  ;;  %v1880_v11 = vmul.f32 %v4795_v8, %v6186_v63 }
 0x987   :  { %v1990_v3 = vmul.f32 %v4797_v12, %v4330_v5  ;;  %v4799_v17 = vpop.eup %4798  ;;  %v1988_v33 = vmul.f32 %v4797_v12, %v6188_v61 }
 0x988   :  { %1885 = vrot.lane.b32.xlu1 %v1881_v15, %s5188_s4  ;;  %v1882_v40 = vmul.f32 %v4795_v8, %v4324_v14  ;;  %v1991_v23 = vmul.f32 %v4799_v17, %v4331_v49  ;;  %v1989_v60 = vmul.f32 %v4799_v17, %v6193_v35 }
 0x98a   :  { %1887 = vrot.lane.b32.xlu0 %v1882_v40, %s5188_s4 }
 0x98c   :  { %1994 = vrot.lane.b32.xlu1 %v1990_v3, %s5188_s4 }
 0x98e   :  { %1996 = vrot.lane.b32.xlu0 %v1991_v23, %s5188_s4 }
 0x9fa   :  { %v1886_v51 = vpop.permute.xlu1 %1885 }
 0x9fb   :  { %v6251_v1 = vadd.f32 %v1886_v51, %v1879_v36 }
 0x9fc   :  { %v1888_v19 = vpop.permute.xlu0 %1887 }
 0x9fd   :  { %4800 = vtanh.f32 %v6251_v1  ;;  %v6255_v56 = vadd.f32 %v1888_v19, %v1880_v11 }
 0x9fe   :  { %v1995_v6 = vpop.permute.xlu1 %1994 }
 0x9ff   :  { %4802 = vtanh.f32 %v6255_v56  ;;  %v6259_v7 = vadd.f32 %v1995_v6, %v1988_v33 }
 0xa00   :  { %v1997_v25 = vpop.permute.xlu0 %1996 }
 0xa01   :  { %4804 = vtanh.f32 %v6259_v7  ;;  %v6263_v34 = vadd.f32 %v1997_v25, %v1989_v60 }
 0xa03   :  { %4806 = vtanh.f32 %v6263_v34 }
 0xa07   :  { %v4801_v63 = vpop.eup %4800 }
 0xa08   :  { %v6266_v14 = vmul.f32 %v4801_v63, %v4789_v50 }
 0xa09   :  { %v4803_v15 = vpop.eup %4802 }
 0xa0a   :  { %v6268_v5 = vmul.f32 %v4803_v15, %v4791_v24 }
 0xa0b   :  { %v4805_v61 = vpop.eup %4804 }
 0xa0c   :  { %v2007_v8 = vpack.c.bf16 %v6268_v5, %v6266_v14  ;;  %v2004_v35 = vmul.f32 %v4805_v61, %v4785_v38 }
 0xa0d   :  { %v4807_v40 = vpop.eup %4806 }
 0xa0e   :  { %2009 = vrot.lane.b32.xlu1 %v2007_v8, %s5188_s4  ;;  %v2005_v49 = vmul.f32 %v4807_v40, %v4787_v4 }
 0xa10   :  { %v2006_v12 = vpack.c.bf16 %v2005_v49, %v2004_v35 }
 0xa12   :  { %2058 = vrot.lane.b32.xlu0 %v2006_v12, %s5188_s4 }
 0xa80   :  { %v2010_v3 = vpop.permute.xlu1 %2009 }
 0xa81   :  { %4332 = vmatmul.mubr.msk.bf16.vlgmr.msra.gmra.mrb[24].mxu1 %vm389_vm4, %v2010_v3 }
 0xa82   :  { %2064 = vmatpush1.bf16.msra.mxu1 %v6053_v62  ;;  %2095 = vmatprep.mubr.bf16.mxu1 %v7109_v58 }
 0xa83   :  { %2065 = vmatprep.subr.bf16.mxu1 %v6060_v21 }
 0xa84   :  { %v2059_v50 = vpop.permute.xlu0 %2058 }
 0xa85   :  { %4340 = vmatmul.mubr.msk.bf16.vlgmr.msra.gmra.mrb[60].mxu0 %vm389_vm4, %v2059_v50 }
 0xa86   :  { %2066 = vmatpush1.bf16.msra.mxu1 %v6066_v57  ;;  %2274 = vmatpush1.bf16.msra.mxu0 %v6104_v18 }
 0xa87   :  { %2067 = vmatprep.subr.bf16.mxu1 %v6072_v26  ;;  %2275 = vmatprep.subr.bf16.mxu0 %v6111_v22 }
 0xa88   :  { %2305 = vmatprep.mubr.bf16.mxu0 %v7109_v58 }
 0xa8a   :  { %2068 = vmatpush1.bf16.msra.mxu1 %v6078_v52  ;;  %2276 = vmatpush1.bf16.msra.mxu0 %v6120_v0 }
 0xa8b   :  { %2069 = vmatprep.subr.bf16.mxu1 %v6084_v10  ;;  %2277 = vmatprep.subr.bf16.mxu0 %v6127_v31 }
 0xa8e   :  { %2070 = vmatpush1.bf16.msra.mxu1 %v6090_v47  ;;  %2278 = vmatpush1.bf16.msra.mxu0 %v6134_v16 }
 0xa8f   :  { %2431 = vmatprep.subr.bf16.mxu1 %v6096_v20  ;;  %2279 = vmatprep.subr.bf16.mxu0 %v6141_v59 }
 0xa91   :  { %4333 = vmatmul.mubr.msk.bf16.vlgmr.msra.gmra.mrb[24].mxu1 %vm389_vm4, %v2059_v50 }
 0xa92   :  { %2432 = vmatpush1.bf16.msra.mxu1 %v5888_v42  ;;  %2280 = vmatpush1.bf16.msra.mxu0 %v6148_v39  ;;  %v589_v42 = vadd.f32 %v5953_v53, %v5403_v54 }
 0xa93   :  { %2433 = vmatprep.subr.bf16.mxu1 %v5895_v41  ;;  %2322 = vmatprep.subr.bf16.mxu0 %v6155_v48  ;;  %v591_v41 = vadd.f32 %v5955_v28, %v5407_v55 }
 0xa94   :  { %2463 = vmatprep.mubr.bf16.mxu1 %v7109_v58 }
 0xa96   :  { %2434 = vmatpush1.bf16.msra.mxu1 %v5901_v27  ;;  %v595_v27 = vadd.f32 %v5957_v30, %v5403_v54 }
 0xa97   :  { %2435 = vmatprep.subr.bf16.mxu1 %v5907_v43 }
 0xa9a   :  { %2436 = vmatpush1.bf16.msra.mxu1 %v5913_v44  ;;  %v597_v44 = vadd.f32 %v5959_v32, %v5407_v55 }
 0xa9b   :  { %2437 = vmatprep.subr.bf16.mxu1 %v5919_v45 }
 0xa9e   :  { %2438 = vmatpush1.bf16.msra.mxu1 %v5925_v46 }
 0xa9f   :  { %2532 = vmatprep.subr.bf16.mxu1 %v6161_v29 }
 0xb58   :  { %v2206_v38 = vpop.f32.mrb[60].mxu0 }
 0xb59   :  { %v2215_v4 = vadd.f32 %v2206_v38, %v589_v42  ;;  %v2208_v43 = vpop.f32.mrb[61].mxu0 }
 0xb5a   :  { %v2216_v45 = vadd.f32 %v2208_v43, %v591_v41  ;;  %v2210_v24 = vpop.f32.mrb[62].mxu0 }
 0xb5b   :  { %v2217_v46 = vadd.f32 %v2210_v24, %v595_v27  ;;  %v2212_v17 = vpop.f32.mrb[63].mxu0  ;;  %v4341_v61 = vmul.f32 -1.442695, %v2215_v4 }
 0xb5c   :  { %v2218_v23 = vadd.f32 %v2212_v17, %v597_v44  ;;  %v4342_v36 = vmul.f32 -1.442695, %v2216_v45 }
 0xb5d   :  { %v4343_v8 = vmul.f32 -1.442695, %v2217_v46 }
 0xb5e   :  { %v4344_v53 = vmul.f32 -1.442695, %v2218_v23  ;;  %4808 = vpow2.f32 %v4342_v36 }
 0xb60   :  { %4810 = vpow2.f32 %v4344_v53 }
 0xb64   :  { %v2097_v51 = vpop.f32.mrb[24].mxu1 }
 0xb65   :  { %v2106_v11 = vadd.f32 %v2097_v51, %v5572_v37  ;;  %v2099_v28 = vpop.f32.mrb[25].mxu1 }
 0xb66   :  { %v2107_v19 = vadd.f32 %v2099_v28, %v5576_v13  ;;  %v2101_v33 = vpop.f32.mrb[26].mxu1 }
 0xb67   :  { %v2108_v30 = vadd.f32 %v2101_v33, %v5572_v37  ;;  %v2103_v6 = vpop.f32.mrb[27].mxu1  ;;  %v4334_v60 = vmul.f32 -1.442695, %v2106_v11 }
 0xb68   :  { %v2109_v32 = vadd.f32 %v2103_v6, %v5576_v13  ;;  %v4335_v25 = vmul.f32 -1.442695, %v2107_v19  ;;  %v4809_v40 = vpop.eup %4808 }
 0xb69   :  { %v4336_v63 = vmul.f32 -1.442695, %v2108_v30  ;;  %4812 = vpow2.f32 %v4334_v60  ;;  %v2232_v49 = vadd.f32 1.0, %v4809_v40 }
 0xb6a   :  { %v4337_v15 = vmul.f32 -1.442695, %v2109_v32  ;;  %4814 = vpow2.f32 %v4335_v25  ;;  %v4811_v35 = vpop.eup %4810 }
 0xb6b   :  { %4816 = vpow2.f32 %v4336_v63  ;;  %v2234_v12 = vadd.f32 1.0, %v4811_v35 }
 0xb6c   :  { %4818 = vpow2.f32 %v4337_v15 }
 0xb6d   :  { %4820 = vpow2.f32 %v4341_v61 }
 0xb6e   :  { %4822 = vpow2.f32 %v4343_v8 }
 0xb6f   :  { %4824 = vrcp.f32 %v2232_v49 }
 0xb70   :  { %4826 = vrcp.f32 %v2234_v12 }
 0xb73   :  { %v4813_v3 = vpop.eup %4812 }
 0xb74   :  { %v4815_v50 = vpop.eup %4814  ;;  %v2122_v27 = vadd.f32 1.0, %v4813_v3 }
 0xb75   :  { %v4817_v42 = vpop.eup %4816  ;;  %v2123_v41 = vadd.f32 1.0, %v4815_v50 }
 0xb76   :  { %v4819_v38 = vpop.eup %4818  ;;  %v2124_v44 = vadd.f32 1.0, %v4817_v42 }
 0xb77   :  { %4828 = vrcp.f32 %v2123_v41  ;;  %v2125_v4 = vadd.f32 1.0, %v4819_v38  ;;  %v4821_v43 = vpop.eup %4820 }
 0xb78   :  { %v4823_v45 = vpop.eup %4822  ;;  %v2231_v24 = vadd.f32 1.0, %v4821_v43 }
 0xb79   :  { %4830 = vrcp.f32 %v2125_v4  ;;  %v2233_v46 = vadd.f32 1.0, %v4823_v45  ;;  %v4825_v17 = vpop.eup %4824 }
 0xb7a   :  { %4832 = vrcp.f32 %v2122_v27  ;;  %v4827_v23 = vpop.eup %4826  ;;  %v2243_v53 = vmul.f32 2.0, %v4825_v17 }
 0xb7b   :  { %4834 = vrcp.f32 %v2124_v44  ;;  %v2244_v33 = vmul.f32 2.0, %v4827_v23 }
 0xb7c   :  { %4836 = vrcp.f32 %v2231_v24  ;;  %v4345_v60 = vadd.f32 -1.0, %v2243_v53 }
 0xb7d   :  { %4838 = vrcp.f32 %v2233_v46  ;;  %v4346_v15 = vadd.f32 -1.0, %v2244_v33 }
 0xb81   :  { %v4829_v36 = vpop.eup %4828 }
 0xb82   :  { %v2134_v51 = vmul.f32 2.0, %v4829_v36 }
 0xb83   :  { %v4831_v11 = vpop.eup %4830 }
 0xb84   :  { %v4338_v28 = vadd.f32 -1.0, %v2134_v51  ;;  %v2135_v19 = vmul.f32 2.0, %v4831_v11  ;;  %v4833_v30 = vpop.eup %4832 }
 0xb85   :  { %v4835_v25 = vpop.eup %4834  ;;  %v2138_v49 = vmul.f32 %v4833_v30, %v6251_v1 }
 0xb86   :  { %v2140_v6 = vmul.f32 %v4833_v30, %v4338_v28  ;;  %v4339_v32 = vadd.f32 -1.0, %v2135_v19  ;;  %v4837_v61 = vpop.eup %4836  ;;  %v2139_v50 = vmul.f32 %v4835_v25, %v6255_v56 }
 0xb87   :  { %v2249_v8 = vmul.f32 %v4837_v61, %v4345_v60  ;;  %v4839_v40 = vpop.eup %4838  ;;  %v2247_v38 = vmul.f32 %v4837_v61, %v6259_v7 }
 0xb88   :  { %2144 = vrot.lane.b32.xlu1 %v2140_v6, %s5188_s4  ;;  %v2141_v63 = vmul.f32 %v4835_v25, %v4339_v32  ;;  %v2250_v35 = vmul.f32 %v4839_v40, %v4346_v15  ;;  %v2248_v43 = vmul.f32 %v4839_v40, %v6263_v34 }
 0xb8a   :  { %2146 = vrot.lane.b32.xlu0 %v2141_v63, %s5188_s4 }
 0xb8c   :  { %2253 = vrot.lane.b32.xlu1 %v2249_v8, %s5188_s4 }
 0xb8e   :  { %2255 = vrot.lane.b32.xlu0 %v2250_v35, %s5188_s4 }
 0xbfa   :  { %v2145_v12 = vpop.permute.xlu1 %2144 }
 0xbfb   :  { %v6321_v3 = vadd.f32 %v2145_v12, %v2138_v49 }
 0xbfc   :  { %v2147_v42 = vpop.permute.xlu0 %2146 }
 0xbfd   :  { %4840 = vtanh.f32 %v6321_v3  ;;  %v6325_v41 = vadd.f32 %v2147_v42, %v2139_v50 }
 0xbfe   :  { %v2254_v27 = vpop.permute.xlu1 %2253 }
 0xbff   :  { %4842 = vtanh.f32 %v6325_v41  ;;  %v6329_v4 = vadd.f32 %v2254_v27, %v2247_v38 }
 0xc00   :  { %v2256_v1 = vpop.permute.xlu0 %2255 }
 0xc01   :  { %4844 = vtanh.f32 %v6329_v4  ;;  %v6333_v44 = vadd.f32 %v2256_v1, %v2248_v43 }
 0xc03   :  { %4846 = vtanh.f32 %v6333_v44 }
 0xc07   :  { %v4841_v56 = vpop.eup %4840 }
 0xc08   :  { %v6336_v24 = vmul.f32 %v4841_v56, %v4829_v36 }
 0xc09   :  { %v4843_v45 = vpop.eup %4842 }
 0xc0a   :  { %v6338_v46 = vmul.f32 %v4843_v45, %v4831_v11 }
 0xc0b   :  { %v4845_v7 = vpop.eup %4844 }
 0xc0c   :  { %v2266_v51 = vpack.c.bf16 %v6338_v46, %v6336_v24  ;;  %v2263_v34 = vmul.f32 %v4845_v7, %v4825_v17  ;;  %v7113_v17 = vld [vmem:[#allocation9_spill] sm:$0xff] }
 0xc0d   :  { %v4847_v53 = vpop.eup %4846 }
 0xc0e   :  { %2268 = vrot.lane.b32.xlu1 %v2266_v51, %s5188_s4  ;;  %v2264_v28 = vmul.f32 %v4847_v53, %v4827_v23  ;;  %v609_v23 = vadd.f32 %v7113_v17, %v5407_v55 }
 0xc10   :  { %v2265_v19 = vpack.c.bf16 %v2264_v28, %v2263_v34 }
 0xc12   :  { %2317 = vrot.lane.b32.xlu0 %v2265_v19, %s5188_s4 }
 0xc80   :  { %v2269_v33 = vpop.permute.xlu1 %2268 }
 0xc81   :  { %4347 = vmatmul.mubr.msk.bf16.vlgmr.msra.gmra.mrb[64].mxu0 %vm389_vm4, %v2269_v33 }
 0xc82   :  { %2323 = vmatpush1.bf16.msra.mxu0 %v6053_v62  ;;  %2354 = vmatprep.mubr.bf16.mxu0 %v7109_v58  ;;  %v6366_v62 = vld [vmem:[%s7064_s5] ss:$8 sps:$4 sm:$0xff]  }
 0xc83   :  { %2324 = vmatprep.subr.bf16.mxu0 %v6060_v21  ;;  %v6373_v21 = vld [vmem:[%s7064_s5 + $0x14] ss:$8 sps:$4 sm:$0xff]  }
 0xc84   :  { %v2318_v36 = vpop.permute.xlu0 %2317 }
 0xc85   :  { %4355 = vmatmul.mubr.msk.bf16.vlgmr.msra.gmra.mrb[28].mxu1 %vm389_vm4, %v2318_v36 }
 0xc86   :  { %2325 = vmatpush1.bf16.msra.mxu0 %v6066_v57  ;;  %2533 = vmatpush1.bf16.msra.mxu1 %v6104_v18  ;;  %v6381_v57 = vld [vmem:[%s7064_s5 + $0x10] ss:$8 sps:$4 sm:$0xff]  }
 0xc87   :  { %2326 = vmatprep.subr.bf16.mxu0 %v6072_v26  ;;  %2534 = vmatprep.subr.bf16.mxu1 %v6111_v22  ;;  %v6387_v26 = vld [vmem:[%s7064_s5 + $0x24] ss:$8 sps:$4 sm:$0xff]   ;;  %v7111_v22 = vld [vmem:[#allocation7_spill] sm:$0xff] }
 0xc88   :  { %2564 = vmatprep.mubr.bf16.mxu1 %v7109_v58 }
 0xc8a   :  { %2327 = vmatpush1.bf16.msra.mxu0 %v6078_v52  ;;  %2535 = vmatpush1.bf16.msra.mxu1 %v6120_v0  ;;  %v6393_v52 = vld [vmem:[%s7064_s5 + $0x20] ss:$8 sps:$4 sm:$0xff]   ;;  %v603_v0 = vadd.f32 %v7111_v22, %v5407_v55 }
 0xc8b   :  { %2328 = vmatprep.subr.bf16.mxu0 %v6084_v10  ;;  %2536 = vmatprep.subr.bf16.mxu1 %v6127_v31  ;;  %v6399_v10 = vld [vmem:[%s7064_s5 + $0x34] ss:$8 sps:$4 sm:$0xff]  }
 0xc8e   :  { %2329 = vmatpush1.bf16.msra.mxu0 %v6090_v47  ;;  %2537 = vmatpush1.bf16.msra.mxu1 %v6134_v16  ;;  %v6405_v47 = vld [vmem:[%s7064_s5 + $0x30] ss:$8 sps:$4 sm:$0xff]   ;;  %v7112_v16 = vld [vmem:[#allocation8_spill] sm:$0xff] }
 0xc8f   :  { %2690 = vmatprep.subr.bf16.mxu0 %v6096_v20  ;;  %2538 = vmatprep.subr.bf16.mxu1 %v6141_v59  ;;  %v7110_v20 = vld [vmem:[#allocation6_spill] sm:$0xff]  ;;  %v607_v59 = vadd.f32 %v7112_v16, %v5403_v54 }
 0xc90   :  { %v601_v18 = vadd.f32 %v7110_v20, %v5403_v54 }
 0xc91   :  { %4348 = vmatmul.mubr.msk.bf16.vlgmr.msra.gmra.mrb[64].mxu0 %vm389_vm4, %v2318_v36 }
 0xc92   :  { %2691 = vmatpush1.bf16.msra.mxu0 %v6366_v62  ;;  %2539 = vmatpush1.bf16.msra.mxu1 %v6148_v39 }
 0xc93   :  { %2692 = vmatprep.subr.bf16.mxu0 %v6373_v21  ;;  %2581 = vmatprep.subr.bf16.mxu1 %v6155_v48 }
 0xc94   :  { %2722 = vmatprep.mubr.bf16.mxu0 %v7109_v58 }
 0xc96   :  { %2693 = vmatpush1.bf16.msra.mxu0 %v6381_v57 }
 0xc97   :  { %2694 = vmatprep.subr.bf16.mxu0 %v6387_v26 }
 0xc9a   :  { %2695 = vmatpush1.bf16.msra.mxu0 %v6393_v52 }
 0xc9b   :  { %2696 = vmatprep.subr.bf16.mxu0 %v6399_v10 }
 0xc9e   :  { %2697 = vmatpush1.bf16.msra.mxu0 %v6405_v47 }
 0xc9f   :  { %2791 = vmatprep.subr.bf16.mxu0 %v6161_v29 }
 0xd58   :  { %v2465_v31 = vpop.f32.mrb[28].mxu1 }
 0xd59   :  { %v2474_v39 = vadd.f32 %v2465_v31, %v601_v18  ;;  %v2467_v48 = vpop.f32.mrb[29].mxu1 }
 0xd5a   :  { %v2475_v11 = vadd.f32 %v2467_v48, %v603_v0  ;;  %v2469_v30 = vpop.f32.mrb[30].mxu1 }
 0xd5b   :  { %v2476_v6 = vadd.f32 %v2469_v30, %v607_v59  ;;  %v2471_v32 = vpop.f32.mrb[31].mxu1  ;;  %v4356_v43 = vmul.f32 -1.442695, %v2474_v39 }
 0xd5c   :  { %v2477_v29 = vadd.f32 %v2471_v32, %v609_v23  ;;  %v4357_v60 = vmul.f32 -1.442695, %v2475_v11 }
 0xd5d   :  { %v4358_v1 = vmul.f32 -1.442695, %v2476_v6 }
 0xd5e   :  { %v4359_v63 = vmul.f32 -1.442695, %v2477_v29  ;;  %4848 = vpow2.f32 %v4357_v60 }
 0xd60   :  { %4850 = vpow2.f32 %v4359_v63 }
 0xd64   :  { %v2356_v25 = vpop.f32.mrb[64].mxu0 }
 0xd65   :  { %v2365_v15 = vadd.f32 %v2356_v25, %v5572_v37  ;;  %v2358_v61 = vpop.f32.mrb[65].mxu0 }
 0xd66   :  { %v2366_v8 = vadd.f32 %v2358_v61, %v5576_v13  ;;  %v2360_v40 = vpop.f32.mrb[66].mxu0 }
 0xd67   :  { %v2367_v35 = vadd.f32 %v2360_v40, %v5572_v37  ;;  %v2362_v49 = vpop.f32.mrb[67].mxu0  ;;  %v4349_v50 = vmul.f32 -1.442695, %v2365_v15 }
 0xd68   :  { %v2368_v12 = vadd.f32 %v2362_v49, %v5576_v13  ;;  %v4350_v42 = vmul.f32 -1.442695, %v2366_v8  ;;  %v4849_v56 = vpop.eup %4848 }
 0xd69   :  { %v4351_v38 = vmul.f32 -1.442695, %v2367_v35  ;;  %4852 = vpow2.f32 %v4349_v50  ;;  %v2491_v7 = vadd.f32 1.0, %v4849_v56 }
 0xd6a   :  { %v4352_v27 = vmul.f32 -1.442695, %v2368_v12  ;;  %4854 = vpow2.f32 %v4350_v42  ;;  %v4851_v45 = vpop.eup %4850 }
 0xd6b   :  { %4856 = vpow2.f32 %v4351_v38  ;;  %v2493_v51 = vadd.f32 1.0, %v4851_v45 }
 0xd6c   :  { %4858 = vpow2.f32 %v4352_v27 }
 0xd6d   :  { %4860 = vpow2.f32 %v4356_v43 }
 0xd6e   :  { %4862 = vpow2.f32 %v4358_v1 }
 0xd6f   :  { %4864 = vrcp.f32 %v2491_v7 }
 0xd70   :  { %4866 = vrcp.f32 %v2493_v51 }
 0xd73   :  { %v4853_v53 = vpop.eup %4852 }
 0xd74   :  { %v4855_v34 = vpop.eup %4854  ;;  %v2381_v36 = vadd.f32 1.0, %v4853_v53 }
 0xd75   :  { %v4857_v28 = vpop.eup %4856  ;;  %v2382_v19 = vadd.f32 1.0, %v4855_v34 }
 0xd76   :  { %v4859_v33 = vpop.eup %4858  ;;  %v2383_v22 = vadd.f32 1.0, %v4857_v28 }
 0xd77   :  { %4868 = vrcp.f32 %v2382_v19  ;;  %v2384_v20 = vadd.f32 1.0, %v4859_v33  ;;  %v4861_v18 = vpop.eup %4860 }
 0xd78   :  { %v4863_v0 = vpop.eup %4862  ;;  %v2490_v31 = vadd.f32 1.0, %v4861_v18 }
 0xd79   :  { %4870 = vrcp.f32 %v2384_v20  ;;  %v2492_v16 = vadd.f32 1.0, %v4863_v0  ;;  %v4865_v59 = vpop.eup %4864  ;;  %v6453_v0 = vld [vmem:[%s7067_s6] ss:$8 sps:$4 sm:$0xff]  }
 0xd7a   :  { %4872 = vrcp.f32 %v2381_v36  ;;  %v4867_v39 = vpop.eup %4866  ;;  %v2502_v23 = vmul.f32 2.0, %v4865_v59 }
 0xd7b   :  { %4874 = vrcp.f32 %v2383_v22  ;;  %v2503_v32 = vmul.f32 2.0, %v4867_v39 }
 0xd7c   :  { %4876 = vrcp.f32 %v2490_v31  ;;  %v4360_v63 = vadd.f32 -1.0, %v2502_v23  ;;  %v6460_v31 = vld [vmem:[%s7067_s6 + $0x14] ss:$8 sps:$4 sm:$0xff]   ;;  %v6492_v23 = vld [vmem:[%s7067_s6 + $0x20] ss:$8 sps:$4 sm:$0xff]  }
 0xd7d   :  { %4878 = vrcp.f32 %v2492_v16  ;;  %v4361_v8 = vadd.f32 -1.0, %v2503_v32  ;;  %v6516_v32 = vld [vmem:[%s7067_s6 + $0x30] ss:$8 sps:$4 sm:$0xff]  }
 0xd81   :  { %v4869_v48 = vpop.eup %4868 }
 0xd82   :  { %v2393_v17 = vmul.f32 2.0, %v4869_v48 }
 0xd83   :  { %v4871_v11 = vpop.eup %4870 }
 0xd84   :  { %v4353_v30 = vadd.f32 -1.0, %v2393_v17  ;;  %v2394_v6 = vmul.f32 2.0, %v4871_v11  ;;  %v4873_v29 = vpop.eup %4872  ;;  %v6485_v17 = vld [vmem:[%s7066_s7 + $0x14] ss:$8 sps:$4 sm:$0xff]  }
 0xd85   :  { %v4875_v15 = vpop.eup %4874  ;;  %v2397_v50 = vmul.f32 %v4873_v29, %v6321_v3 }
 0xd86   :  { %v2399_v60 = vmul.f32 %v4873_v29, %v4353_v30  ;;  %v4354_v25 = vadd.f32 -1.0, %v2394_v6  ;;  %v4877_v40 = vpop.eup %4876  ;;  %v2398_v27 = vmul.f32 %v4875_v15, %v6325_v41  ;;  %v6504_v30 = vld [vmem:[%s7067_s6 + $0x34] ss:$8 sps:$4 sm:$0xff]   ;;  %v6510_v6 = vld [vmem:[%s7066_s7 + $0x24] ss:$8 sps:$4 sm:$0xff]  }
 0xd87   :  { %v2508_v35 = vmul.f32 %v4877_v40, %v4360_v63  ;;  %v4879_v49 = vpop.eup %4878  ;;  %v2506_v56 = vmul.f32 %v4877_v40, %v6329_v4  ;;  %v6522_v29 = vld [vmem:[%s7066_s7 + $0x20] ss:$8 sps:$4 sm:$0xff]   ;;  %v6542_v63 = vld [vmem:[%s7066_s7 + $0x30] ss:$8 sps:$4 sm:$0xff]  }
 0xd88   :  { %2403 = vrot.lane.b32.xlu1 %v2399_v60, %s5188_s4  ;;  %v2400_v61 = vmul.f32 %v4875_v15, %v4354_v25  ;;  %v2509_v12 = vmul.f32 %v4879_v49, %v4361_v8  ;;  %v2507_v51 = vmul.f32 %v4879_v49, %v6333_v44  ;;  %v6528_v60 = vld [vmem:[%s7064_s5 + $0x4] ss:$8 sps:$4 sm:$0xff]   ;;  %v6534_v25 = vld [vmem:[%s7066_s7 + $0x34] ss:$8 sps:$4 sm:$0xff]  }
 0xd89   :  { %v6549_v15 = vld [vmem:[%s7067_s6 + $0x4] ss:$8 sps:$4 sm:$0xff]   ;;  %v7114_v8 = vld [vmem:[#allocation10_spill] sm:$0xff] }
 0xd8a   :  { %2405 = vrot.lane.b32.xlu0 %v2400_v61, %s5188_s4  ;;  %v6561_v61 = vld [vmem:[%s7066_s7 + $0x4] ss:$8 sps:$4 sm:$0xff]   ;;  %v613_v40 = vadd.f32 %v7114_v8, %v5403_v54 }
 0xd8c   :  { %2512 = vrot.lane.b32.xlu1 %v2508_v35, %s5188_s4  ;;  %v7115_v35 = vld [vmem:[#allocation11_spill] sm:$0xff] }
 0xd8d   :  { %v615_v49 = vadd.f32 %v7115_v35, %v5407_v55 }
 0xd8e   :  { %2514 = vrot.lane.b32.xlu0 %v2509_v12, %s5188_s4 }
 0xdfa   :  { %v2404_v42 = vpop.permute.xlu1 %2403 }
 0xdfb   :  { %v6426_v38 = vadd.f32 %v2404_v42, %v2397_v50  ;;  %v7116_v50 = vld [vmem:[#allocation12_spill] sm:$0xff] }
 0xdfc   :  { %v2406_v43 = vpop.permute.xlu0 %2405  ;;  %v619_v42 = vadd.f32 %v7116_v50, %v5403_v54 }
 0xdfd   :  { %4880 = vtanh.f32 %v6426_v38  ;;  %v6430_v1 = vadd.f32 %v2406_v43, %v2398_v27 }
 0xdfe   :  { %v2513_v45 = vpop.permute.xlu1 %2512 }
 0xdff   :  { %4882 = vtanh.f32 %v6430_v1  ;;  %v6434_v7 = vadd.f32 %v2513_v45, %v2506_v56  ;;  %v7117_v56 = vld [vmem:[#allocation13_spill] sm:$0xff] }
 0xe00   :  { %v2515_v3 = vpop.permute.xlu0 %2514  ;;  %v621_v45 = vadd.f32 %v7117_v56, %v5407_v55 }
 0xe01   :  { %4884 = vtanh.f32 %v6434_v7  ;;  %v6438_v53 = vadd.f32 %v2515_v3, %v2507_v51 }
 0xe03   :  { %4886 = vtanh.f32 %v6438_v53 }
 0xe07   :  { %v4881_v41 = vpop.eup %4880 }
 0xe08   :  { %v6441_v28 = vmul.f32 %v4881_v41, %v4869_v48  ;;  %v6479_v48 = vld [vmem:[%s7067_s6 + $0x24] ss:$8 sps:$4 sm:$0xff]  }
 0xe09   :  { %v4883_v34 = vpop.eup %4882 }
 0xe0a   :  { %v6443_v19 = vmul.f32 %v4883_v34, %v4871_v11  ;;  %v6498_v11 = vld [vmem:[%s7066_s7 + $0x10] ss:$8 sps:$4 sm:$0xff]  }
 0xe0b   :  { %v4885_v4 = vpop.eup %4884 }
 0xe0c   :  { %v2525_v33 = vpack.c.bf16 %v6443_v19, %v6441_v28  ;;  %v2522_v44 = vmul.f32 %v4885_v4, %v4865_v59  ;;  %v6467_v59 = vld [vmem:[%s7067_s6 + $0x10] ss:$8 sps:$4 sm:$0xff]  }
 0xe0d   :  { %v4887_v36 = vpop.eup %4886 }
 0xe0e   :  { %2527 = vrot.lane.b32.xlu1 %v2525_v33, %s5188_s4  ;;  %v2523_v20 = vmul.f32 %v4887_v36, %v4867_v39  ;;  %v6473_v39 = vld [vmem:[%s7066_s7] ss:$8 sps:$4 sm:$0xff]  }
 0xe10   :  { %v2524_v18 = vpack.c.bf16 %v2523_v20, %v2522_v44 }
 0xe12   :  { %2576 = vrot.lane.b32.xlu0 %v2524_v18, %s5188_s4 }
 0xe80   :  { %v2528_v22 = vpop.permute.xlu1 %2527 }
 0xe81   :  { %4362 = vmatmul.mubr.msk.bf16.vlgmr.msra.gmra.mrb[32].mxu1 %vm389_vm4, %v2528_v22 }
 0xe82   :  { %2582 = vmatpush1.bf16.msra.mxu1 %v6453_v0  ;;  %2613 = vmatprep.mubr.bf16.mxu1 %v7109_v58 }
 0xe83   :  { %2583 = vmatprep.subr.bf16.mxu1 %v6460_v31 }
 0xe84   :  { %v2577_v16 = vpop.permute.xlu0 %2576 }
 0xe85   :  { %4370 = vmatmul.mubr.msk.bf16.vlgmr.msra.gmra.mrb[68].mxu0 %vm389_vm4, %v2577_v16 }
 0xe86   :  { %2584 = vmatpush1.bf16.msra.mxu1 %v6467_v59  ;;  %2792 = vmatpush1.bf16.msra.mxu0 %v6473_v39 }
 0xe87   :  { %2585 = vmatprep.subr.bf16.mxu1 %v6479_v48  ;;  %2793 = vmatprep.subr.bf16.mxu0 %v6485_v17 }
 0xe88   :  { %2823 = vmatprep.mubr.bf16.mxu0 %v7109_v58 }
 0xe8a   :  { %2586 = vmatpush1.bf16.msra.mxu1 %v6492_v23  ;;  %2794 = vmatpush1.bf16.msra.mxu0 %v6498_v11 }
 0xe8b   :  { %2587 = vmatprep.subr.bf16.mxu1 %v6504_v30  ;;  %2795 = vmatprep.subr.bf16.mxu0 %v6510_v6 }
 0xe8e   :  { %2588 = vmatpush1.bf16.msra.mxu1 %v6516_v32  ;;  %2796 = vmatpush1.bf16.msra.mxu0 %v6522_v29 }
 0xe8f   :  { %2949 = vmatprep.subr.bf16.mxu1 %v6528_v60  ;;  %2797 = vmatprep.subr.bf16.mxu0 %v6534_v25 }
 0xe91   :  { %4363 = vmatmul.mubr.msk.bf16.vlgmr.msra.gmra.mrb[32].mxu1 %vm389_vm4, %v2577_v16 }
 0xe92   :  { %2950 = vmatpush1.bf16.msra.mxu1 %v6366_v62  ;;  %2798 = vmatpush1.bf16.msra.mxu0 %v6542_v63 }
 0xe93   :  { %2951 = vmatprep.subr.bf16.mxu1 %v6373_v21  ;;  %2840 = vmatprep.subr.bf16.mxu0 %v6549_v15 }
 0xe94   :  { %2981 = vmatprep.mubr.bf16.mxu1 %v7109_v58 }
 0xe96   :  { %2952 = vmatpush1.bf16.msra.mxu1 %v6381_v57 }
 0xe97   :  { %2953 = vmatprep.subr.bf16.mxu1 %v6387_v26 }
 0xe9a   :  { %2954 = vmatpush1.bf16.msra.mxu1 %v6393_v52 }
 0xe9b   :  { %2955 = vmatprep.subr.bf16.mxu1 %v6399_v10 }
 0xe9e   :  { %2956 = vmatpush1.bf16.msra.mxu1 %v6405_v47 }
 0xe9f   :  { %3050 = vmatprep.subr.bf16.mxu1 %v6561_v61 }
 0xf58   :  { %v2724_v12 = vpop.f32.mrb[68].mxu0 }
 0xf59   :  { %v2733_v27 = vadd.f32 %v2724_v12, %v613_v40  ;;  %v2726_v43 = vpop.f32.mrb[69].mxu0 }
 0xf5a   :  { %v2734_v51 = vadd.f32 %v2726_v43, %v615_v49  ;;  %v2728_v3 = vpop.f32.mrb[70].mxu0 }
 0xf5b   :  { %v2735_v41 = vadd.f32 %v2728_v3, %v619_v42  ;;  %v2730_v34 = vpop.f32.mrb[71].mxu0  ;;  %v4371_v43 = vmul.f32 -1.442695, %v2733_v27 }
 0xf5c   :  { %v2736_v4 = vadd.f32 %v2730_v34, %v621_v45  ;;  %v4372_v33 = vmul.f32 -1.442695, %v2734_v51 }
 0xf5d   :  { %v4373_v56 = vmul.f32 -1.442695, %v2735_v41 }
 0xf5e   :  { %v4374_v44 = vmul.f32 -1.442695, %v2736_v4  ;;  %4888 = vpow2.f32 %v4372_v33 }
 0xf60   :  { %4890 = vpow2.f32 %v4374_v44 }
 0xf64   :  { %v2615_v36 = vpop.f32.mrb[32].mxu1 }
 0xf65   :  { %v2624_v20 = vadd.f32 %v2615_v36, %v5572_v37  ;;  %v2617_v18 = vpop.f32.mrb[33].mxu1 }
 0xf66   :  { %v2625_v22 = vadd.f32 %v2617_v18, %v5576_v13  ;;  %v2619_v16 = vpop.f32.mrb[34].mxu1 }
 0xf67   :  { %v2626_v8 = vadd.f32 %v2619_v16, %v5572_v37  ;;  %v2621_v40 = vpop.f32.mrb[35].mxu1  ;;  %v4364_v49 = vmul.f32 -1.442695, %v2624_v20 }
 0xf68   :  { %v2627_v35 = vadd.f32 %v2621_v40, %v5576_v13  ;;  %v4365_v12 = vmul.f32 -1.442695, %v2625_v22  ;;  %v4889_v45 = vpop.eup %4888 }
 0xf69   :  { %v4366_v50 = vmul.f32 -1.442695, %v2626_v8  ;;  %4892 = vpow2.f32 %v4364_v49  ;;  %v2750_v3 = vadd.f32 1.0, %v4889_v45 }
 0xf6a   :  { %v4367_v42 = vmul.f32 -1.442695, %v2627_v35  ;;  %4894 = vpow2.f32 %v4365_v12  ;;  %v4891_v51 = vpop.eup %4890 }
 0xf6b   :  { %4896 = vpow2.f32 %v4366_v50  ;;  %v2752_v34 = vadd.f32 1.0, %v4891_v51 }
 0xf6c   :  { %4898 = vpow2.f32 %v4367_v42 }
 0xf6d   :  { %4900 = vpow2.f32 %v4371_v43 }
 0xf6e   :  { %4902 = vpow2.f32 %v4373_v56 }
 0xf6f   :  { %4904 = vrcp.f32 %v2750_v3 }
 0xf70   :  { %4906 = vrcp.f32 %v2752_v34 }
 0xf73   :  { %v4893_v4 = vpop.eup %4892 }
 0xf74   :  { %v4895_v33 = vpop.eup %4894  ;;  %v2640_v18 = vadd.f32 1.0, %v4893_v4 }
 0xf75   :  { %v4897_v36 = vpop.eup %4896  ;;  %v2641_v44 = vadd.f32 1.0, %v4895_v33 }
 0xf76   :  { %v4899_v20 = vpop.eup %4898  ;;  %v2642_v16 = vadd.f32 1.0, %v4897_v36 }
 0xf77   :  { %4908 = vrcp.f32 %v2641_v44  ;;  %v2643_v27 = vadd.f32 1.0, %v4899_v20  ;;  %v4901_v22 = vpop.eup %4900 }
 0xf78   :  { %v4903_v41 = vpop.eup %4902  ;;  %v2749_v8 = vadd.f32 1.0, %v4901_v22 }
 0xf79   :  { %4910 = vrcp.f32 %v2643_v27  ;;  %v2751_v40 = vadd.f32 1.0, %v4903_v41  ;;  %v4905_v35 = vpop.eup %4904 }
 0xf7a   :  { %4912 = vrcp.f32 %v2640_v18  ;;  %v4907_v49 = vpop.eup %4906  ;;  %v2761_v42 = vmul.f32 2.0, %v4905_v35 }
 0xf7b   :  { %4914 = vrcp.f32 %v2642_v16  ;;  %v2762_v51 = vmul.f32 2.0, %v4907_v49 }
 0xf7c   :  { %4916 = vrcp.f32 %v2749_v8  ;;  %v4375_v33 = vadd.f32 -1.0, %v2761_v42 }
 0xf7d   :  { %4918 = vrcp.f32 %v2751_v40  ;;  %v4376_v20 = vadd.f32 -1.0, %v2762_v51 }
 0xf81   :  { %v4909_v12 = vpop.eup %4908 }
 0xf82   :  { %v2652_v50 = vmul.f32 2.0, %v4909_v12 }
 0xf83   :  { %v4911_v43 = vpop.eup %4910 }
 0xf84   :  { %v4368_v56 = vadd.f32 -1.0, %v2652_v50  ;;  %v2653_v45 = vmul.f32 2.0, %v4911_v43  ;;  %v4913_v3 = vpop.eup %4912 }
 0xf85   :  { %v4915_v36 = vpop.eup %4914  ;;  %v2656_v41 = vmul.f32 %v4913_v3, %v6426_v38 }
 0xf86   :  { %v2658_v34 = vmul.f32 %v4913_v3, %v4368_v56  ;;  %v4369_v4 = vadd.f32 -1.0, %v2653_v45  ;;  %v4917_v18 = vpop.eup %4916  ;;  %v2657_v50 = vmul.f32 %v4915_v36, %v6430_v1 }
 0xf87   :  { %v2767_v27 = vmul.f32 %v4917_v18, %v4375_v33  ;;  %v4919_v22 = vpop.eup %4918  ;;  %v2765_v45 = vmul.f32 %v4917_v18, %v6434_v7 }
 0xf88   :  { %2662 = vrot.lane.b32.xlu1 %v2658_v34, %s5188_s4  ;;  %v2659_v44 = vmul.f32 %v4915_v36, %v4369_v4  ;;  %v2768_v16 = vmul.f32 %v4919_v22, %v4376_v20  ;;  %v2766_v4 = vmul.f32 %v4919_v22, %v6438_v53 }
 0xf8a   :  { %2664 = vrot.lane.b32.xlu0 %v2659_v44, %s5188_s4 }
 0xf8c   :  { %2771 = vrot.lane.b32.xlu1 %v2767_v27, %s5188_s4 }
 0xf8e   :  { %2773 = vrot.lane.b32.xlu0 %v2768_v16, %s5188_s4 }
 0xffa   :  { %v2663_v8 = vpop.permute.xlu1 %2662 }
 0xffb   :  { %v6581_v40 = vadd.f32 %v2663_v8, %v2656_v41 }
 0xffc   :  { %v2665_v42 = vpop.permute.xlu0 %2664 }
 0xffd   :  { %4920 = vtanh.f32 %v6581_v40  ;;  %v6585_v56 = vadd.f32 %v2665_v42, %v2657_v50  ;;  %v7120_v50 = vld [vmem:[#allocation16_spill] sm:$0xff] }
 0xffe   :  { %v2772_v51 = vpop.permute.xlu1 %2771  ;;  %v631_v42 = vadd.f32 %v7120_v50, %v5403_v54 }
 0xfff   :  { %4922 = vtanh.f32 %v6585_v56  ;;  %v6589_v34 = vadd.f32 %v2772_v51, %v2765_v45 }
0x1000   :  { %v2774_v38 = vpop.permute.xlu0 %2773 }
0x1001   :  { %4924 = vtanh.f32 %v6589_v34  ;;  %v6593_v3 = vadd.f32 %v2774_v38, %v2766_v4  ;;  %v7121_v4 = vld [vmem:[#allocation17_spill] sm:$0xff] }
0x1002   :  { %v633_v38 = vadd.f32 %v7121_v4, %v5407_v55 }
0x1003   :  { %4926 = vtanh.f32 %v6593_v3 }
0x1007   :  { %v4921_v1 = vpop.eup %4920 }
0x1008   :  { %v6596_v36 = vmul.f32 %v4921_v1, %v4909_v12 }
0x1009   :  { %v4923_v33 = vpop.eup %4922 }
0x100a   :  { %v6598_v44 = vmul.f32 %v4923_v33, %v4911_v43  ;;  %v7119_v43 = vld [vmem:[#allocation15_spill] sm:$0xff] }
0x100b   :  { %v4925_v7 = vpop.eup %4924  ;;  %v627_v41 = vadd.f32 %v7119_v43, %v5407_v55 }
0x100c   :  { %v2784_v20 = vpack.c.bf16 %v6598_v44, %v6596_v36  ;;  %v2781_v53 = vmul.f32 %v4925_v7, %v4905_v35  ;;  %v7118_v35 = vld [vmem:[#allocation14_spill] sm:$0xff] }
0x100d   :  { %v4927_v18 = vpop.eup %4926 }
0x100e   :  { %2786 = vrot.lane.b32.xlu1 %v2784_v20, %s5188_s4  ;;  %v2782_v27 = vmul.f32 %v4927_v18, %v4907_v49  ;;  %v625_v49 = vadd.f32 %v7118_v35, %v5403_v54 }
0x1010   :  { %v2783_v22 = vpack.c.bf16 %v2782_v27, %v2781_v53 }
0x1012   :  { %2835 = vrot.lane.b32.xlu0 %v2783_v22, %s5188_s4 }
0x1080   :  { %v2787_v16 = vpop.permute.xlu1 %2786 }
0x1081   :  { %4377 = vmatmul.mubr.msk.bf16.vlgmr.msra.gmra.mrb[72].mxu0 %vm389_vm4, %v2787_v16 }
0x1082   :  { %2841 = vmatpush1.bf16.msra.mxu0 %v6453_v0  ;;  %2872 = vmatprep.mubr.bf16.mxu0 %v7109_v58 }
0x1083   :  { %2842 = vmatprep.subr.bf16.mxu0 %v6460_v31 }
0x1084   :  { %v2836_v12 = vpop.permute.xlu0 %2835 }
0x1085   :  { %4385 = vmatmul.mubr.msk.bf16.vlgmr.msra.gmra.mrb[36].mxu1 %vm389_vm4, %v2836_v12 }
0x1086   :  { %2843 = vmatpush1.bf16.msra.mxu0 %v6467_v59  ;;  %3051 = vmatpush1.bf16.msra.mxu1 %v6473_v39 }
0x1087   :  { %2844 = vmatprep.subr.bf16.mxu0 %v6479_v48  ;;  %3052 = vmatprep.subr.bf16.mxu1 %v6485_v17 }
0x1088   :  { %3082 = vmatprep.mubr.bf16.mxu1 %v7109_v58 }
0x108a   :  { %2845 = vmatpush1.bf16.msra.mxu0 %v6492_v23  ;;  %3053 = vmatpush1.bf16.msra.mxu1 %v6498_v11 }
0x108b   :  { %2846 = vmatprep.subr.bf16.mxu0 %v6504_v30  ;;  %3054 = vmatprep.subr.bf16.mxu1 %v6510_v6 }
0x108e   :  { %2847 = vmatpush1.bf16.msra.mxu0 %v6516_v32  ;;  %3055 = vmatpush1.bf16.msra.mxu1 %v6522_v29 }
0x108f   :  { %3208 = vmatprep.subr.bf16.mxu0 %v6528_v60  ;;  %3056 = vmatprep.subr.bf16.mxu1 %v6534_v25 }
0x1091   :  { %4378 = vmatmul.mubr.msk.bf16.vlgmr.msra.gmra.mrb[72].mxu0 %vm389_vm4, %v2836_v12 }
0x1092   :  { %3209 = vmatpush1.bf16.msra.mxu0 %v6366_v62  ;;  %3057 = vmatpush1.bf16.msra.mxu1 %v6542_v63 }
0x1093   :  { %3210 = vmatprep.subr.bf16.mxu0 %v6373_v21  ;;  %3099 = vmatprep.subr.bf16.mxu1 %v6549_v15 }
0x1094   :  { %3240 = vmatprep.mubr.bf16.mxu0 %v7109_v58 }
0x1096   :  { %3211 = vmatpush1.bf16.msra.mxu0 %v6381_v57 }
0x1097   :  { %3212 = vmatprep.subr.bf16.mxu0 %v6387_v26 }
0x109a   :  { %3213 = vmatpush1.bf16.msra.mxu0 %v6393_v52 }
0x109b   :  { %3214 = vmatprep.subr.bf16.mxu0 %v6399_v10 }
0x109e   :  { %3215 = vmatpush1.bf16.msra.mxu0 %v6405_v47 }
0x109f   :  { %3309 = vmatprep.subr.bf16.mxu0 %v6561_v61 }
0x1158   :  { %v2983_v8 = vpop.f32.mrb[36].mxu1 }
0x1159   :  { %v2992_v45 = vadd.f32 %v2983_v8, %v625_v49  ;;  %v2985_v51 = vpop.f32.mrb[37].mxu1 }
0x115a   :  { %v2993_v1 = vadd.f32 %v2985_v51, %v627_v41  ;;  %v2987_v33 = vpop.f32.mrb[38].mxu1 }
0x115b   :  { %v2994_v7 = vadd.f32 %v2987_v33, %v631_v42  ;;  %v2989_v20 = vpop.f32.mrb[39].mxu1 }
0x115c   :  { %v2995_v18 = vadd.f32 %v2989_v20, %v633_v38  ;;  %v4387_v53 = vmul.f32 -1.442695, %v2993_v1  ;;  %v4386_v38 = vmul.f32 -1.442695, %v2992_v45 }
0x115d   :  { %v4388_v1 = vmul.f32 -1.442695, %v2994_v7 }
0x115e   :  { %v4389_v22 = vmul.f32 -1.442695, %v2995_v18  ;;  %4928 = vpow2.f32 %v4387_v53 }
0x1160   :  { %4930 = vpow2.f32 %v4389_v22 }
0x1164   :  { %v2874_v27 = vpop.f32.mrb[72].mxu0 }
0x1165   :  { %v2883_v16 = vadd.f32 %v2874_v27, %v5572_v37  ;;  %v2876_v12 = vpop.f32.mrb[73].mxu0 }
0x1166   :  { %v2884_v35 = vadd.f32 %v2876_v12, %v5576_v13  ;;  %v2878_v43 = vpop.f32.mrb[74].mxu0 }
0x1167   :  { %v2885_v49 = vadd.f32 %v2878_v43, %v5572_v37  ;;  %v2880_v8 = vpop.f32.mrb[75].mxu0  ;;  %v4379_v41 = vmul.f32 -1.442695, %v2883_v16 }
0x1168   :  { %v2886_v50 = vadd.f32 %v2880_v8, %v5576_v13  ;;  %v4380_v42 = vmul.f32 -1.442695, %v2884_v35  ;;  %v4929_v33 = vpop.eup %4928 }
0x1169   :  { %v4381_v51 = vmul.f32 -1.442695, %v2885_v49  ;;  %4932 = vpow2.f32 %v4379_v41  ;;  %v3009_v18 = vadd.f32 1.0, %v4929_v33 }
0x116a   :  { %v4382_v4 = vmul.f32 -1.442695, %v2886_v50  ;;  %4934 = vpow2.f32 %v4380_v42  ;;  %v4931_v20 = vpop.eup %4930 }
0x116b   :  { %4936 = vpow2.f32 %v4381_v51  ;;  %v3011_v27 = vadd.f32 1.0, %v4931_v20 }
0x116c   :  { %4938 = vpow2.f32 %v4382_v4 }
0x116d   :  { %4940 = vpow2.f32 %v4386_v38 }
0x116e   :  { %4942 = vpow2.f32 %v4388_v1 }
0x116f   :  { %4944 = vrcp.f32 %v3009_v18 }
0x1170   :  { %4946 = vrcp.f32 %v3011_v27 }
0x1173   :  { %v4933_v53 = vpop.eup %4932 }
0x1174   :  { %v4935_v12 = vpop.eup %4934  ;;  %v2899_v35 = vadd.f32 1.0, %v4933_v53 }
0x1175   :  { %v4937_v43 = vpop.eup %4936  ;;  %v2900_v22 = vadd.f32 1.0, %v4935_v12 }
0x1176   :  { %v4939_v16 = vpop.eup %4938  ;;  %v2901_v8 = vadd.f32 1.0, %v4937_v43 }
0x1177   :  { %4948 = vrcp.f32 %v2900_v22  ;;  %v2902_v45 = vadd.f32 1.0, %v4939_v16  ;;  %v4941_v49 = vpop.eup %4940 }
0x1178   :  { %v4943_v7 = vpop.eup %4942  ;;  %v3008_v50 = vadd.f32 1.0, %v4941_v49 }
0x1179   :  { %4950 = vrcp.f32 %v2902_v45  ;;  %v3010_v41 = vadd.f32 1.0, %v4943_v7  ;;  %v4945_v42 = vpop.eup %4944 }
0x117a   :  { %4952 = vrcp.f32 %v2899_v35  ;;  %v4947_v51 = vpop.eup %4946  ;;  %v3020_v1 = vmul.f32 2.0, %v4945_v42 }
0x117b   :  { %4954 = vrcp.f32 %v2901_v8  ;;  %v3021_v27 = vmul.f32 2.0, %v4947_v51 }
0x117c   :  { %4956 = vrcp.f32 %v3008_v50  ;;  %v4390_v22 = vadd.f32 -1.0, %v3020_v1 }
0x117d   :  { %4958 = vrcp.f32 %v3010_v41  ;;  %v4391_v45 = vadd.f32 -1.0, %v3021_v27 }
0x1181   :  { %v4949_v4 = vpop.eup %4948 }
0x1182   :  { %v2911_v38 = vmul.f32 2.0, %v4949_v4 }
0x1183   :  { %v4951_v33 = vpop.eup %4950 }
0x1184   :  { %v4383_v20 = vadd.f32 -1.0, %v2911_v38  ;;  %v2912_v18 = vmul.f32 2.0, %v4951_v33  ;;  %v4953_v53 = vpop.eup %4952 }
0x1185   :  { %v4955_v16 = vpop.eup %4954  ;;  %v2915_v41 = vmul.f32 %v4953_v53, %v6581_v40 }
0x1186   :  { %v2917_v12 = vmul.f32 %v4953_v53, %v4383_v20  ;;  %v4384_v43 = vadd.f32 -1.0, %v2912_v18  ;;  %v4957_v49 = vpop.eup %4956  ;;  %v2916_v1 = vmul.f32 %v4955_v16, %v6585_v56 }
0x1187   :  { %v3026_v8 = vmul.f32 %v4957_v49, %v4390_v22  ;;  %v4959_v7 = vpop.eup %4958 }
0x1188   :  { %2921 = vrot.lane.b32.xlu1 %v2917_v12, %s5188_s4  ;;  %v2918_v35 = vmul.f32 %v4955_v16, %v4384_v43  ;;  %v3027_v50 = vmul.f32 %v4959_v7, %v4391_v45  ;;  %v3024_v12 = vmul.f32 %v4957_v49, %v6589_v34 }
0x118a   :  { %2923 = vrot.lane.b32.xlu0 %v2918_v35, %s5188_s4  ;;  %v3025_v35 = vmul.f32 %v4959_v7, %v6593_v3 }
0x118c   :  { %3030 = vrot.lane.b32.xlu1 %v3026_v8, %s5188_s4 }
0x118e   :  { %3032 = vrot.lane.b32.xlu0 %v3027_v50, %s5188_s4 }
0x11fa   :  { %v2922_v38 = vpop.permute.xlu1 %2921 }
0x11fb   :  { %v6651_v20 = vadd.f32 %v2922_v38, %v2915_v41 }
0x11fc   :  { %v2924_v18 = vpop.permute.xlu0 %2923 }
0x11fd   :  { %4960 = vtanh.f32 %v6651_v20  ;;  %v6655_v27 = vadd.f32 %v2924_v18, %v2916_v1  ;;  %v7124_v1 = vld [vmem:[#allocation20_spill] sm:$0xff] }
0x11fe   :  { %v3031_v43 = vpop.permute.xlu1 %3030 }
0x11ff   :  { %4962 = vtanh.f32 %v6655_v27  ;;  %v6659_v22 = vadd.f32 %v3031_v43, %v3024_v12 }
0x1200   :  { %v3033_v40 = vpop.permute.xlu0 %3032 }
0x1201   :  { %4964 = vtanh.f32 %v6659_v22  ;;  %v6663_v53 = vadd.f32 %v3033_v40, %v3025_v35 }
0x1203   :  { %4966 = vtanh.f32 %v6663_v53 }
0x1207   :  { %v4961_v56 = vpop.eup %4960 }
0x1208   :  { %v6666_v45 = vmul.f32 %v4961_v56, %v4949_v4 }
0x1209   :  { %v4963_v16 = vpop.eup %4962 }
0x120a   :  { %v6668_v8 = vmul.f32 %v4963_v16, %v4951_v33 }
0x120b   :  { %v4965_v34 = vpop.eup %4964 }
0x120c   :  { %v3043_v49 = vpack.c.bf16 %v6668_v8, %v6666_v45  ;;  %v3040_v3 = vmul.f32 %v4965_v34, %v4945_v42 }
0x120d   :  { %v4967_v50 = vpop.eup %4966 }
0x120e   :  { %3045 = vrot.lane.b32.xlu1 %v3043_v49, %s5188_s4  ;;  %v3041_v7 = vmul.f32 %v4967_v50, %v4947_v51 }
0x1210   :  { %v3042_v41 = vpack.c.bf16 %v3041_v7, %v3040_v3 }
0x1212   :  { %3094 = vrot.lane.b32.xlu0 %v3042_v41, %s5188_s4 }
0x1280   :  { %v3046_v38 = vpop.permute.xlu1 %3045 }
0x1281   :  { %4392 = vmatmul.mubr.msk.bf16.vlgmr.msra.gmra.mrb[40].mxu1 %vm389_vm4, %v3046_v38 }
0x1282   :  { %3100 = vmatpush1.bf16.msra.mxu1 %v6453_v0  ;;  %3131 = vmatprep.mubr.bf16.mxu1 %v7109_v58 }
0x1283   :  { %3101 = vmatprep.subr.bf16.mxu1 %v6460_v31 }
0x1284   :  { %v3095_v4 = vpop.permute.xlu0 %3094 }
0x1285   :  { %4400 = vmatmul.mubr.msk.bf16.vlgmr.msra.gmra.mrb[76].mxu0 %vm389_vm4, %v3095_v4 }
0x1286   :  { %3102 = vmatpush1.bf16.msra.mxu1 %v6467_v59  ;;  %3310 = vmatpush1.bf16.msra.mxu0 %v6473_v39 }
0x1287   :  { %3103 = vmatprep.subr.bf16.mxu1 %v6479_v48  ;;  %3311 = vmatprep.subr.bf16.mxu0 %v6485_v17 }
0x1288   :  { %3341 = vmatprep.mubr.bf16.mxu0 %v7109_v58 }
0x128a   :  { %3104 = vmatpush1.bf16.msra.mxu1 %v6492_v23  ;;  %3312 = vmatpush1.bf16.msra.mxu0 %v6498_v11 }
0x128b   :  { %3105 = vmatprep.subr.bf16.mxu1 %v6504_v30  ;;  %3313 = vmatprep.subr.bf16.mxu0 %v6510_v6 }
0x128e   :  { %3106 = vmatpush1.bf16.msra.mxu1 %v6516_v32  ;;  %3314 = vmatpush1.bf16.msra.mxu0 %v6522_v29 }
0x128f   :  { %3467 = vmatprep.subr.bf16.mxu1 %v6528_v60  ;;  %3315 = vmatprep.subr.bf16.mxu0 %v6534_v25 }
0x1291   :  { %4393 = vmatmul.mubr.msk.bf16.vlgmr.msra.gmra.mrb[40].mxu1 %vm389_vm4, %v3095_v4 }
0x1292   :  { %3468 = vmatpush1.bf16.msra.mxu1 %v6366_v62  ;;  %3316 = vmatpush1.bf16.msra.mxu0 %v6542_v63  ;;  %v7122_v62 = vld [vmem:[#allocation18_spill] sm:$0xff] }
0x1293   :  { %3469 = vmatprep.subr.bf16.mxu1 %v6373_v21  ;;  %3358 = vmatprep.subr.bf16.mxu0 %v6549_v15  ;;  %v637_v42 = vadd.f32 %v7122_v62, %v5403_v54  ;;  %v7123_v21 = vld [vmem:[#allocation19_spill] sm:$0xff] }
0x1294   :  { %3499 = vmatprep.mubr.bf16.mxu1 %v7109_v58  ;;  %v639_v51 = vadd.f32 %v7123_v21, %v5407_v55 }
0x1296   :  { %3470 = vmatpush1.bf16.msra.mxu1 %v6381_v57  ;;  %v643_v57 = vadd.f32 %v7124_v1, %v5403_v54 }
0x1297   :  { %3471 = vmatprep.subr.bf16.mxu1 %v6387_v26 }
0x129a   :  { %3472 = vmatpush1.bf16.msra.mxu1 %v6393_v52  ;;  %v7125_v52 = vld [vmem:[#allocation21_spill] sm:$0xff] }
0x129b   :  { %3473 = vmatprep.subr.bf16.mxu1 %v6399_v10  ;;  %v645_v12 = vadd.f32 %v7125_v52, %v5407_v55 }
0x129e   :  { %3474 = vmatpush1.bf16.msra.mxu1 %v6405_v47 }
0x129f   :  { %3568 = vmatprep.subr.bf16.mxu1 %v6561_v61 }
0x1358   :  { %v3242_v33 = vpop.f32.mrb[76].mxu0 }
0x1359   :  { %v3251_v18 = vadd.f32 %v3242_v33, %v637_v42  ;;  %v3244_v26 = vpop.f32.mrb[77].mxu0 }
0x135a   :  { %v3252_v10 = vadd.f32 %v3244_v26, %v639_v51  ;;  %v3246_v43 = vpop.f32.mrb[78].mxu0 }
0x135b   :  { %v3253_v47 = vadd.f32 %v3246_v43, %v643_v57  ;;  %v3248_v35 = vpop.f32.mrb[79].mxu0  ;;  %v4401_v33 = vmul.f32 -1.442695, %v3251_v18 }
0x135c   :  { %v3254_v40 = vadd.f32 %v3248_v35, %v645_v12  ;;  %v4402_v56 = vmul.f32 -1.442695, %v3252_v10 }
0x135d   :  { %v4403_v1 = vmul.f32 -1.442695, %v3253_v47 }
0x135e   :  { %v4404_v34 = vmul.f32 -1.442695, %v3254_v40  ;;  %4968 = vpow2.f32 %v4402_v56 }
0x1360   :  { %4970 = vpow2.f32 %v4404_v34 }
0x1364   :  { %v3133_v16 = vpop.f32.mrb[40].mxu1 }
0x1365   :  { %v3142_v49 = vadd.f32 %v3133_v16, %v5572_v37  ;;  %v3135_v50 = vpop.f32.mrb[41].mxu1 }
0x1366   :  { %v3143_v3 = vadd.f32 %v3135_v50, %v5576_v13  ;;  %v3137_v7 = vpop.f32.mrb[42].mxu1 }
0x1367   :  { %v3144_v41 = vadd.f32 %v3137_v7, %v5572_v37  ;;  %v3139_v38 = vpop.f32.mrb[43].mxu1  ;;  %v4394_v62 = vmul.f32 -1.442695, %v3142_v49 }
0x1368   :  { %v3145_v4 = vadd.f32 %v3139_v38, %v5576_v13  ;;  %v4395_v42 = vmul.f32 -1.442695, %v3143_v3  ;;  %v4969_v57 = vpop.eup %4968 }
0x1369   :  { %v4396_v21 = vmul.f32 -1.442695, %v3144_v41  ;;  %4972 = vpow2.f32 %v4394_v62  ;;  %v3268_v52 = vadd.f32 1.0, %v4969_v57 }
0x136a   :  { %v4397_v51 = vmul.f32 -1.442695, %v3145_v4  ;;  %4974 = vpow2.f32 %v4395_v42  ;;  %v4971_v26 = vpop.eup %4970 }
0x136b   :  { %4976 = vpow2.f32 %v4396_v21  ;;  %v3270_v12 = vadd.f32 1.0, %v4971_v26 }
0x136c   :  { %4978 = vpow2.f32 %v4397_v51 }
0x136d   :  { %4980 = vpow2.f32 %v4401_v33 }
0x136e   :  { %4982 = vpow2.f32 %v4403_v1 }
0x136f   :  { %4984 = vrcp.f32 %v3268_v52 }
0x1370   :  { %4986 = vrcp.f32 %v3270_v12 }
0x1373   :  { %v4973_v10 = vpop.eup %4972 }
0x1374   :  { %v4975_v43 = vpop.eup %4974  ;;  %v3158_v16 = vadd.f32 1.0, %v4973_v10 }
0x1375   :  { %v4977_v35 = vpop.eup %4976  ;;  %v3159_v40 = vadd.f32 1.0, %v4975_v43 }
0x1376   :  { %v4979_v56 = vpop.eup %4978  ;;  %v3160_v49 = vadd.f32 1.0, %v4977_v35 }
0x1377   :  { %4988 = vrcp.f32 %v3159_v40  ;;  %v3161_v18 = vadd.f32 1.0, %v4979_v56  ;;  %v4981_v34 = vpop.eup %4980 }
0x1378   :  { %v4983_v47 = vpop.eup %4982  ;;  %v3267_v50 = vadd.f32 1.0, %v4981_v34 }
0x1379   :  { %4990 = vrcp.f32 %v3161_v18  ;;  %v3269_v3 = vadd.f32 1.0, %v4983_v47  ;;  %v4985_v7 = vpop.eup %4984 }
0x137a   :  { %4992 = vrcp.f32 %v3158_v16  ;;  %v4987_v41 = vpop.eup %4986  ;;  %v3279_v62 = vmul.f32 2.0, %v4985_v7 }
0x137b   :  { %4994 = vrcp.f32 %v3160_v49  ;;  %v3280_v33 = vmul.f32 2.0, %v4987_v41 }
0x137c   :  { %4996 = vrcp.f32 %v3267_v50  ;;  %v4405_v52 = vadd.f32 -1.0, %v3279_v62 }
0x137d   :  { %4998 = vrcp.f32 %v3269_v3  ;;  %v4406_v43 = vadd.f32 -1.0, %v3280_v33 }
0x1381   :  { %v4989_v38 = vpop.eup %4988 }
0x1382   :  { %v3170_v4 = vmul.f32 2.0, %v4989_v38 }
0x1383   :  { %v4991_v42 = vpop.eup %4990 }
0x1384   :  { %v4398_v21 = vadd.f32 -1.0, %v3170_v4  ;;  %v3171_v51 = vmul.f32 2.0, %v4991_v42  ;;  %v4993_v1 = vpop.eup %4992 }
0x1385   :  { %v4995_v12 = vpop.eup %4994  ;;  %v3174_v18 = vmul.f32 %v4993_v1, %v6651_v20 }
0x1386   :  { %v3176_v57 = vmul.f32 %v4993_v1, %v4398_v21  ;;  %v4399_v26 = vadd.f32 -1.0, %v3171_v51  ;;  %v4997_v35 = vpop.eup %4996  ;;  %v3175_v47 = vmul.f32 %v4995_v12, %v6655_v27 }
0x1387   :  { %v3285_v40 = vmul.f32 %v4997_v35, %v4405_v52  ;;  %v4999_v56 = vpop.eup %4998  ;;  %v3283_v4 = vmul.f32 %v4997_v35, %v6659_v22 }
0x1388   :  { %3180 = vrot.lane.b32.xlu1 %v3176_v57, %s5188_s4  ;;  %v3177_v10 = vmul.f32 %v4995_v12, %v4399_v26  ;;  %v3286_v16 = vmul.f32 %v4999_v56, %v4406_v43  ;;  %v3284_v51 = vmul.f32 %v4999_v56, %v6663_v53 }
0x138a   :  { %3182 = vrot.lane.b32.xlu0 %v3177_v10, %s5188_s4 }
0x138c   :  { %3289 = vrot.lane.b32.xlu1 %v3285_v40, %s5188_s4 }
0x138e   :  { %3291 = vrot.lane.b32.xlu0 %v3286_v16, %s5188_s4 }
0x13fa   :  { %v3181_v34 = vpop.permute.xlu1 %3180 }
0x13fb   :  { %v6721_v49 = vadd.f32 %v3181_v34, %v3174_v18 }
0x13fc   :  { %v3183_v50 = vpop.permute.xlu0 %3182 }
0x13fd   :  { %5000 = vtanh.f32 %v6721_v49  ;;  %v6725_v3 = vadd.f32 %v3183_v50, %v3175_v47 }
0x13fe   :  { %v3290_v62 = vpop.permute.xlu1 %3289 }
0x13ff   :  { %5002 = vtanh.f32 %v6725_v3  ;;  %v6729_v21 = vadd.f32 %v3290_v62, %v3283_v4 }
0x1400   :  { %v3292_v20 = vpop.permute.xlu0 %3291 }
0x1401   :  { %5004 = vtanh.f32 %v6729_v21  ;;  %v6733_v33 = vadd.f32 %v3292_v20, %v3284_v51 }
0x1403   :  { %5006 = vtanh.f32 %v6733_v33 }
0x1407   :  { %v5001_v27 = vpop.eup %5000 }
0x1408   :  { %v6736_v57 = vmul.f32 %v5001_v27, %v4989_v38 }
0x1409   :  { %v5003_v1 = vpop.eup %5002 }
0x140a   :  { %v6738_v26 = vmul.f32 %v5003_v1, %v4991_v42 }
0x140b   :  { %v5005_v22 = vpop.eup %5004 }
0x140c   :  { %v3302_v52 = vpack.c.bf16 %v6738_v26, %v6736_v57  ;;  %v3299_v53 = vmul.f32 %v5005_v22, %v4985_v7  ;;  %v7129_v7 = vld [vmem:[#allocation25_spill] sm:$0xff] }
0x140d   :  { %v5007_v12 = vpop.eup %5006 }
0x140e   :  { %3304 = vrot.lane.b32.xlu1 %v3302_v52, %s5188_s4  ;;  %v3300_v10 = vmul.f32 %v5007_v12, %v4987_v41  ;;  %v657_v41 = vadd.f32 %v7129_v7, %v5407_v55 }
0x1410   :  { %v3301_v43 = vpack.c.bf16 %v3300_v10, %v3299_v53 }
0x1412   :  { %3353 = vrot.lane.b32.xlu0 %v3301_v43, %s5188_s4 }
0x1480   :  { %v3305_v35 = vpop.permute.xlu1 %3304 }
0x1481   :  { %4407 = vmatmul.mubr.msk.bf16.vlgmr.msra.gmra.mrb[80].mxu0 %vm389_vm4, %v3305_v35 }
0x1482   :  { %3359 = vmatpush1.bf16.msra.mxu0 %v6453_v0  ;;  %3390 = vmatprep.mubr.bf16.mxu0 %v7109_v58  ;;  %v5164_v0 = vld [vmem:[%s7064_s5] ss:$8 sps:$4 sm:$0xff]  }
0x1483   :  { %3360 = vmatprep.subr.bf16.mxu0 %v6460_v31  ;;  %v5165_v31 = vld [vmem:[%s7064_s5 + $0x14] ss:$8 sps:$4 sm:$0xff]  }
0x1484   :  { %v3354_v38 = vpop.permute.xlu0 %3353 }
0x1485   :  { %4415 = vmatmul.mubr.msk.bf16.vlgmr.msra.gmra.mrb[44].mxu1 %vm389_vm4, %v3354_v38 }
0x1486   :  { %3361 = vmatpush1.bf16.msra.mxu0 %v6467_v59  ;;  %3569 = vmatpush1.bf16.msra.mxu1 %v6473_v39  ;;  %v5166_v59 = vld [vmem:[%s7064_s5 + $0x10] ss:$8 sps:$4 sm:$0xff]   ;;  %v5167_v39 = vld [vmem:[%s7064_s5 + $0x24] ss:$8 sps:$4 sm:$0xff]  }
0x1487   :  { %3362 = vmatprep.subr.bf16.mxu0 %v6479_v48  ;;  %3570 = vmatprep.subr.bf16.mxu1 %v6485_v17  ;;  %v5168_v48 = vld [vmem:[%s7064_s5 + $0x20] ss:$8 sps:$4 sm:$0xff]   ;;  %v5169_v17 = vld [vmem:[%s7064_s5 + $0x34] ss:$8 sps:$4 sm:$0xff]  }
0x1488   :  { %3600 = vmatprep.mubr.bf16.mxu1 %v7109_v58 }
0x148a   :  { %3363 = vmatpush1.bf16.msra.mxu0 %v6492_v23  ;;  %3571 = vmatpush1.bf16.msra.mxu1 %v6498_v11  ;;  %v5170_v23 = vld [vmem:[%s7064_s5 + $0x30] ss:$8 sps:$4 sm:$0xff]  }
0x148b   :  { %3364 = vmatprep.subr.bf16.mxu0 %v6504_v30  ;;  %3572 = vmatprep.subr.bf16.mxu1 %v6510_v6  ;;  %v7126_v11 = vld [vmem:[#allocation22_spill] sm:$0xff]  ;;  %v7127_v6 = vld [vmem:[#allocation23_spill] sm:$0xff] }
0x148c   :  { %v649_v30 = vadd.f32 %v7126_v11, %v5403_v54 }
0x148e   :  { %3365 = vmatpush1.bf16.msra.mxu0 %v6516_v32  ;;  %3573 = vmatpush1.bf16.msra.mxu1 %v6522_v29  ;;  %v651_v32 = vadd.f32 %v7127_v6, %v5407_v55 }
0x148f   :  { %3726 = vmatprep.subr.bf16.mxu0 %v6528_v60  ;;  %3574 = vmatprep.subr.bf16.mxu1 %v6534_v25  ;;  %v7128_v60 = vld [vmem:[#allocation24_spill] sm:$0xff] }
0x1490   :  { %v655_v25 = vadd.f32 %v7128_v60, %v5403_v54 }
0x1491   :  { %4408 = vmatmul.mubr.msk.bf16.vlgmr.msra.gmra.mrb[80].mxu0 %vm389_vm4, %v3354_v38 }
0x1492   :  { %3727 = vmatpush1.bf16.msra.mxu0 %v5164_v0  ;;  %3575 = vmatpush1.bf16.msra.mxu1 %v6542_v63 }
0x1493   :  { %3728 = vmatprep.subr.bf16.mxu0 %v5165_v31  ;;  %3617 = vmatprep.subr.bf16.mxu1 %v6549_v15 }
0x1494   :  { %3758 = vmatprep.mubr.bf16.mxu0 %v7109_v58 }
0x1496   :  { %3729 = vmatpush1.bf16.msra.mxu0 %v5166_v59 }
0x1497   :  { %3730 = vmatprep.subr.bf16.mxu0 %v5167_v39 }
0x149a   :  { %3731 = vmatpush1.bf16.msra.mxu0 %v5168_v48 }
0x149b   :  { %3732 = vmatprep.subr.bf16.mxu0 %v5169_v17 }
0x149e   :  { %3733 = vmatpush1.bf16.msra.mxu0 %v5170_v23 }
0x149f   :  { %3827 = vmatprep.subr.bf16.mxu0 %v6561_v61 }
0x1558   :  { %v3501_v29 = vpop.f32.mrb[44].mxu1 }
0x1559   :  { %v3510_v63 = vadd.f32 %v3501_v29, %v649_v30  ;;  %v3503_v15 = vpop.f32.mrb[45].mxu1 }
0x155a   :  { %v3511_v42 = vadd.f32 %v3503_v15, %v651_v32  ;;  %v3505_v40 = vpop.f32.mrb[46].mxu1 }
0x155b   :  { %v3512_v56 = vadd.f32 %v3505_v40, %v655_v25  ;;  %v3507_v16 = vpop.f32.mrb[47].mxu1  ;;  %v4416_v10 = vmul.f32 -1.442695, %v3510_v63 }
0x155c   :  { %v3513_v61 = vadd.f32 %v3507_v16, %v657_v41  ;;  %v4417_v18 = vmul.f32 -1.442695, %v3511_v42 }
0x155d   :  { %v4418_v43 = vmul.f32 -1.442695, %v3512_v56 }
0x155e   :  { %v4419_v47 = vmul.f32 -1.442695, %v3513_v61  ;;  %5008 = vpow2.f32 %v4417_v18 }
0x1560   :  { %5010 = vpow2.f32 %v4419_v47 }
0x1564   :  { %v3392_v34 = vpop.f32.mrb[80].mxu0 }
0x1565   :  { %v3401_v50 = vadd.f32 %v3392_v34, %v5572_v37  ;;  %v3394_v4 = vpop.f32.mrb[81].mxu0 }
0x1566   :  { %v3402_v62 = vadd.f32 %v3394_v4, %v5576_v13  ;;  %v3396_v51 = vpop.f32.mrb[82].mxu0 }
0x1567   :  { %v3403_v20 = vadd.f32 %v3396_v51, %v5572_v37  ;;  %v3398_v27 = vpop.f32.mrb[83].mxu0  ;;  %v4409_v22 = vmul.f32 -1.442695, %v3401_v50 }
0x1568   :  { %v3404_v1 = vadd.f32 %v3398_v27, %v5576_v13  ;;  %v4410_v52 = vmul.f32 -1.442695, %v3402_v62  ;;  %v5009_v35 = vpop.eup %5008 }
0x1569   :  { %v4411_v12 = vmul.f32 -1.442695, %v3403_v20  ;;  %5012 = vpow2.f32 %v4409_v22  ;;  %v3527_v0 = vadd.f32 1.0, %v5009_v35 }
0x156a   :  { %v4412_v53 = vmul.f32 -1.442695, %v3404_v1  ;;  %5014 = vpow2.f32 %v4410_v52  ;;  %v5011_v38 = vpop.eup %5010 }
0x156b   :  { %5016 = vpow2.f32 %v4411_v12  ;;  %v3529_v31 = vadd.f32 1.0, %v5011_v38 }
0x156c   :  { %5018 = vpow2.f32 %v4412_v53 }
0x156d   :  { %5020 = vpow2.f32 %v4416_v10 }
0x156e   :  { %5022 = vpow2.f32 %v4418_v43 }
0x156f   :  { %5024 = vrcp.f32 %v3527_v0 }
0x1570   :  { %5026 = vrcp.f32 %v3529_v31 }
0x1573   :  { %v5013_v59 = vpop.eup %5012 }
0x1574   :  { %v5015_v39 = vpop.eup %5014  ;;  %v3417_v11 = vadd.f32 1.0, %v5013_v59 }
0x1575   :  { %v5017_v48 = vpop.eup %5016  ;;  %v3418_v17 = vadd.f32 1.0, %v5015_v39 }
0x1576   :  { %v5019_v23 = vpop.eup %5018  ;;  %v3419_v32 = vadd.f32 1.0, %v5017_v48 }
0x1577   :  { %5028 = vrcp.f32 %v3418_v17  ;;  %v3420_v30 = vadd.f32 1.0, %v5019_v23  ;;  %v5021_v6 = vpop.eup %5020 }
0x1578   :  { %v5023_v29 = vpop.eup %5022  ;;  %v3526_v60 = vadd.f32 1.0, %v5021_v6 }
0x1579   :  { %5030 = vrcp.f32 %v3420_v30  ;;  %v3528_v25 = vadd.f32 1.0, %v5023_v29  ;;  %v5025_v63 = vpop.eup %5024 }
0x157a   :  { %5032 = vrcp.f32 %v3417_v11  ;;  %v5027_v15 = vpop.eup %5026  ;;  %v3538_v42 = vmul.f32 2.0, %v5025_v63 }
0x157b   :  { %5034 = vrcp.f32 %v3419_v32  ;;  %v3539_v61 = vmul.f32 2.0, %v5027_v15 }
0x157c   :  { %5036 = vrcp.f32 %v3526_v60  ;;  %v4420_v50 = vadd.f32 -1.0, %v3538_v42  ;;  %v6832_v60 = vld [vmem:[%s7067_s6] ss:$8 sps:$4 sm:$0xff]   ;;  %v5176_v42 = vld [vmem:[%s7066_s7 + $0x14] ss:$8 sps:$4 sm:$0xff]  }
0x157d   :  { %5038 = vrcp.f32 %v3528_v25  ;;  %v4421_v51 = vadd.f32 -1.0, %v3539_v61  ;;  %v6839_v25 = vld [vmem:[%s7067_s6 + $0x14] ss:$8 sps:$4 sm:$0xff]   ;;  %v5180_v61 = vld [vmem:[%s7066_s7 + $0x24] ss:$8 sps:$4 sm:$0xff]  }
0x1581   :  { %v5029_v7 = vpop.eup %5028 }
0x1582   :  { %v3429_v41 = vmul.f32 2.0, %v5029_v7 }
0x1583   :  { %v5031_v40 = vpop.eup %5030 }
0x1584   :  { %v4413_v56 = vadd.f32 -1.0, %v3429_v41  ;;  %v3430_v16 = vmul.f32 2.0, %v5031_v40  ;;  %v5033_v18 = vpop.eup %5032  ;;  %v6855_v41 = vld [vmem:[%s7067_s6 + $0x24] ss:$8 sps:$4 sm:$0xff]  }
0x1585   :  { %v5035_v4 = vpop.eup %5034  ;;  %v3433_v52 = vmul.f32 %v5033_v18, %v6721_v49 }
0x1586   :  { %v3435_v34 = vmul.f32 %v5033_v18, %v4413_v56  ;;  %v4414_v47 = vadd.f32 -1.0, %v3430_v16  ;;  %v5037_v20 = vpop.eup %5036  ;;  %v3434_v10 = vmul.f32 %v5035_v4, %v6725_v3  ;;  %v5178_v56 = vld [vmem:[%s7066_s7 + $0x10] ss:$8 sps:$4 sm:$0xff]   ;;  %v6874_v16 = vld [vmem:[%s7067_s6 + $0x34] ss:$8 sps:$4 sm:$0xff]  }
0x1587   :  { %v3544_v27 = vmul.f32 %v5037_v20, %v4420_v50  ;;  %v5039_v1 = vpop.eup %5038  ;;  %v3542_v38 = vmul.f32 %v5037_v20, %v6729_v21  ;;  %v6883_v18 = vld [vmem:[%s7067_s6 + $0x30] ss:$8 sps:$4 sm:$0xff]  }
0x1588   :  { %3439 = vrot.lane.b32.xlu1 %v3435_v34, %s5188_s4  ;;  %v3436_v62 = vmul.f32 %v5035_v4, %v4414_v47  ;;  %v3545_v22 = vmul.f32 %v5039_v1, %v4421_v51  ;;  %v3543_v59 = vmul.f32 %v5039_v1, %v6733_v33  ;;  %v5182_v34 = vld [vmem:[%s7066_s7 + $0x20] ss:$8 sps:$4 sm:$0xff]   ;;  %v5183_v47 = vld [vmem:[%s7066_s7 + $0x34] ss:$8 sps:$4 sm:$0xff]   ;;  %v5184_v50 = vld [vmem:[%s7066_s7 + $0x30] ss:$8 sps:$4 sm:$0xff]  }
0x1589   :  { %v5185_v4 = vld [vmem:[%s7067_s6 + $0x4] ss:$8 sps:$4 sm:$0xff]   ;;  %v7131_v20 = vld [vmem:[#allocation27_spill] sm:$0xff] }
0x158a   :  { %3441 = vrot.lane.b32.xlu0 %v3436_v62, %s5188_s4  ;;  %v7130_v62 = vld [vmem:[#allocation26_spill] sm:$0xff] }
0x158b   :  { %v661_v51 = vadd.f32 %v7130_v62, %v5403_v54 }
0x158c   :  { %3548 = vrot.lane.b32.xlu1 %v3544_v27, %s5188_s4  ;;  %v663_v27 = vadd.f32 %v7131_v20, %v5407_v55 }
0x158e   :  { %3550 = vrot.lane.b32.xlu0 %v3545_v22, %s5188_s4  ;;  %v7132_v22 = vld [vmem:[#allocation28_spill] sm:$0xff] }
0x15fa   :  { %v3440_v12 = vpop.permute.xlu1 %3439 }
0x15fb   :  { %v6805_v53 = vadd.f32 %v3440_v12, %v3433_v52  ;;  %v667_v52 = vadd.f32 %v7132_v22, %v5403_v54 }
0x15fc   :  { %v3442_v43 = vpop.permute.xlu0 %3441 }
0x15fd   :  { %5040 = vtanh.f32 %v6805_v53  ;;  %v6809_v35 = vadd.f32 %v3442_v43, %v3434_v10  ;;  %v7133_v43 = vld [vmem:[#allocation29_spill] sm:$0xff] }
0x15fe   :  { %v3549_v0 = vpop.permute.xlu1 %3548 }
0x15ff   :  { %5042 = vtanh.f32 %v6809_v35  ;;  %v6813_v31 = vadd.f32 %v3549_v0, %v3542_v38  ;;  %v669_v38 = vadd.f32 %v7133_v43, %v5407_v55 }
0x1600   :  { %v3551_v49 = vpop.permute.xlu0 %3550 }
0x1601   :  { %5044 = vtanh.f32 %v6813_v31  ;;  %v6817_v39 = vadd.f32 %v3551_v49, %v3543_v59 }
0x1603   :  { %5046 = vtanh.f32 %v6817_v39 }
0x1607   :  { %v5041_v3 = vpop.eup %5040 }
0x1608   :  { %v6820_v17 = vmul.f32 %v5041_v3, %v5029_v7  ;;  %v5174_v7 = vld [vmem:[%s7066_s7] ss:$8 sps:$4 sm:$0xff]  }
0x1609   :  { %v5043_v48 = vpop.eup %5042 }
0x160a   :  { %v6822_v23 = vmul.f32 %v5043_v48, %v5031_v40  ;;  %v6865_v40 = vld [vmem:[%s7067_s6 + $0x20] ss:$8 sps:$4 sm:$0xff]  }
0x160b   :  { %v5045_v21 = vpop.eup %5044 }
0x160c   :  { %v3561_v11 = vpack.c.bf16 %v6822_v23, %v6820_v17  ;;  %v3558_v33 = vmul.f32 %v5045_v21, %v5025_v63 }
0x160d   :  { %v5047_v30 = vpop.eup %5046 }
0x160e   :  { %3563 = vrot.lane.b32.xlu1 %v3561_v11, %s5188_s4  ;;  %v3559_v6 = vmul.f32 %v5047_v30, %v5027_v15  ;;  %v6846_v15 = vld [vmem:[%s7067_s6 + $0x10] ss:$8 sps:$4 sm:$0xff]  }
0x1610   :  { %v3560_v32 = vpack.c.bf16 %v3559_v6, %v3558_v33 }
0x1612   :  { %3612 = vrot.lane.b32.xlu0 %v3560_v32, %s5188_s4 }
0x1680   :  { %v3564_v29 = vpop.permute.xlu1 %3563 }
0x1681   :  { %4422 = vmatmul.mubr.msk.bf16.vlgmr.msra.gmra.mrb[48].mxu1 %vm389_vm4, %v3564_v29 }
0x1682   :  { %3618 = vmatpush1.bf16.msra.mxu1 %v6832_v60  ;;  %3649 = vmatprep.mubr.bf16.mxu1 %v7109_v58 }
0x1683   :  { %3619 = vmatprep.subr.bf16.mxu1 %v6839_v25 }
0x1684   :  { %v3613_v63 = vpop.permute.xlu0 %3612 }
0x1685   :  { %4430 = vmatmul.mubr.msk.bf16.vlgmr.msra.gmra.mrb[84].mxu0 %vm389_vm4, %v3613_v63 }
0x1686   :  { %3620 = vmatpush1.bf16.msra.mxu1 %v6846_v15  ;;  %3828 = vmatpush1.bf16.msra.mxu0 %v5174_v7 }
0x1687   :  { %3621 = vmatprep.subr.bf16.mxu1 %v6855_v41  ;;  %3829 = vmatprep.subr.bf16.mxu0 %v5176_v42 }
0x1688   :  { %3859 = vmatprep.mubr.bf16.mxu0 %v7109_v58 }
0x168a   :  { %3622 = vmatpush1.bf16.msra.mxu1 %v6865_v40  ;;  %3830 = vmatpush1.bf16.msra.mxu0 %v5178_v56 }
0x168b   :  { %3623 = vmatprep.subr.bf16.mxu1 %v6874_v16  ;;  %3831 = vmatprep.subr.bf16.mxu0 %v5180_v61 }
0x168e   :  { %3624 = vmatpush1.bf16.msra.mxu1 %v6883_v18  ;;  %3832 = vmatpush1.bf16.msra.mxu0 %v5182_v34 }
0x168f   :  { %3833 = vmatprep.subr.bf16.mxu0 %v5183_v47 }
0x1691   :  { %4423 = vmatmul.mubr.msk.bf16.vlgmr.msra.gmra.mrb[48].mxu1 %vm389_vm4, %v3613_v63 }
0x1692   :  { %3834 = vmatpush1.bf16.msra.mxu0 %v5184_v50 }
0x1693   :  { %3876 = vmatprep.subr.bf16.mxu0 %v5185_v4 }
0x1758   :  { %v3760_v1 = vpop.f32.mrb[84].mxu0 }
0x1759   :  { %v3769_v12 = vadd.f32 %v3760_v1, %v661_v51  ;;  %v3762_v10 = vpop.f32.mrb[85].mxu0 }
0x175a   :  { %v3770_v0 = vadd.f32 %v3762_v10, %v663_v27  ;;  %v3764_v59 = vpop.f32.mrb[86].mxu0 }
0x175b   :  { %v3771_v49 = vadd.f32 %v3764_v59, %v667_v52  ;;  %v3766_v3 = vpop.f32.mrb[87].mxu0  ;;  %v4431_v34 = vmul.f32 -1.442695, %v3769_v12 }
0x175c   :  { %v3772_v48 = vadd.f32 %v3766_v3, %v669_v38  ;;  %v4432_v21 = vmul.f32 -1.442695, %v3770_v0 }
0x175d   :  { %v4433_v47 = vmul.f32 -1.442695, %v3771_v49 }
0x175e   :  { %v4434_v30 = vmul.f32 -1.442695, %v3772_v48  ;;  %5048 = vpow2.f32 %v4432_v21 }
0x1760   :  { %5050 = vpow2.f32 %v4434_v30 }
0x1764   :  { %v3651_v11 = vpop.f32.mrb[48].mxu1 }
0x1765   :  { %v3660_v33 = vadd.f32 %v3651_v11, %v5572_v37  ;;  %v3653_v6 = vpop.f32.mrb[49].mxu1 }
0x1766   :  { %v3661_v32 = vadd.f32 %v3653_v6, %v5576_v13  ;;  %v3655_v29 = vpop.f32.mrb[50].mxu1 }
0x1767   :  { %v3662_v54 = vadd.f32 %v3655_v29, %v5572_v37  ;;  %v3657_v63 = vpop.f32.mrb[51].mxu1  ;;  %v4424_v7 = vmul.f32 -1.442695, %v3660_v33 }
0x1768   :  { %v3663_v55 = vadd.f32 %v3657_v63, %v5576_v13  ;;  %v4425_v42 = vmul.f32 -1.442695, %v3661_v32  ;;  %v5049_v50 = vpop.eup %5048 }
0x1769   :  { %v4426_v56 = vmul.f32 -1.442695, %v3662_v54  ;;  %5052 = vpow2.f32 %v4424_v7  ;;  %v3786_v62 = vadd.f32 1.0, %v5049_v50 }
0x176a   :  { %v4427_v61 = vmul.f32 -1.442695, %v3663_v55  ;;  %5054 = vpow2.f32 %v4425_v42  ;;  %v5051_v4 = vpop.eup %5050 }
0x176b   :  { %5056 = vpow2.f32 %v4426_v56  ;;  %v3788_v51 = vadd.f32 1.0, %v5051_v4 }
0x176c   :  { %5058 = vpow2.f32 %v4427_v61 }
0x176d   :  { %5060 = vpow2.f32 %v4431_v34 }
0x176e   :  { %5062 = vpow2.f32 %v4433_v47 }
0x176f   :  { %5064 = vrcp.f32 %v3786_v62 }
0x1770   :  { %5066 = vrcp.f32 %v3788_v51 }
0x1773   :  { %v5053_v20 = vpop.eup %5052 }
0x1774   :  { %v5055_v27 = vpop.eup %5054  ;;  %v3676_v10 = vadd.f32 1.0, %v5053_v20 }
0x1775   :  { %v5057_v1 = vpop.eup %5056  ;;  %v3677_v22 = vadd.f32 1.0, %v5055_v27 }
0x1776   :  { %v5059_v52 = vpop.eup %5058  ;;  %v3678_v38 = vadd.f32 1.0, %v5057_v1 }
0x1777   :  { %5068 = vrcp.f32 %v3677_v22  ;;  %v3679_v12 = vadd.f32 1.0, %v5059_v52  ;;  %v5061_v43 = vpop.eup %5060 }
0x1778   :  { %v5063_v0 = vpop.eup %5062  ;;  %v3785_v59 = vadd.f32 1.0, %v5061_v43 }
0x1779   :  { %5070 = vrcp.f32 %v3679_v12  ;;  %v3787_v49 = vadd.f32 1.0, %v5063_v0  ;;  %v5065_v3 = vpop.eup %5064 }
0x177a   :  { %5072 = vrcp.f32 %v3676_v10  ;;  %v5067_v48 = vpop.eup %5066  ;;  %v3797_v30 = vmul.f32 2.0, %v5065_v3 }
0x177b   :  { %5074 = vrcp.f32 %v3678_v38  ;;  %v3798_v29 = vmul.f32 2.0, %v5067_v48 }
0x177c   :  { %5076 = vrcp.f32 %v3785_v59  ;;  %v4435_v7 = vadd.f32 -1.0, %v3797_v30 }
0x177d   :  { %5078 = vrcp.f32 %v3787_v49  ;;  %v4436_v61 = vadd.f32 -1.0, %v3798_v29 }
0x1781   :  { %v5069_v21 = vpop.eup %5068 }
0x1782   :  { %v3688_v11 = vmul.f32 2.0, %v5069_v21 }
0x1783   :  { %v5071_v33 = vpop.eup %5070 }
0x1784   :  { %v4428_v6 = vadd.f32 -1.0, %v3688_v11  ;;  %v3689_v32 = vmul.f32 2.0, %v5071_v33  ;;  %v5073_v54 = vpop.eup %5072 }
0x1785   :  { %v5075_v42 = vpop.eup %5074  ;;  %v3692_v62 = vmul.f32 %v5073_v54, %v6805_v53 }
0x1786   :  { %v3694_v63 = vmul.f32 %v5073_v54, %v4428_v6  ;;  %v4429_v55 = vadd.f32 -1.0, %v3689_v32  ;;  %v5077_v34 = vpop.eup %5076  ;;  %v3693_v27 = vmul.f32 %v5075_v42, %v6809_v35 }
0x1787   :  { %v3803_v47 = vmul.f32 %v5077_v34, %v4435_v7  ;;  %v5079_v50 = vpop.eup %5078  ;;  %v3801_v52 = vmul.f32 %v5077_v34, %v6813_v31 }
0x1788   :  { %3698 = vrot.lane.b32.xlu1 %v3694_v63, %s5188_s4  ;;  %v3695_v56 = vmul.f32 %v5075_v42, %v4429_v55  ;;  %v3804_v4 = vmul.f32 %v5079_v50, %v4436_v61  ;;  %v3802_v43 = vmul.f32 %v5079_v50, %v6817_v39 }
0x178a   :  { %3700 = vrot.lane.b32.xlu0 %v3695_v56, %s5188_s4 }
0x178c   :  { %3807 = vrot.lane.b32.xlu1 %v3803_v47, %s5188_s4 }
0x178e   :  { %3809 = vrot.lane.b32.xlu0 %v3804_v4, %s5188_s4 }
0x17fa   :  { %v3699_v51 = vpop.permute.xlu1 %3698 }
0x17fb   :  { %v6916_v20 = vadd.f32 %v3699_v51, %v3692_v62 }
0x17fc   :  { %v3701_v1 = vpop.permute.xlu0 %3700 }
0x17fd   :  { %5080 = vtanh.f32 %v6916_v20  ;;  %v6920_v22 = vadd.f32 %v3701_v1, %v3693_v27 }
0x17fe   :  { %v3808_v10 = vpop.permute.xlu1 %3807 }
0x17ff   :  { %5082 = vtanh.f32 %v6920_v22  ;;  %v3813_v12 = vadd.f32 %v3808_v10, %v3801_v52 }
0x1800   :  { %v3810_v38 = vpop.permute.xlu0 %3809 }
0x1801   :  { %5084 = vtanh.f32 %v3813_v12  ;;  %v3814_v53 = vadd.f32 %v3810_v38, %v3802_v43  ;;  %v7134_v12 = vld [vmem:[#allocation4_spill] sm:$0xff]  ;;  %v7135_v43 = vld [vmem:[#allocation5_spill] sm:$0xff]  ;;  %v7136_v38 = vld [vmem:[#allocation30_spill] sm:$0xff] }
0x1803   :  { %5086 = vtanh.f32 %v3814_v53  ;;  %v7137_v53 = vld [vmem:[#allocation31_spill] sm:$0xff] }
0x1807   :  { %v5081_v0 = vpop.eup %5080 }
0x1808   :  { %v6925_v35 = vmul.f32 %v5081_v0, %v5069_v21 }
0x1809   :  { %v5083_v59 = vpop.eup %5082 }
0x180a   :  { %v6927_v49 = vmul.f32 %v5083_v59, %v5071_v33 }
0x180b   :  { %v5085_v11 = vpop.eup %5084 }
0x180c   :  { %v3820_v31 = vpack.c.bf16 %v6927_v49, %v6925_v35  ;;  %v3817_v6 = vmul.f32 %v5085_v11, %v5065_v3 }
0x180d   :  { %v5087_v30 = vpop.eup %5086 }
0x180e   :  { %3822 = vrot.lane.b32.xlu1 %v3820_v31, %s5188_s4  ;;  %v3818_v32 = vmul.f32 %v5087_v30, %v5067_v48 }
0x1810   :  { %v3819_v39 = vpack.c.bf16 %v3818_v32, %v3817_v6 }
0x1812   :  { %3871 = vrot.lane.b32.xlu0 %v3819_v39, %s5188_s4 }
0x1880   :  { %v3823_v29 = vpop.permute.xlu1 %3822 }
0x1881   :  { %4437 = vmatmul.mubr.msk.bf16.vlgmr.msra.gmra.mrb[88].mxu0 %vm389_vm4, %v3823_v29 }
0x1882   :  { %3877 = vmatpush1.bf16.msra.mxu0 %v6832_v60  ;;  %3908 = vmatprep.mubr.bf16.mxu0 %v7109_v58 }
0x1883   :  { %3878 = vmatprep.subr.bf16.mxu0 %v6839_v25 }
0x1884   :  { %v3872_v3 = vpop.permute.xlu0 %3871 }
0x1886   :  { %3879 = vmatpush1.bf16.msra.mxu0 %v6846_v15 }
0x1887   :  { %3880 = vmatprep.subr.bf16.mxu0 %v6855_v41 }
0x188a   :  { %3881 = vmatpush1.bf16.msra.mxu0 %v6865_v40 }
0x188b   :  { %3882 = vmatprep.subr.bf16.mxu0 %v6874_v16 }
0x188e   :  { %3883 = vmatpush1.bf16.msra.mxu0 %v6883_v18 }
0x1891   :  { %4438 = vmatmul.mubr.msk.bf16.vlgmr.msra.gmra.mrb[88].mxu0 %vm389_vm4, %v3872_v3 }
0x1964   :  { %v3910_v48 = vpop.f32.mrb[88].mxu0 }
0x1965   :  { %v3919_v60 = vadd.f32 %v3910_v48, %v5572_v37  ;;  %v3912_v21 = vpop.f32.mrb[89].mxu0 }
0x1966   :  { %v3920_v58 = vadd.f32 %v3912_v21, %v5576_v13  ;;  %v3914_v25 = vpop.f32.mrb[90].mxu0 }
0x1967   :  { %v4439_v33 = vmul.f32 -1.442695, %v3919_v60  ;;  %v3921_v15 = vadd.f32 %v3914_v25, %v5572_v37  ;;  %v3916_v41 = vpop.f32.mrb[91].mxu0 }
0x1968   :  { %v4440_v54 = vmul.f32 -1.442695, %v3920_v58  ;;  %v3922_v40 = vadd.f32 %v3916_v41, %v5576_v13 }
0x1969   :  { %5088 = vpow2.f32 %v4439_v33  ;;  %v4441_v16 = vmul.f32 -1.442695, %v3921_v15 }
0x196a   :  { %5090 = vpow2.f32 %v4440_v54  ;;  %v4442_v18 = vmul.f32 -1.442695, %v3922_v40  ;;  %v755_v54 = vld [vmem:[%s7070_s2] sm:$0xff] }
0x196b   :  { %5092 = vpow2.f32 %v4441_v16  ;;  %v756_v16 = vld [vmem:[%s7070_s2 + $0x8] sm:$0xff]  ;;  %vm1120_vm13 = vcmp.eq.s32.totalorder %v755_v54, 0  ;;  %vm1379_vm14 = vcmp.eq.s32.totalorder %v755_v54, 1  ;;  %vm1638_vm0 = vcmp.eq.s32.totalorder %v755_v54, 2 }
0x196c   :  { %5094 = vpow2.f32 %v4442_v18  ;;  %vm1121_vm15 = vcmp.eq.s32.totalorder %v756_v16, 0  ;;  %vm1380_vm1 = vcmp.eq.s32.totalorder %v756_v16, 1  ;;  %vm1897_vm2 = vcmp.eq.s32.totalorder %v755_v54, 3 }
0x196d   :  { %vm1639_vm3 = vcmp.eq.s32.totalorder %v756_v16, 2  ;;  %vm2156_vm5 = vcmp.eq.s32.totalorder %v755_v54, 4  ;;  %vm1898_vm6 = vcmp.eq.s32.totalorder %v756_v16, 3  ;;  %vm2415_vm7 = vcmp.eq.s32.totalorder %v755_v54, 5 }
0x196e   :  { %vm2157_vm8 = vcmp.eq.s32.totalorder %v756_v16, 4  ;;  %vm2674_vm9 = vcmp.eq.s32.totalorder %v755_v54, 6  ;;  %vm2416_vm10 = vcmp.eq.s32.totalorder %v756_v16, 5  ;;  %vm2933_vm11 = vcmp.eq.s32.totalorder %v755_v54, 7 }
0x196f   :  { %vm2675_vm12 = vcmp.eq.s32.totalorder %v756_v16, 6 }
0x1973   :  { %v5089_v63 = vpop.eup %5088 }
0x1974   :  { %v5091_v55 = vpop.eup %5090  ;;  %v3935_v61 = vadd.f32 1.0, %v5089_v63 }
0x1975   :  { %v5093_v7 = vpop.eup %5092  ;;  %v3936_v42 = vadd.f32 1.0, %v5091_v55 }
0x1976   :  { %v5095_v56 = vpop.eup %5094  ;;  %v3937_v47 = vadd.f32 1.0, %v5093_v7 }
0x1977   :  { %5096 = vrcp.f32 %v3936_v42  ;;  %v3938_v34 = vadd.f32 1.0, %v5095_v56 }
0x1979   :  { %5098 = vrcp.f32 %v3938_v34 }
0x197a   :  { %5100 = vrcp.f32 %v3935_v61 }
0x197b   :  { %5102 = vrcp.f32 %v3937_v47 }
0x1981   :  { %v6947_v37 = vpop.eup %5096 }
0x1982   :  { %v3947_v13 = vmul.f32 2.0, %v6947_v37 }
0x1983   :  { %v6950_v50 = vpop.eup %5098 }
0x1984   :  { %v4443_v4 = vadd.f32 -1.0, %v3947_v13  ;;  %v3948_v62 = vmul.f32 2.0, %v6950_v50  ;;  %v5101_v51 = vpop.eup %5100 }
0x1985   :  { %v5103_v52 = vpop.eup %5102 }
0x1986   :  { %v3953_v27 = vmul.f32 %v5101_v51, %v4443_v4  ;;  %v4444_v1 = vadd.f32 -1.0, %v3948_v62  ;;  %v3952_v0 = vmul.f32 %v5103_v52, %v6920_v22 }
0x1988   :  { %3957 = vrot.lane.b32.xlu1 %v3953_v27, %s5188_s4  ;;  %v3954_v10 = vmul.f32 %v5103_v52, %v4444_v1 }
0x198a   :  { %3959 = vrot.lane.b32.xlu0 %v3954_v10, %s5188_s4 }
0x198c   :  { %1124 = vrot.lane.b32.xlu1 %v7134_v12, %s5188_s4 }
0x198e   :  { %1126 = vrot.lane.b32.xlu0 %v7135_v43, %s5188_s4 }
0x1990   :  { %1383 = vrot.lane.b32.xlu1 %v7136_v38, %s5188_s4 }
0x1992   :  { %1385 = vrot.lane.b32.xlu0 %v7137_v53, %s5188_s4 }
0x1994   :  { %1642 = vrot.lane.b32.xlu1 %v6196_v9, %s5188_s4  ;;  %v3981_v9 = vld [vmem:[%s7069_s9] sm:$0xff] }
0x1996   :  { %1644 = vrot.lane.b32.xlu0 %v6198_v2, %s5188_s4  ;;  %v3982_v2 = vld [vmem:[%s7069_s9 + $0x8] sm:$0xff] }
0x1998   :  { %1901 = vrot.lane.b32.xlu1 %v6266_v14, %s5188_s4  ;;  %v3983_v14 = vld [vmem:[%s7069_s9 + $0x10] sm:$0xff] }
0x199a   :  { %1903 = vrot.lane.b32.xlu0 %v6268_v5, %s5188_s4  ;;  %v4515_v5 = vpack.c.bf16 %v3982_v2, %v3981_v9 }
0x199c   :  { %2160 = vrot.lane.b32.xlu1 %v6336_v24, %s5188_s4  ;;  %v3984_v24 = vld [vmem:[%s7069_s9 + $0x18] sm:$0xff]  ;;  %4516 = vmatprep.subr.bf16.mxu1 %v4515_v5 }
0x199d   :  { %4518 = vmatpush3.bf16.msra.mxu1 %v4515_v5 }
0x199e   :  { %2162 = vrot.lane.b32.xlu0 %v6338_v46, %s5188_s4  ;;  %v4519_v46 = vpack.c.bf16 %v3984_v24, %v3983_v14 }
0x19a0   :  { %2419 = vrot.lane.b32.xlu1 %v6441_v28, %s5188_s4  ;;  %v3985_v28 = vld [vmem:[%s7069_s9 + $0x20] sm:$0xff]  ;;  %4520 = vmatprep.subr.bf16.mxu1 %v4519_v46 }
0x19a1   :  { %4522 = vmatpush3.bf16.msra.mxu1 %v4519_v46 }
0x19a2   :  { %2421 = vrot.lane.b32.xlu0 %v6443_v19, %s5188_s4  ;;  %v3986_v19 = vld [vmem:[%s7069_s9 + $0x28] sm:$0xff] }
0x19a4   :  { %2678 = vrot.lane.b32.xlu1 %v6596_v36, %s5188_s4  ;;  %v4523_v36 = vpack.c.bf16 %v3986_v19, %v3985_v28 }
0x19a6   :  { %2680 = vrot.lane.b32.xlu0 %v6598_v44, %s5188_s4  ;;  %v3987_v44 = vld [vmem:[%s7069_s9 + $0x30] sm:$0xff]  ;;  %4524 = vmatprep.subr.bf16.mxu1 %v4523_v36 }
0x19a7   :  { %4526 = vmatpush3.bf16.msra.mxu1 %v4523_v36  ;;  %v4083_v36 = vld [vmem:[%s7071_s11] sm:$0xff] }
0x19a8   :  { %2937 = vrot.lane.b32.xlu1 %v6666_v45, %s5188_s4  ;;  %v3988_v45 = vld [vmem:[%s7069_s9 + $0x38] sm:$0xff] }
0x19aa   :  { %2939 = vrot.lane.b32.xlu0 %v6668_v8, %s5188_s4  ;;  %v4527_v8 = vpack.c.bf16 %v3988_v45, %v3987_v44  ;;  %v4084_v44 = vld [vmem:[%s7071_s11 + $0x8] sm:$0xff] }
0x19ab   :  { %v4531_v45 = vpack.c.bf16 %v4084_v44, %v4083_v36 }
0x19ac   :  { %3196 = vrot.lane.b32.xlu1 %v6736_v57, %s5188_s4  ;;  %4528 = vmatprep.subr.bf16.mxu1 %v4527_v8  ;;  %v3951_v57 = vmul.f32 %v5101_v51, %v6916_v20 }
0x19ad   :  { %4530 = vmatpush3.bf16.msra.mxu1 %v4527_v8  ;;  %v4085_v8 = vld [vmem:[%s7071_s11 + $0x10] sm:$0xff] }
0x19ae   :  { %3198 = vrot.lane.b32.xlu0 %v6738_v26, %s5188_s4  ;;  %4532 = vmatprep.subr.bf16.mxu1 %v4531_v45 }
0x19b0   :  { %3455 = vrot.lane.b32.xlu1 %v6820_v17, %s5188_s4 }
0x19b2   :  { %3457 = vrot.lane.b32.xlu0 %v6822_v23, %s5188_s4 }
0x19b4   :  { %3714 = vrot.lane.b32.xlu1 %v6925_v35, %s5188_s4 }
0x19b6   :  { %3716 = vrot.lane.b32.xlu0 %v6927_v49, %s5188_s4 }
0x19fa   :  { %v3958_v26 = vpop.permute.xlu1 %3957 }
0x19fb   :  { %v3963_v17 = vadd.f32 %v3958_v26, %v3951_v57  ;;  %v4086_v57 = vld [vmem:[%s7071_s11 + $0x18] sm:$0xff] }
0x19fc   :  { %v3960_v59 = vpop.permute.xlu0 %3959  ;;  %v4535_v26 = vpack.c.bf16 %v4086_v57, %v4085_v8 }
0x19fd   :  { %5104 = vtanh.f32 %v3963_v17  ;;  %v3964_v23 = vadd.f32 %v3960_v59, %v3952_v0  ;;  %v18_v17 = vstv %s7072_s12  ;;  %v4445_v0 = vld [vmem:[%s7073_s10] ss:$0 sm:$0xff] }
0x19fe   :  { %v1125_v30 = vpop.permute.xlu1 %1124  ;;  %19 = vst [vmem:[#allocation3] sm:$0x1] %v18_v17 }
0x19ff   :  { %5106 = vtanh.f32 %v3964_v23  ;;  %v1130_v63 = vsel %vm1120_vm13, %v1125_v30, 0.0  ;;  %vm3192_vm13 = vcmp.eq.s32.totalorder %v755_v54, 8 }
0x1a00   :  { %v1127_v20 = vpop.permute.xlu0 %1126 }
0x1a01   :  { %v1131_v42 = vsel %vm1121_vm15, %v1127_v20, 0.0  ;;  %vm3451_vm15 = vcmp.eq.s32.totalorder %v755_v54, 9 }
0x1a02   :  { %v1384_v6 = vpop.permute.xlu1 %1383 }
0x1a03   :  { %v1389_v7 = vsel %vm1379_vm14, %v1384_v6, %v1130_v63  ;;  %vm2934_vm14 = vcmp.eq.s32.totalorder %v756_v16, 7 }
0x1a04   :  { %v1386_v32 = vpop.permute.xlu0 %1385 }
0x1a05   :  { %v1390_v34 = vsel %vm1380_vm1, %v1386_v32, %v1131_v42  ;;  %vm3710_vm1 = vcmp.eq.s32.totalorder %v755_v54, 10  ;;  %v4448_v6 = vld [vmem:[#allocation3] ss:$0 sm:$0xff] }
0x1a06   :  { %v1643_v39 = vpop.permute.xlu1 %1642 }
0x1a07   :  { %v5105_v11 = vpop.eup %5104  ;;  %v1648_v56 = vsel %vm1638_vm0, %v1643_v39, %v1389_v7  ;;  %vm3193_vm0 = vcmp.eq.s32.totalorder %v756_v16, 8 }
0x1a08   :  { %v3967_v31 = vmul.f32 %v5105_v11, %v6947_v37  ;;  %v1645_v22 = vpop.permute.xlu0 %1644 }
0x1a09   :  { %v5107_v35 = vpop.eup %5106  ;;  %v1649_v37 = vsel %vm1639_vm3, %v1645_v22, %v1390_v34  ;;  %vm3969_vm3 = vcmp.eq.s32.totalorder %v755_v54, 11 }
0x1a0a   :  { %3973 = vrot.lane.b32.xlu1 %v3967_v31, %s5188_s4  ;;  %v3968_v49 = vmul.f32 %v5107_v35, %v6950_v50  ;;  %v1902_v29 = vpop.permute.xlu1 %1901 }
0x1a0b   :  { %v1907_v47 = vsel %vm1897_vm2, %v1902_v29, %v1648_v56  ;;  %vm3452_vm2 = vcmp.eq.s32.totalorder %v756_v16, 9 }
0x1a0c   :  { %3975 = vrot.lane.b32.xlu0 %v3968_v49, %s5188_s4  ;;  %v1904_v3 = vpop.permute.xlu0 %1903 }
0x1a0d   :  { %v1908_v50 = vsel %vm1898_vm6, %v1904_v3, %v1649_v37  ;;  %vm3970_vm6 = vcmp.eq.s32.totalorder %v756_v16, 11 }
0x1a0e   :  { %v2161_v48 = vpop.permute.xlu1 %2160 }
0x1a0f   :  { %v2166_v13 = vsel %vm2156_vm5, %v2161_v48, %v1907_v47  ;;  %vm3711_vm5 = vcmp.eq.s32.totalorder %v756_v16, 10 }
0x1a10   :  { %v2163_v60 = vpop.permute.xlu0 %2162 }
0x1a11   :  { %v2167_v62 = vsel %vm2157_vm8, %v2163_v60, %v1908_v50  ;;  %vm4094_vm8 = vcmask 261120  }
0x1a12   :  { %v2420_v21 = vpop.permute.xlu1 %2419 }
0x1a13   :  { %v2425_v4 = vsel %vm2415_vm7, %v2420_v21, %v2166_v13 }
0x1a14   :  { %v2422_v58 = vpop.permute.xlu0 %2421 }
0x1a15   :  { %v2426_v1 = vsel %vm2416_vm10, %v2422_v58, %v2167_v62 }
0x1a16   :  { %v2679_v25 = vpop.permute.xlu1 %2678 }
0x1a17   :  { %v2684_v51 = vsel %vm2674_vm9, %v2679_v25, %v2425_v4  ;;  %vm4188_vm9 = vcmask 7168  }
0x1a18   :  { %v2681_v33 = vpop.permute.xlu0 %2680 }
0x1a19   :  { %v2685_v10 = vsel %vm2675_vm12, %v2681_v33, %v2426_v1 }
0x1a1a   :  { %v2938_v15 = vpop.permute.xlu1 %2937 }
0x1a1b   :  { %v2943_v52 = vsel %vm2933_vm11, %v2938_v15, %v2684_v51 }
0x1a1c   :  { %v2940_v41 = vpop.permute.xlu0 %2939 }
0x1a1d   :  { %v2944_v38 = vsel %vm2934_vm14, %v2940_v41, %v2685_v10 }
0x1a1e   :  { %v3197_v40 = vpop.permute.xlu1 %3196 }
0x1a1f   :  { %v3202_v12 = vsel %vm3192_vm13, %v3197_v40, %v2943_v52 }
0x1a20   :  { %v3199_v18 = vpop.permute.xlu0 %3198 }
0x1a21   :  { %v3203_v9 = vsel %vm3193_vm0, %v3199_v18, %v2944_v38 }
0x1a22   :  { %v3456_v55 = vpop.permute.xlu1 %3455 }
0x1a23   :  { %v3461_v53 = vsel %vm3451_vm15, %v3456_v55, %v3202_v12 }
0x1a24   :  { %v3458_v61 = vpop.permute.xlu0 %3457 }
0x1a25   :  { %v3462_v5 = vsel %vm3452_vm2, %v3458_v61, %v3203_v9 }
0x1a26   :  { %v3715_v27 = vpop.permute.xlu1 %3714 }
0x1a27   :  { %v3720_v2 = vsel %vm3710_vm1, %v3715_v27, %v3461_v53 }
0x1a28   :  { %v3717_v43 = vpop.permute.xlu0 %3716 }
0x1a29   :  { %v3721_v46 = vsel %vm3711_vm5, %v3717_v43, %v3462_v5 }
0x1a7c   :  { %v3974_v14 = vpop.permute.xlu1 %3973 }
0x1a7d   :  { %v3979_v24 = vsel %vm3969_vm3, %v3974_v14, %v3720_v2 }
0x1a7e   :  { %4485 = vmatprep.mubr.msk.f32.mxu1 %vm389_vm4, %v3979_v24  ;;  %v3976_v28 = vpop.permute.xlu0 %3975 }
0x1a7f   :  { %v3980_v19 = vsel %vm3970_vm6, %v3976_v28, %v3721_v46 }
0x1a80   :  { %4486 = vmatmul.mubr.msk.f32.vlgmr.msra.gmra.mrb[52].mxu1 %vm389_vm4, %v3980_v19 }
0x1a81   :  { %4534 = vmatpush3.bf16.msra.mxu1 %v4531_v45 }
0x1a82   :  { %4536 = vmatprep.subr.bf16.mxu1 %v4535_v26 }
0x1a85   :  { %4538 = vmatpush3.bf16.msra.mxu1 %v4535_v26 }
0x1b53   :  { %v4487_v59 = vpop.f32.mrb[52].mxu1 }
0x1b54   :  { %v4074_v23 = vadd.f32 %v4487_v59, %v4445_v0  ;;  %v4068_v11 = vpop.f32.mrb[53].mxu1 }
0x1b55   :  { %v4069_v31 = vadd.f32 %v4445_v0, %v4068_v11 }
0x1b56   :  { %v4080_v35 = vmul.f32 0.01, %v4074_v23  ;;  %vm4078_vm4 = vcmp.gt.f32.partialorder %v4074_v23, 0.0 }
0x1b57   :  { %vm4077_vm7 = vcmp.gt.f32.partialorder %v4069_v31, 0.0  ;;  %v4079_v49 = vmul.f32 0.01, %v4069_v31 }
0x1b58   :  { %v4082_v20 = vsel %vm4078_vm4, %v4074_v23, %v4080_v35 }
0x1b59   :  { %v4081_v30 = vsel %vm4077_vm7, %v4069_v31, %v4079_v49 }
0x1b5a   :  { %4496 = vmatprep.mubr.msk.f32.mxu1 %vm4094_vm8, %v4081_v30 }
0x1b5b   :  { %4497 = vmatmul.mubr.msk.f32.vlgmr.msra.gmra.mrb[54].mxu1 %vm4094_vm8, %v4082_v20 }
0x1c2e   :  { %v4498_v32 = vpop.f32.mrb[54].mxu1 }
0x1c2f   :  { %v4173_v39 = vadd.f32 %v4498_v32, %v4448_v6  ;;  %v4167_v22 = vpop.f32.mrb[55].mxu1 }
0x1c30   :  { %v4168_v29 = vadd.f32 %v4448_v6, %v4167_v22 }
0x1c31   :  { %v4452_v3 = vmul.f32 -1.442695, %v4173_v39 }
0x1c32   :  { %v4451_v48 = vmul.f32 -1.442695, %v4168_v29 }
0x1c33   :  { %5108 = vpow2.f32 %v4452_v3 }
0x1c34   :  { %5110 = vpow2.f32 %v4451_v48 }
0x1c3d   :  { %v5109_v60 = vpop.eup %5108 }
0x1c3e   :  { %v5111_v21 = vpop.eup %5110  ;;  %v4183_v58 = vadd.f32 1.0, %v5109_v60 }
0x1c3f   :  { %v4182_v25 = vadd.f32 1.0, %v5111_v21 }
0x1c40   :  { %5112 = vrcp.f32 %v4183_v58 }
0x1c41   :  { %5114 = vrcp.f32 %v4182_v25 }
0x1c4a   :  { %v5113_v33 = vpop.eup %5112 }
0x1c4b   :  { %v5115_v15 = vpop.eup %5114  ;;  %4190 = vst.msk [vmem:[%s7074_s13 + $0x8] sm:$0xff] %vm4188_vm9, %v5113_v33 }
0x1c4c   :  { %4189 = vst.msk [vmem:[%s7074_s13] sm:$0xff] %vm4188_vm9, %v5115_v15 }

</bundles_post_ra>
